<compile_context>
chip_gen: v6e
topology: v6e:2x2x1
jax: 0.10.0
libtpu: 0.0.40
codegen_flags: <defaults>
</compile_context>

<pallas_src>
import jax
import jax.numpy as jnp
from jax import lax
from jax.experimental import pallas as pl
from jax.experimental.pallas import tpu as pltpu

EPS = 1e-5
LANES = 128
_TAPS = tuple((dy, dx) for dy in range(3) for dx in range(3))


def _round_up(x, m):
    return (x + m - 1) // m * m


# ------------------------------ Pallas kernel -------------------------------

def _basic_block_kernel(xp_ref, w1_ref, b1_ref, w2_ref, wds_ref, b2_ref,
                        o_ref, h_ref):
    # xp_ref : (1, H+2, W+2, Cin_p)  bf16  spatially padded input tile
    # w1_ref : (9, Cin_p,  Cout_p)   bf16  conv1 weights, BN1 scale folded in
    # b1_ref : (1, Cout_p)           f32   BN1 bias
    # w2_ref : (9, Cout_p, Cout_p)   bf16  conv2 weights, BN2 scale folded in
    # wds_ref: (Cin_p, Cout_p)       bf16  1x1 downsample, BNds scale folded in
    # b2_ref : (1, Cout_p)           f32   BN2 bias + BNds bias
    # o_ref  : (1, H, W, Cout_p)     f32
    # h_ref  : (H+2, W+2, Cout_p)    f32   VMEM scratch for the intermediate
    _, H, W, Cp = o_ref.shape
    HW = H * W

    xw = xp_ref[0]                       # one VMEM load of the halo'd tile

    # ---- conv1 (3x3) as 9 shifted MXU matmuls + bias + ReLU ---------------
    acc = jnp.zeros((HW, Cp), jnp.float32)
    for t, (dy, dx) in enumerate(_TAPS):
        lhs = xw[dy:dy + H, dx:dx + W, :].reshape(HW, -1)
        acc = acc + jnp.dot(lhs, w1_ref[t], preferred_element_type=jnp.float32)
    h = jnp.maximum(acc + b1_ref[...], 0.0)      # BN1 scale already in w1

    # keep the intermediate in VMEM with a zero halo (no HBM round-trip)
    h_ref[...] = jnp.zeros_like(h_ref)
    h_ref[1:H + 1, 1:W + 1, :] = h.reshape(H, W, Cp)
    hw = h_ref[...]

    # ---- conv2 (3x3) + fused 1x1 downsample + residual + ReLU -------------
    acc2 = jnp.zeros((HW, Cp), jnp.float32)
    for t, (dy, dx) in enumerate(_TAPS):
        lhs = hw[dy:dy + H, dx:dx + W, :].reshape(HW, Cp).astype(jnp.bfloat16)
        acc2 = acc2 + jnp.dot(lhs, w2_ref[t], preferred_element_type=jnp.float32)
    # 1x1 downsample on the (un-padded) input: after channel padding this is a
    # full 128-deep MXU pass just like a conv tap.
    xc = xw[1:H + 1, 1:W + 1, :].reshape(HW, -1)
    acc2 = acc2 + jnp.dot(xc, wds_ref[...], preferred_element_type=jnp.float32)

    o_ref[0] = jnp.maximum(acc2 + b2_ref[...], 0.0).reshape(H, W, Cp)


# -------------------------------- JAX glue ----------------------------------

def _fold_bn(bn_params):
    gamma, beta, mean, var = bn_params
    s = gamma / jnp.sqrt(var + EPS)
    return s, beta - mean * s


def _prep_3x3(w, scale, cin_p, cout_p):
    # (Cout, Cin, 3, 3) -> (9, Cin_p, Cout_p), BN scale folded along Cout.
    cout, cin = w.shape[0], w.shape[1]
    wr = jnp.transpose(w, (2, 3, 1, 0)).reshape(9, cin, cout) * scale[None, None, :]
    wr = jnp.pad(wr, ((0, 0), (0, cin_p - cin), (0, cout_p - cout)))
    return wr.astype(jnp.bfloat16)


def basic_block_forward(x_nchw, params):
    N, Cin, H, W = x_nchw.shape
    Cout = params["w1"].shape[0]
    Cin_p = _round_up(Cin, LANES)
    Cout_p = _round_up(Cout, LANES)
    Hp, Wp = H + 2, W + 2

    # NHWC, spatial pad 1, channel pad to 128 -> lane-dense bf16 input stream.
    x_nhwc = jnp.transpose(x_nchw, (0, 2, 3, 1)).astype(jnp.float32)
    xp = jnp.pad(x_nhwc, ((0, 0), (1, 1), (1, 1), (0, Cin_p - Cin)))
    xp = xp.astype(jnp.bfloat16)

    s1, b1 = _fold_bn(params["bn1"])
    s2, b2 = _fold_bn(params["bn2"])
    sds, bds = _fold_bn(params["bnds"])

    w1r = _prep_3x3(params["w1"], s1, Cin_p, Cout_p)
    w2r = _prep_3x3(params["w2"], s2, Cout_p, Cout_p)
    wdsr = params["wds"][:, :, 0, 0].T * sds[None, :]
    wdsr = jnp.pad(wdsr, ((0, Cin_p - Cin), (0, Cout_p - Cout))).astype(jnp.bfloat16)

    b1p = jnp.pad(b1, (0, Cout_p - Cout)).reshape(1, Cout_p).astype(jnp.float32)
    b2p = jnp.pad(b2 + bds, (0, Cout_p - Cout)).reshape(1, Cout_p).astype(jnp.float32)

    # cost hint: 9-tap conv1 + 9-tap conv2 + 1x1 downsample (padded channels)
    M = N * H * W
    flops = 2 * M * Cout_p * (9 * Cin_p + 9 * Cout_p + Cin_p)
    bytes_accessed = (xp.size * 2 + (w1r.size + w2r.size + wdsr.size) * 2
                      + (b1p.size + b2p.size) * 4 + M * Cout_p * 4)

    # per-step VMEM footprint: double-buffered in/out tiles + resident weights
    # + h scratch + f32 accumulators; keep the limit modest so it fits v7x too.
    vmem_est = (2 * Hp * Wp * Cin_p * 2            # input block (x2 buffers)
                + 2 * H * W * Cout_p * 4           # output block (x2 buffers)
                + Hp * Wp * Cout_p * 4             # h scratch
                + 2 * H * W * Cout_p * 4           # accumulators
                + (w1r.size + w2r.size + wdsr.size) * 2)
    vmem_limit = int(min(max(2 * vmem_est, 16 * 2**20), 48 * 2**20))

    out_p = pl.pallas_call(
        _basic_block_kernel,
        out_shape=jax.ShapeDtypeStruct((N, H, W, Cout_p), jnp.float32),
        grid=(N,),
        in_specs=[
            pl.BlockSpec((1, Hp, Wp, Cin_p), lambda n: (n, 0, 0, 0)),   # xp
            pl.BlockSpec((9, Cin_p, Cout_p), lambda n: (0, 0, 0)),      # w1 (resident)
            pl.BlockSpec((1, Cout_p), lambda n: (0, 0)),                # b1
            pl.BlockSpec((9, Cout_p, Cout_p), lambda n: (0, 0, 0)),     # w2 (resident)
            pl.BlockSpec((Cin_p, Cout_p), lambda n: (0, 0)),            # wds
            pl.BlockSpec((1, Cout_p), lambda n: (0, 0)),                # b2+bds
        ],
        out_specs=pl.BlockSpec((1, H, W, Cout_p), lambda n: (n, 0, 0, 0)),
        scratch_shapes=[pltpu.VMEM((Hp, Wp, Cout_p), jnp.float32)],
        compiler_params=pltpu.CompilerParams(
            dimension_semantics=("parallel",),
            vmem_limit_bytes=vmem_limit),
        cost_estimate=pl.CostEstimate(flops=flops, transcendentals=0,
                                      bytes_accessed=bytes_accessed),
    )(xp, w1r, b1p, w2r, wdsr, b2p)

    y = out_p[..., :Cout]                        # drop channel padding
    return jnp.transpose(y, (0, 3, 1, 2))        # back to NCHW


# ----------------------- deterministic parameter init -----------------------

def init_params(key, in_channels, out_channels):
    k1, k2, k3 = jax.random.split(key, 3)
    w1 = 0.2 * jax.random.normal(k1, (out_channels, in_channels, 3, 3), jnp.float32)
    w2 = 0.2 * jax.random.normal(k2, (out_channels, out_channels, 3, 3), jnp.float32)
    wds = 0.2 * jax.random.normal(k3, (out_channels, in_channels, 1, 1), jnp.float32)

    def bn(c, o):
        idx = jnp.arange(c, dtype=jnp.float32)
        gamma = 1.0 + 0.05 * idx
        beta = 0.02 * idx - 0.03 * o
        mean = 0.01 * idx
        var = 1.0 + 0.03 * idx
        return (gamma, beta, mean, var)

    return {
        "w1": w1, "bn1": bn(out_channels, 0.0),
        "w2": w2, "bn2": bn(out_channels, 1.0),
        "wds": wds, "bnds": bn(out_channels, 2.0),
    }


# ------------------------------ pure-JAX reference --------------------------

def reference_forward(x, params):
    def conv(x, w, pad):
        return lax.conv_general_dilated(
            x, w, window_strides=(1, 1), padding=((pad, pad), (pad, pad)),
            dimension_numbers=("NCHW", "OIHW", "NCHW"),
            precision=lax.Precision.HIGHEST)

    def bn(x, p):
        gamma, beta, mean, var = p
        s = gamma / jnp.sqrt(var + EPS)
        b = beta - mean * s
        return x * s[None, :, None, None] + b[None, :, None, None]

    h = jax.nn.relu(bn(conv(x, params["w1"], 1), params["bn1"]))
    y = bn(conv(h, params["w2"], 1), params["bn2"])
    i = bn(conv(x, params["wds"], 0), params["bnds"])
    return jax.nn.relu(y + i)


if __name__ == "__main__":
    key = jax.random.PRNGKey(0)
    k_x, k_p = jax.random.split(key)

    N, Cin, Cout, H, W = 2, 4, 8, 16, 16   # in_ch=4, out_ch=8, stride=1, downsample=True
    x = jax.random.normal(k_x, (N, Cin, H, W), jnp.float32)
    params = init_params(k_p, Cin, Cout)

    fwd = jax.jit(basic_block_forward)
    out = fwd(x, params)
    jax.block_until_ready(out)

    assert out.shape == (N, Cout, H, W), out.shape
    ref = reference_forward(x, params)
    max_err = float(jnp.max(jnp.abs(out - ref)))
    # bf16 MXU inputs with f32 accumulation: allow bf16-level error vs f32 ref.
    if max_err > 1e-1:
        raise AssertionError(f"mismatch vs reference: max abs err = {max_err}")

    print("KERNEL_OK")
</pallas_src>

<mosaic_0001>
module attributes {stable_mosaic.version = 11 : i64} {
  func.func @_basic_block_kernel(%arg0: i32, %arg1: memref<1x18x18x128xbf16, #tpu.memory_space<vmem>>, %arg2: memref<9x128x128xbf16, #tpu.memory_space<vmem>>, %arg3: memref<1x128xf32, #tpu.memory_space<vmem>>, %arg4: memref<9x128x128xbf16, #tpu.memory_space<vmem>>, %arg5: memref<128x128xbf16, #tpu.memory_space<vmem>>, %arg6: memref<1x128xf32, #tpu.memory_space<vmem>>, %arg7: memref<1x16x16x128xf32, #tpu.memory_space<vmem>>, %arg8: memref<18x18x128xf32, #tpu.memory_space<vmem>>) attributes {dimension_semantics = [#tpu.dimension_semantics<parallel>], iteration_bounds = array<i64: 2>, scalar_prefetch = 0 : i64, scratch_operands = 1 : i64, tpu.core_type = #tpu.core_type<tc>, window_params = [{transform_indices = @transform_0, window_bounds = array<i64: 1, 18, 18, 128>}, {pipeline_mode = #tpu.pipeline_mode<synchronous>, transform_indices = @transform_1, window_bounds = array<i64: 9, 128, 128>}, {pipeline_mode = #tpu.pipeline_mode<synchronous>, transform_indices = @transform_2, window_bounds = array<i64: 1, 128>}, {pipeline_mode = #tpu.pipeline_mode<synchronous>, transform_indices = @transform_3, window_bounds = array<i64: 9, 128, 128>}, {pipeline_mode = #tpu.pipeline_mode<synchronous>, transform_indices = @transform_4, window_bounds = array<i64: 128, 128>}, {pipeline_mode = #tpu.pipeline_mode<synchronous>, transform_indices = @transform_5, window_bounds = array<i64: 1, 128>}, {transform_indices = @transform_6, window_bounds = array<i64: 1, 16, 16, 128>}]} {
    %c0 = arith.constant 0 : index
    %c0_0 = arith.constant 0 : index
    %c0_1 = arith.constant 0 : index
    %c0_2 = arith.constant 0 : index
    %0 = vector.load %arg1[%c0, %c0_0, %c0_1, %c0_2] : memref<1x18x18x128xbf16, #tpu.memory_space<vmem>>, vector<1x18x18x128xbf16>
    %1 = vector.shape_cast %0 : vector<1x18x18x128xbf16> to vector<18x18x128xbf16>
    %cst = arith.constant 0.000000e+00 : f32
    %2 = vector.broadcast %cst : f32 to vector<256x128xf32>
    %3 = vector.extract_strided_slice %1 {offsets = [0, 0, 0], sizes = [16, 16, 128], strides = [1, 1, 1]} : vector<18x18x128xbf16> to vector<16x16x128xbf16>
    %4 = vector.shape_cast %3 : vector<16x16x128xbf16> to vector<256x128xbf16>
    %c0_3 = arith.constant 0 : index
    %c0_4 = arith.constant 0 : index
    %c0_5 = arith.constant 0 : index
    %5 = vector.load %arg2[%c0_3, %c0_4, %c0_5] : memref<9x128x128xbf16, #tpu.memory_space<vmem>>, vector<1x128x128xbf16>
    %6 = vector.shape_cast %5 : vector<1x128x128xbf16> to vector<128x128xbf16>
    %cst_6 = arith.constant dense<0.000000e+00> : vector<256x128xf32>
    %7 = tpu.matmul %4, %6, %cst_6 {dimension_numbers = #tpu.dot_dimension_numbers<[1], [0], [0], [1], [0, 0, 1, 1], [], []>} : vector<256x128xbf16>, vector<128x128xbf16>, vector<256x128xf32> -> vector<256x128xf32>
    %8 = arith.addf %2, %7 : vector<256x128xf32>
    %9 = vector.extract_strided_slice %1 {offsets = [0, 1, 0], sizes = [16, 16, 128], strides = [1, 1, 1]} : vector<18x18x128xbf16> to vector<16x16x128xbf16>
    %10 = vector.shape_cast %9 : vector<16x16x128xbf16> to vector<256x128xbf16>
    %c1 = arith.constant 1 : index
    %c0_7 = arith.constant 0 : index
    %c0_8 = arith.constant 0 : index
    %11 = vector.load %arg2[%c1, %c0_7, %c0_8] : memref<9x128x128xbf16, #tpu.memory_space<vmem>>, vector<1x128x128xbf16>
    %12 = vector.shape_cast %11 : vector<1x128x128xbf16> to vector<128x128xbf16>
    %cst_9 = arith.constant dense<0.000000e+00> : vector<256x128xf32>
    %13 = tpu.matmul %10, %12, %cst_9 {dimension_numbers = #tpu.dot_dimension_numbers<[1], [0], [0], [1], [0, 0, 1, 1], [], []>} : vector<256x128xbf16>, vector<128x128xbf16>, vector<256x128xf32> -> vector<256x128xf32>
    %14 = arith.addf %8, %13 : vector<256x128xf32>
    %15 = vector.extract_strided_slice %1 {offsets = [0, 2, 0], sizes = [16, 16, 128], strides = [1, 1, 1]} : vector<18x18x128xbf16> to vector<16x16x128xbf16>
    %16 = vector.shape_cast %15 : vector<16x16x128xbf16> to vector<256x128xbf16>
    %c2 = arith.constant 2 : index
    %c0_10 = arith.constant 0 : index
    %c0_11 = arith.constant 0 : index
    %17 = vector.load %arg2[%c2, %c0_10, %c0_11] : memref<9x128x128xbf16, #tpu.memory_space<vmem>>, vector<1x128x128xbf16>
    %18 = vector.shape_cast %17 : vector<1x128x128xbf16> to vector<128x128xbf16>
    %cst_12 = arith.constant dense<0.000000e+00> : vector<256x128xf32>
    %19 = tpu.matmul %16, %18, %cst_12 {dimension_numbers = #tpu.dot_dimension_numbers<[1], [0], [0], [1], [0, 0, 1, 1], [], []>} : vector<256x128xbf16>, vector<128x128xbf16>, vector<256x128xf32> -> vector<256x128xf32>
    %20 = arith.addf %14, %19 : vector<256x128xf32>
    %21 = vector.extract_strided_slice %1 {offsets = [1, 0, 0], sizes = [16, 16, 128], strides = [1, 1, 1]} : vector<18x18x128xbf16> to vector<16x16x128xbf16>
    %22 = vector.shape_cast %21 : vector<16x16x128xbf16> to vector<256x128xbf16>
    %c3 = arith.constant 3 : index
    %c0_13 = arith.constant 0 : index
    %c0_14 = arith.constant 0 : index
    %23 = vector.load %arg2[%c3, %c0_13, %c0_14] : memref<9x128x128xbf16, #tpu.memory_space<vmem>>, vector<1x128x128xbf16>
    %24 = vector.shape_cast %23 : vector<1x128x128xbf16> to vector<128x128xbf16>
    %cst_15 = arith.constant dense<0.000000e+00> : vector<256x128xf32>
    %25 = tpu.matmul %22, %24, %cst_15 {dimension_numbers = #tpu.dot_dimension_numbers<[1], [0], [0], [1], [0, 0, 1, 1], [], []>} : vector<256x128xbf16>, vector<128x128xbf16>, vector<256x128xf32> -> vector<256x128xf32>
    %26 = arith.addf %20, %25 : vector<256x128xf32>
    %27 = vector.extract_strided_slice %1 {offsets = [1, 1, 0], sizes = [16, 16, 128], strides = [1, 1, 1]} : vector<18x18x128xbf16> to vector<16x16x128xbf16>
    %28 = vector.shape_cast %27 : vector<16x16x128xbf16> to vector<256x128xbf16>
    %c4 = arith.constant 4 : index
    %c0_16 = arith.constant 0 : index
    %c0_17 = arith.constant 0 : index
    %29 = vector.load %arg2[%c4, %c0_16, %c0_17] : memref<9x128x128xbf16, #tpu.memory_space<vmem>>, vector<1x128x128xbf16>
    %30 = vector.shape_cast %29 : vector<1x128x128xbf16> to vector<128x128xbf16>
    %cst_18 = arith.constant dense<0.000000e+00> : vector<256x128xf32>
    %31 = tpu.matmul %28, %30, %cst_18 {dimension_numbers = #tpu.dot_dimension_numbers<[1], [0], [0], [1], [0, 0, 1, 1], [], []>} : vector<256x128xbf16>, vector<128x128xbf16>, vector<256x128xf32> -> vector<256x128xf32>
    %32 = arith.addf %26, %31 : vector<256x128xf32>
    %33 = vector.extract_strided_slice %1 {offsets = [1, 2, 0], sizes = [16, 16, 128], strides = [1, 1, 1]} : vector<18x18x128xbf16> to vector<16x16x128xbf16>
    %34 = vector.shape_cast %33 : vector<16x16x128xbf16> to vector<256x128xbf16>
    %c5 = arith.constant 5 : index
    %c0_19 = arith.constant 0 : index
    %c0_20 = arith.constant 0 : index
    %35 = vector.load %arg2[%c5, %c0_19, %c0_20] : memref<9x128x128xbf16, #tpu.memory_space<vmem>>, vector<1x128x128xbf16>
    %36 = vector.shape_cast %35 : vector<1x128x128xbf16> to vector<128x128xbf16>
    %cst_21 = arith.constant dense<0.000000e+00> : vector<256x128xf32>
    %37 = tpu.matmul %34, %36, %cst_21 {dimension_numbers = #tpu.dot_dimension_numbers<[1], [0], [0], [1], [0, 0, 1, 1], [], []>} : vector<256x128xbf16>, vector<128x128xbf16>, vector<256x128xf32> -> vector<256x128xf32>
    %38 = arith.addf %32, %37 : vector<256x128xf32>
    %39 = vector.extract_strided_slice %1 {offsets = [2, 0, 0], sizes = [16, 16, 128], strides = [1, 1, 1]} : vector<18x18x128xbf16> to vector<16x16x128xbf16>
    %40 = vector.shape_cast %39 : vector<16x16x128xbf16> to vector<256x128xbf16>
    %c6 = arith.constant 6 : index
    %c0_22 = arith.constant 0 : index
    %c0_23 = arith.constant 0 : index
    %41 = vector.load %arg2[%c6, %c0_22, %c0_23] : memref<9x128x128xbf16, #tpu.memory_space<vmem>>, vector<1x128x128xbf16>
    %42 = vector.shape_cast %41 : vector<1x128x128xbf16> to vector<128x128xbf16>
    %cst_24 = arith.constant dense<0.000000e+00> : vector<256x128xf32>
    %43 = tpu.matmul %40, %42, %cst_24 {dimension_numbers = #tpu.dot_dimension_numbers<[1], [0], [0], [1], [0, 0, 1, 1], [], []>} : vector<256x128xbf16>, vector<128x128xbf16>, vector<256x128xf32> -> vector<256x128xf32>
    %44 = arith.addf %38, %43 : vector<256x128xf32>
    %45 = vector.extract_strided_slice %1 {offsets = [2, 1, 0], sizes = [16, 16, 128], strides = [1, 1, 1]} : vector<18x18x128xbf16> to vector<16x16x128xbf16>
    %46 = vector.shape_cast %45 : vector<16x16x128xbf16> to vector<256x128xbf16>
    %c7 = arith.constant 7 : index
    %c0_25 = arith.constant 0 : index
    %c0_26 = arith.constant 0 : index
    %47 = vector.load %arg2[%c7, %c0_25, %c0_26] : memref<9x128x128xbf16, #tpu.memory_space<vmem>>, vector<1x128x128xbf16>
    %48 = vector.shape_cast %47 : vector<1x128x128xbf16> to vector<128x128xbf16>
    %cst_27 = arith.constant dense<0.000000e+00> : vector<256x128xf32>
    %49 = tpu.matmul %46, %48, %cst_27 {dimension_numbers = #tpu.dot_dimension_numbers<[1], [0], [0], [1], [0, 0, 1, 1], [], []>} : vector<256x128xbf16>, vector<128x128xbf16>, vector<256x128xf32> -> vector<256x128xf32>
    %50 = arith.addf %44, %49 : vector<256x128xf32>
    %51 = vector.extract_strided_slice %1 {offsets = [2, 2, 0], sizes = [16, 16, 128], strides = [1, 1, 1]} : vector<18x18x128xbf16> to vector<16x16x128xbf16>
    %52 = vector.shape_cast %51 : vector<16x16x128xbf16> to vector<256x128xbf16>
    %c8 = arith.constant 8 : index
    %c0_28 = arith.constant 0 : index
    %c0_29 = arith.constant 0 : index
    %53 = vector.load %arg2[%c8, %c0_28, %c0_29] : memref<9x128x128xbf16, #tpu.memory_space<vmem>>, vector<1x128x128xbf16>
    %54 = vector.shape_cast %53 : vector<1x128x128xbf16> to vector<128x128xbf16>
    %cst_30 = arith.constant dense<0.000000e+00> : vector<256x128xf32>
    %55 = tpu.matmul %52, %54, %cst_30 {dimension_numbers = #tpu.dot_dimension_numbers<[1], [0], [0], [1], [0, 0, 1, 1], [], []>} : vector<256x128xbf16>, vector<128x128xbf16>, vector<256x128xf32> -> vector<256x128xf32>
    %56 = arith.addf %50, %55 : vector<256x128xf32>
    %c0_31 = arith.constant 0 : index
    %c0_32 = arith.constant 0 : index
    %57 = vector.load %arg3[%c0_31, %c0_32] : memref<1x128xf32, #tpu.memory_space<vmem>>, vector<1x128xf32>
    %58 = vector.broadcast %57 : vector<1x128xf32> to vector<256x128xf32>
    %59 = arith.addf %56, %58 : vector<256x128xf32>
    %cst_33 = arith.constant 0.000000e+00 : f32
    %60 = vector.broadcast %cst_33 : f32 to vector<256x128xf32>
    %61 = arith.maximumf %59, %60 : vector<256x128xf32>
    %cst_34 = arith.constant 0.000000e+00 : f32
    %62 = vector.broadcast %cst_34 : f32 to vector<18x18x128xf32>
    %c0_35 = arith.constant 0 : index
    %c0_36 = arith.constant 0 : index
    %c0_37 = arith.constant 0 : index
    %63 = vector.load %arg8[%c0_35, %c0_36, %c0_37] : memref<18x18x128xf32, #tpu.memory_space<vmem>>, vector<18x18x128xf32>
    tpu.vector_store %arg8[%c0_35, %c0_36, %c0_37], %62 {strides = array<i32>} : memref<18x18x128xf32, #tpu.memory_space<vmem>>, vector<18x18x128xf32>,
    %64 = vector.shape_cast %61 : vector<256x128xf32> to vector<16x16x128xf32>
    %c1_38 = arith.constant 1 : index
    %c1_39 = arith.constant 1 : index
    %c0_40 = arith.constant 0 : index
    %65 = vector.load %arg8[%c1_38, %c1_39, %c0_40] : memref<18x18x128xf32, #tpu.memory_space<vmem>>, vector<16x16x128xf32>
    tpu.vector_store %arg8[%c1_38, %c1_39, %c0_40], %64 {strides = array<i32>} : memref<18x18x128xf32, #tpu.memory_space<vmem>>, vector<16x16x128xf32>,
    %c0_41 = arith.constant 0 : index
    %c0_42 = arith.constant 0 : index
    %c0_43 = arith.constant 0 : index
    %66 = vector.load %arg8[%c0_41, %c0_42, %c0_43] : memref<18x18x128xf32, #tpu.memory_space<vmem>>, vector<18x18x128xf32>
    %cst_44 = arith.constant 0.000000e+00 : f32
    %67 = vector.broadcast %cst_44 : f32 to vector<256x128xf32>
    %68 = vector.extract_strided_slice %66 {offsets = [0, 0, 0], sizes = [16, 16, 128], strides = [1, 1, 1]} : vector<18x18x128xf32> to vector<16x16x128xf32>
    %69 = vector.shape_cast %68 : vector<16x16x128xf32> to vector<256x128xf32>
    %70 = arith.truncf %69 : vector<256x128xf32> to vector<256x128xbf16>
    %c0_45 = arith.constant 0 : index
    %c0_46 = arith.constant 0 : index
    %c0_47 = arith.constant 0 : index
    %71 = vector.load %arg4[%c0_45, %c0_46, %c0_47] : memref<9x128x128xbf16, #tpu.memory_space<vmem>>, vector<1x128x128xbf16>
    %72 = vector.shape_cast %71 : vector<1x128x128xbf16> to vector<128x128xbf16>
    %cst_48 = arith.constant dense<0.000000e+00> : vector<256x128xf32>
    %73 = tpu.matmul %70, %72, %cst_48 {dimension_numbers = #tpu.dot_dimension_numbers<[1], [0], [0], [1], [0, 0, 1, 1], [], []>} : vector<256x128xbf16>, vector<128x128xbf16>, vector<256x128xf32> -> vector<256x128xf32>
    %74 = arith.addf %67, %73 : vector<256x128xf32>
    %75 = vector.extract_strided_slice %66 {offsets = [0, 1, 0], sizes = [16, 16, 128], strides = [1, 1, 1]} : vector<18x18x128xf32> to vector<16x16x128xf32>
    %76 = vector.shape_cast %75 : vector<16x16x128xf32> to vector<256x128xf32>
    %77 = arith.truncf %76 : vector<256x128xf32> to vector<256x128xbf16>
    %c1_49 = arith.constant 1 : index
    %c0_50 = arith.constant 0 : index
    %c0_51 = arith.constant 0 : index
    %78 = vector.load %arg4[%c1_49, %c0_50, %c0_51] : memref<9x128x128xbf16, #tpu.memory_space<vmem>>, vector<1x128x128xbf16>
    %79 = vector.shape_cast %78 : vector<1x128x128xbf16> to vector<128x128xbf16>
    %cst_52 = arith.constant dense<0.000000e+00> : vector<256x128xf32>
    %80 = tpu.matmul %77, %79, %cst_52 {dimension_numbers = #tpu.dot_dimension_numbers<[1], [0], [0], [1], [0, 0, 1, 1], [], []>} : vector<256x128xbf16>, vector<128x128xbf16>, vector<256x128xf32> -> vector<256x128xf32>
    %81 = arith.addf %74, %80 : vector<256x128xf32>
    %82 = vector.extract_strided_slice %66 {offsets = [0, 2, 0], sizes = [16, 16, 128], strides = [1, 1, 1]} : vector<18x18x128xf32> to vector<16x16x128xf32>
    %83 = vector.shape_cast %82 : vector<16x16x128xf32> to vector<256x128xf32>
    %84 = arith.truncf %83 : vector<256x128xf32> to vector<256x128xbf16>
    %c2_53 = arith.constant 2 : index
    %c0_54 = arith.constant 0 : index
    %c0_55 = arith.constant 0 : index
    %85 = vector.load %arg4[%c2_53, %c0_54, %c0_55] : memref<9x128x128xbf16, #tpu.memory_space<vmem>>, vector<1x128x128xbf16>
    %86 = vector.shape_cast %85 : vector<1x128x128xbf16> to vector<128x128xbf16>
    %cst_56 = arith.constant dense<0.000000e+00> : vector<256x128xf32>
    %87 = tpu.matmul %84, %86, %cst_56 {dimension_numbers = #tpu.dot_dimension_numbers<[1], [0], [0], [1], [0, 0, 1, 1], [], []>} : vector<256x128xbf16>, vector<128x128xbf16>, vector<256x128xf32> -> vector<256x128xf32>
    %88 = arith.addf %81, %87 : vector<256x128xf32>
    %89 = vector.extract_strided_slice %66 {offsets = [1, 0, 0], sizes = [16, 16, 128], strides = [1, 1, 1]} : vector<18x18x128xf32> to vector<16x16x128xf32>
    %90 = vector.shape_cast %89 : vector<16x16x128xf32> to vector<256x128xf32>
    %91 = arith.truncf %90 : vector<256x128xf32> to vector<256x128xbf16>
    %c3_57 = arith.constant 3 : index
    %c0_58 = arith.constant 0 : index
    %c0_59 = arith.constant 0 : index
    %92 = vector.load %arg4[%c3_57, %c0_58, %c0_59] : memref<9x128x128xbf16, #tpu.memory_space<vmem>>, vector<1x128x128xbf16>
    %93 = vector.shape_cast %92 : vector<1x128x128xbf16> to vector<128x128xbf16>
    %cst_60 = arith.constant dense<0.000000e+00> : vector<256x128xf32>
    %94 = tpu.matmul %91, %93, %cst_60 {dimension_numbers = #tpu.dot_dimension_numbers<[1], [0], [0], [1], [0, 0, 1, 1], [], []>} : vector<256x128xbf16>, vector<128x128xbf16>, vector<256x128xf32> -> vector<256x128xf32>
    %95 = arith.addf %88, %94 : vector<256x128xf32>
    %96 = vector.extract_strided_slice %66 {offsets = [1, 1, 0], sizes = [16, 16, 128], strides = [1, 1, 1]} : vector<18x18x128xf32> to vector<16x16x128xf32>
    %97 = vector.shape_cast %96 : vector<16x16x128xf32> to vector<256x128xf32>
    %98 = arith.truncf %97 : vector<256x128xf32> to vector<256x128xbf16>
    %c4_61 = arith.constant 4 : index
    %c0_62 = arith.constant 0 : index
    %c0_63 = arith.constant 0 : index
    %99 = vector.load %arg4[%c4_61, %c0_62, %c0_63] : memref<9x128x128xbf16, #tpu.memory_space<vmem>>, vector<1x128x128xbf16>
    %100 = vector.shape_cast %99 : vector<1x128x128xbf16> to vector<128x128xbf16>
    %cst_64 = arith.constant dense<0.000000e+00> : vector<256x128xf32>
    %101 = tpu.matmul %98, %100, %cst_64 {dimension_numbers = #tpu.dot_dimension_numbers<[1], [0], [0], [1], [0, 0, 1, 1], [], []>} : vector<256x128xbf16>, vector<128x128xbf16>, vector<256x128xf32> -> vector<256x128xf32>
    %102 = arith.addf %95, %101 : vector<256x128xf32>
    %103 = vector.extract_strided_slice %66 {offsets = [1, 2, 0], sizes = [16, 16, 128], strides = [1, 1, 1]} : vector<18x18x128xf32> to vector<16x16x128xf32>
    %104 = vector.shape_cast %103 : vector<16x16x128xf32> to vector<256x128xf32>
    %105 = arith.truncf %104 : vector<256x128xf32> to vector<256x128xbf16>
    %c5_65 = arith.constant 5 : index
    %c0_66 = arith.constant 0 : index
    %c0_67 = arith.constant 0 : index
    %106 = vector.load %arg4[%c5_65, %c0_66, %c0_67] : memref<9x128x128xbf16, #tpu.memory_space<vmem>>, vector<1x128x128xbf16>
    %107 = vector.shape_cast %106 : vector<1x128x128xbf16> to vector<128x128xbf16>
    %cst_68 = arith.constant dense<0.000000e+00> : vector<256x128xf32>
    %108 = tpu.matmul %105, %107, %cst_68 {dimension_numbers = #tpu.dot_dimension_numbers<[1], [0], [0], [1], [0, 0, 1, 1], [], []>} : vector<256x128xbf16>, vector<128x128xbf16>, vector<256x128xf32> -> vector<256x128xf32>
    %109 = arith.addf %102, %108 : vector<256x128xf32>
    %110 = vector.extract_strided_slice %66 {offsets = [2, 0, 0], sizes = [16, 16, 128], strides = [1, 1, 1]} : vector<18x18x128xf32> to vector<16x16x128xf32>
    %111 = vector.shape_cast %110 : vector<16x16x128xf32> to vector<256x128xf32>
    %112 = arith.truncf %111 : vector<256x128xf32> to vector<256x128xbf16>
    %c6_69 = arith.constant 6 : index
    %c0_70 = arith.constant 0 : index
    %c0_71 = arith.constant 0 : index
    %113 = vector.load %arg4[%c6_69, %c0_70, %c0_71] : memref<9x128x128xbf16, #tpu.memory_space<vmem>>, vector<1x128x128xbf16>
    %114 = vector.shape_cast %113 : vector<1x128x128xbf16> to vector<128x128xbf16>
    %cst_72 = arith.constant dense<0.000000e+00> : vector<256x128xf32>
    %115 = tpu.matmul %112, %114, %cst_72 {dimension_numbers = #tpu.dot_dimension_numbers<[1], [0], [0], [1], [0, 0, 1, 1], [], []>} : vector<256x128xbf16>, vector<128x128xbf16>, vector<256x128xf32> -> vector<256x128xf32>
    %116 = arith.addf %109, %115 : vector<256x128xf32>
    %117 = vector.extract_strided_slice %66 {offsets = [2, 1, 0], sizes = [16, 16, 128], strides = [1, 1, 1]} : vector<18x18x128xf32> to vector<16x16x128xf32>
    %118 = vector.shape_cast %117 : vector<16x16x128xf32> to vector<256x128xf32>
    %119 = arith.truncf %118 : vector<256x128xf32> to vector<256x128xbf16>
    %c7_73 = arith.constant 7 : index
    %c0_74 = arith.constant 0 : index
    %c0_75 = arith.constant 0 : index
    %120 = vector.load %arg4[%c7_73, %c0_74, %c0_75] : memref<9x128x128xbf16, #tpu.memory_space<vmem>>, vector<1x128x128xbf16>
    %121 = vector.shape_cast %120 : vector<1x128x128xbf16> to vector<128x128xbf16>
    %cst_76 = arith.constant dense<0.000000e+00> : vector<256x128xf32>
    %122 = tpu.matmul %119, %121, %cst_76 {dimension_numbers = #tpu.dot_dimension_numbers<[1], [0], [0], [1], [0, 0, 1, 1], [], []>} : vector<256x128xbf16>, vector<128x128xbf16>, vector<256x128xf32> -> vector<256x128xf32>
    %123 = arith.addf %116, %122 : vector<256x128xf32>
    %124 = vector.extract_strided_slice %66 {offsets = [2, 2, 0], sizes = [16, 16, 128], strides = [1, 1, 1]} : vector<18x18x128xf32> to vector<16x16x128xf32>
    %125 = vector.shape_cast %124 : vector<16x16x128xf32> to vector<256x128xf32>
    %126 = arith.truncf %125 : vector<256x128xf32> to vector<256x128xbf16>
    %c8_77 = arith.constant 8 : index
    %c0_78 = arith.constant 0 : index
    %c0_79 = arith.constant 0 : index
    %127 = vector.load %arg4[%c8_77, %c0_78, %c0_79] : memref<9x128x128xbf16, #tpu.memory_space<vmem>>, vector<1x128x128xbf16>
    %128 = vector.shape_cast %127 : vector<1x128x128xbf16> to vector<128x128xbf16>
    %cst_80 = arith.constant dense<0.000000e+00> : vector<256x128xf32>
    %129 = tpu.matmul %126, %128, %cst_80 {dimension_numbers = #tpu.dot_dimension_numbers<[1], [0], [0], [1], [0, 0, 1, 1], [], []>} : vector<256x128xbf16>, vector<128x128xbf16>, vector<256x128xf32> -> vector<256x128xf32>
    %130 = arith.addf %123, %129 : vector<256x128xf32>
    %131 = vector.extract_strided_slice %1 {offsets = [1, 1, 0], sizes = [16, 16, 128], strides = [1, 1, 1]} : vector<18x18x128xbf16> to vector<16x16x128xbf16>
    %132 = vector.shape_cast %131 : vector<16x16x128xbf16> to vector<256x128xbf16>
    %c0_81 = arith.constant 0 : index
    %c0_82 = arith.constant 0 : index
    %133 = vector.load %arg5[%c0_81, %c0_82] : memref<128x128xbf16, #tpu.memory_space<vmem>>, vector<128x128xbf16>
    %cst_83 = arith.constant dense<0.000000e+00> : vector<256x128xf32>
    %134 = tpu.matmul %132, %133, %cst_83 {dimension_numbers = #tpu.dot_dimension_numbers<[1], [0], [0], [1], [0, 0, 1, 1], [], []>} : vector<256x128xbf16>, vector<128x128xbf16>, vector<256x128xf32> -> vector<256x128xf32>
    %135 = arith.addf %130, %134 : vector<256x128xf32>
    %c0_84 = arith.constant 0 : index
    %c0_85 = arith.constant 0 : index
    %136 = vector.load %arg6[%c0_84, %c0_85] : memref<1x128xf32, #tpu.memory_space<vmem>>, vector<1x128xf32>
    %137 = vector.broadcast %136 : vector<1x128xf32> to vector<256x128xf32>
    %138 = arith.addf %135, %137 : vector<256x128xf32>
    %cst_86 = arith.constant 0.000000e+00 : f32
    %139 = vector.broadcast %cst_86 : f32 to vector<256x128xf32>
    %140 = arith.maximumf %138, %139 : vector<256x128xf32>
    %141 = vector.shape_cast %140 : vector<256x128xf32> to vector<16x16x128xf32>
    %c0_87 = arith.constant 0 : index
    %c0_88 = arith.constant 0 : index
    %c0_89 = arith.constant 0 : index
    %c0_90 = arith.constant 0 : index
    %142 = vector.load %arg7[%c0_87, %c0_88, %c0_89, %c0_90] : memref<1x16x16x128xf32, #tpu.memory_space<vmem>>, vector<1x16x16x128xf32>
    %143 = vector.shape_cast %142 : vector<1x16x16x128xf32> to vector<16x16x128xf32>
    %144 = vector.shape_cast %141 : vector<16x16x128xf32> to vector<1x16x16x128xf32>
    tpu.vector_store %arg7[%c0_87, %c0_88, %c0_89, %c0_90], %144 {strides = array<i32>} : memref<1x16x16x128xf32, #tpu.memory_space<vmem>>, vector<1x16x16x128xf32>,
    return
  }
  func.func @transform_0(%arg0: i32) -> (i32, i32, i32, i32) {
    %c0_i32 = arith.constant 0 : i32
    %c0_i32_0 = arith.constant 0 : i32
    %c0_i32_1 = arith.constant 0 : i32
    %c0_i32_2 = arith.constant 0 : i32
    return %arg0, %c0_i32, %c0_i32_0, %c0_i32_1 : i32, i32, i32, i32
  }
  func.func @transform_1(%arg0: i32) -> (i32, i32, i32) {
    %c0_i32 = arith.constant 0 : i32
    %c0_i32_0 = arith.constant 0 : i32
    %c0_i32_1 = arith.constant 0 : i32
    %c0_i32_2 = arith.constant 0 : i32
    return %c0_i32, %c0_i32_0, %c0_i32_1 : i32, i32, i32
  }
  func.func @transform_2(%arg0: i32) -> (i32, i32) {
    %c0_i32 = arith.constant 0 : i32
    %c0_i32_0 = arith.constant 0 : i32
    %c0_i32_1 = arith.constant 0 : i32
    return %c0_i32, %c0_i32_0 : i32, i32
  }
  func.func @transform_3(%arg0: i32) -> (i32, i32, i32) {
    %c0_i32 = arith.constant 0 : i32
    %c0_i32_0 = arith.constant 0 : i32
    %c0_i32_1 = arith.constant 0 : i32
    %c0_i32_2 = arith.constant 0 : i32
    return %c0_i32, %c0_i32_0, %c0_i32_1 : i32, i32, i32
  }
  func.func @transform_4(%arg0: i32) -> (i32, i32) {
    %c0_i32 = arith.constant 0 : i32
    %c0_i32_0 = arith.constant 0 : i32
    %c0_i32_1 = arith.constant 0 : i32
    return %c0_i32, %c0_i32_0 : i32, i32
  }
  func.func @transform_5(%arg0: i32) -> (i32, i32) {
    %c0_i32 = arith.constant 0 : i32
    %c0_i32_0 = arith.constant 0 : i32
    %c0_i32_1 = arith.constant 0 : i32
    return %c0_i32, %c0_i32_0 : i32, i32
  }
  func.func @transform_6(%arg0: i32) -> (i32, i32, i32, i32) {
    %c0_i32 = arith.constant 0 : i32
    %c0_i32_0 = arith.constant 0 : i32
    %c0_i32_1 = arith.constant 0 : i32
    %c0_i32_2 = arith.constant 0 : i32
    return %arg0, %c0_i32, %c0_i32_0, %c0_i32_1 : i32, i32, i32, i32
  }
}

</mosaic_0001>

<bundles_post_ra>
// kernel: basic_block_forward.1
= control target key start
LH: loop header
LB: loop body
LE: loop exit
PB: predicated region body
PF: predicated region fallthrough
CT: control target
= control target key end

     0   :  { %s8756_s21 = smov 0   ;;  %s11880_s0 = inlined_call_operand.vmem [shape: bf16[2,18,18,128], index: 0, kind: input, shape index: {}]   ;;  %s11881_s1 = inlined_call_operand.vmem [shape: bf16[9,128,128], index: 1, kind: input, shape index: {}]   ;;  %s11882_s2 = inlined_call_operand.vmem [shape: f32[1,128], index: 2, kind: input, shape index: {}]   ;;  %s11883_s3 = inlined_call_operand.vmem [shape: bf16[9,128,128], index: 3, kind: input, shape index: {}]   ;;  %s11884_s4 = inlined_call_operand.vmem [shape: bf16[128,128], index: 4, kind: input, shape index: {}]   ;;  %s11885_s5 = inlined_call_operand.vmem [shape: f32[1,128], index: 5, kind: input, shape index: {}]   ;;  %s11886_s6 = inlined_call_operand.vmem [shape: f32[2,16,16,128], index: 6, kind: output, shape index: {}]  }
   0x1 LB: > { %s6644_s22 = sadd.s32 4294967295, %s8717_s21   ;;  %p6648_p0 = scmp.ge.s32.totalorder %s8717_s21, 1  ;;  %s8717_s21 = sphi %s8756_s21, %s16_s21  }
   0x2   : > { %p212_p1 = scmp.lt.s32.totalorder %s8717_s21, 3 }
   0x4   : > { %p213_p2 = pnand %p6648_p0, %p212_p1 }
   0x6   : > { %216 = sbr.rel (%p213_p2) target bundleno = 1053 (0x41d), region = 44 }
   0xb   : > { %v8531_v0 = vld [vmem:[%s11881_s1 + $0x78] sm:$0xff]   ;;  %p242_p3 = scmp.lt.s32.totalorder %s6644_s22, 1  ;;  %v8532_v1 = vld [vmem:[%s11881_s1 + $0x70] sm:$0xff]   ;;  %v8533_v2 = vld [vmem:[%s11881_s1 + $0x68] sm:$0xff]   ;;  %vm323_vm0 = vsmask.f32 3328 }
   0xc   : > { %7593 = vmatprep.subr.bf16.mxu0 %v8531_v0  ;;  %8505 = vmatprep.subr.bf16.mxu1 %v8531_v0  ;;  %v8534_v3 = vld [vmem:[%s11881_s1 + $0x60] sm:$0xff]   ;;  %vm324_vm1 = vsmask.f32 7440  ;;  %v8535_v9 = vld [vmem:[%s11881_s1 + $0x58] sm:$0xff]   ;;  %v8536_v28 = vld [vmem:[%s11881_s1 + $0x50] sm:$0xff]   ;;  %vm1321_vm3 = vcmask 1042432  }
   0xd   : > { %s12365_s22 = smov (!%p242_p3, %s6644_s22), 1  ;;  %7594 = vmatpush3.bf16.msra.mxu0 %v8531_v0  ;;  %8513 = vmatpush3.bf16.msra.mxu1 %v8531_v0  ;;  %vm8813_vm2 = vmor %vm323_vm0, %vm324_vm1  ;;  %v8537_v59 = vld [vmem:[%s11881_s1 + $0x48] sm:$0xff]   ;;  %vm1322_vm4 = vcmask 1046532   ;;  %vm3690_vm6 = vcmask 1046528   ;;  %vm4254_vm7 = vcmask 1045504  }
   0xe   : > { %7595 = vmatprep.subr.bf16.mxu0 %v8532_v1  ;;  %8506 = vmatprep.subr.bf16.mxu1 %v8532_v1  ;;  %s8521_s29 = smul.u32 216, %s12365_s22  ;;  %vm9159_vm5 = vmor %vm1321_vm3, %vm1322_vm4  ;;  %s7136_s9 = sshll.u32 %s12365_s22, 8 }
   0xf   : > { %s11734_s11 = scalar_lea.vmem %s11886_s6, %s7136_s9 }
  0x10   : > { %s8779_s8 = scalar_lea.vmem %s11880_s0, %s8521_s29 }
  0x11   : > { %7596 = vmatpush3.bf16.msra.mxu0 %v8532_v1  ;;  %8514 = vmatpush3.bf16.msra.mxu1 %v8532_v1  ;;  %v8785_v4 = vld [vmem:[%s8779_s8] sm:$0xf]  ;;  %v8788_v5 = vld [vmem:[%s8779_s8 + $0x4] sm:$0xf]  ;;  %v8791_v6 = vld [vmem:[%s8779_s8 + $0x8] sm:$0x1] }
  0x12   : > { %7597 = vmatprep.subr.bf16.mxu0 %v8533_v2  ;;  %8507 = vmatprep.subr.bf16.mxu1 %v8533_v2  ;;  %v327_v7 = vshrl.u32 %v8785_v4, 16  ;;  %v330_v8 = vshll.u32 %v8785_v4, 16  ;;  %v336_v10 = vshll.u32 %v8788_v5, 16  ;;  %v340_v11 = vshrl.u32 %v8788_v5, 16  ;;  %v277_v14 = vld [vmem:[%s8779_s8 + $0x60] sm:$0xf] }
  0x13   : > { %v346_v12 = vshll.u32 %v8791_v6, 16  ;;  %v278_v17 = vld [vmem:[%s8779_s8 + $0x64] sm:$0xf]  ;;  %v279_v18 = vld [vmem:[%s8779_s8 + $0x68] sm:$0x1]  ;;  %v519_v22 = vshrl.u32 %v277_v14, 16 }
  0x14   : > { %v329_v15 = vrot.slane %v327_v7, 4  ;;  %v332_v16 = vrot.slane %v330_v8, 5  ;;  %v338_v19 = vrot.slane %v336_v10, 5  ;;  %v342_v20 = vrot.slane %v340_v11, 4  ;;  %v8806_v23 = vld [vmem:[%s8779_s8 + $0xc] sm:$0xf] }
  0x15   : > { %7598 = vmatpush3.bf16.msra.mxu0 %v8533_v2  ;;  %8515 = vmatpush3.bf16.msra.mxu1 %v8533_v2  ;;  %v348_v21 = vrot.slane %v346_v12, 5  ;;  %v522_v25 = vshll.u32 %v277_v14, 16  ;;  %v528_v26 = vshll.u32 %v278_v17, 16  ;;  %v532_v27 = vshrl.u32 %v278_v17, 16  ;;  %v8818_v33 = vld [vmem:[%s8779_s8 + $0x10] sm:$0xf] }
  0x16   : > { %7599 = vmatprep.subr.bf16.mxu0 %v8534_v3  ;;  %8508 = vmatprep.subr.bf16.mxu1 %v8534_v3  ;;  %v333_v24 = vor.u32 %v332_v16, %v329_v15  ;;  %v343_v30 = vor.u32 %v342_v20, %v338_v19  ;;  %v521_v31 = vrot.slane %v519_v22, 4  ;;  %v538_v32 = vshll.u32 %v279_v18, 16  ;;  %v8822_v39 = vld [vmem:[%s8779_s8 + $0x14] sm:$0x1]  ;;  %v280_v44 = vld [vmem:[%s8779_s8 + $0x6c] sm:$0xf] }
  0x17   : > { %v351_v34 = vshrl.u32 %v8806_v23, 16  ;;  %v524_v36 = vrot.slane %v522_v25, 5  ;;  %v530_v37 = vrot.slane %v528_v26, 5  ;;  %v534_v38 = vrot.slane %v532_v27, 4  ;;  %v281_v49 = vld [vmem:[%s8779_s8 + $0x70] sm:$0xf] }
  0x18   : > { %v334_v35 = vrot.slane %v333_v24, 4  ;;  %v344_v40 = vrot.slane %v343_v30, 4  ;;  %v540_v41 = vrot.slane %v538_v32, 5  ;;  %v354_v43 = vshll.u32 %v8806_v23, 16  ;;  %v282_v54 = vld [vmem:[%s8779_s8 + $0x74] sm:$0x1] }
  0x19   : > { %7600 = vmatpush3.bf16.msra.mxu0 %v8534_v3  ;;  %8516 = vmatpush3.bf16.msra.mxu1 %v8534_v3  ;;  %v353_v42 = vrot.slane %v351_v34, 4  ;;  %v525_v46 = vor.u32 %v524_v36, %v521_v31  ;;  %v535_v47 = vor.u32 %v534_v38, %v530_v37  ;;  %v360_v48 = vshll.u32 %v8818_v33, 16  ;;  %v8846_v16 = vld [vmem:[%s8779_s8 + $0x18] sm:$0xf]  ;;  %v8538_v17 = vld [vmem:[%s11881_s1 + $0x40] sm:$0xff]  }
  0x1a   : > { %7601 = vmatprep.subr.bf16.mxu0 %v8535_v9  ;;  %8509 = vmatprep.subr.bf16.mxu1 %v8535_v9  ;;  %v339_v45 = vsel %vm8813_vm2, %v334_v35, %v338_v19  ;;  %v349_v50 = vsel %vm8813_vm2, %v344_v40, %v348_v21  ;;  %v356_v51 = vrot.slane %v354_v43, 5  ;;  %v364_v52 = vshrl.u32 %v8818_v33, 16  ;;  %v8854_v21 = vld [vmem:[%s8779_s8 + $0x1c] sm:$0xf]  ;;  %v8862_v27 = vld [vmem:[%s8779_s8 + $0x20] sm:$0x1] }
  0x1b   : > { %v370_v53 = vshll.u32 %v8822_v39, 16  ;;  %v6668_v55 = vcombine.low %v339_v45, %v349_v50  ;;  %v526_v56 = vrot.slane %v525_v46, 4  ;;  %v536_v57 = vrot.slane %v535_v47, 4  ;;  %v283_v35 = vld [vmem:[%s8779_s8 + $0x78] sm:$0xf] }
  0x1c   : > { %v362_v58 = vrot.slane %v360_v48, 5  ;;  %v357_v60 = vor.u32 %v356_v51, %v353_v42  ;;  %v366_v61 = vrot.slane %v364_v52, 4  ;;  %v543_v2 = vshrl.u32 %v280_v44, 16  ;;  %v8539_v42 = vld [vmem:[%s11881_s1 + $0x38] sm:$0xff]  }
  0x1d   : > { %7602 = vmatpush3.bf16.msra.mxu0 %v8535_v9  ;;  %8517 = vmatpush3.bf16.msra.mxu1 %v8535_v9  ;;  %v372_v62 = vrot.slane %v370_v53, 5  ;;  %v531_v0 = vsel %vm8813_vm2, %v526_v56, %v530_v37  ;;  %v541_v1 = vsel %vm8813_vm2, %v536_v57, %v540_v41  ;;  %v546_v3 = vshll.u32 %v280_v44, 16  ;;  %v8874_v41 = vld [vmem:[%s8779_s8 + $0x7c] sm:$0xf]  ;;  %v8888_v57 = vld [vmem:[%s8779_s8 + $0x24] sm:$0xf] }
  0x1e   : > { %7603 = vmatprep.subr.bf16.mxu0 %v8536_v28  ;;  %8510 = vmatprep.subr.bf16.mxu1 %v8536_v28  ;;  %v8843_v7 = vcombine.low %v531_v0, %v541_v1  ;;  %v358_v8 = vrot.slane %v357_v60, 4  ;;  %v367_v9 = vor.u32 %v366_v61, %v362_v58  ;;  %v552_v10 = vshll.u32 %v281_v49, 16  ;;  %v8540_v43 = vld [vmem:[%s11881_s1 + $0xb8] sm:$0xff]   ;;  %v8897_v0 = vld [vmem:[%s8779_s8 + $0x28] sm:$0xf] }
  0x1f   : > { %7609 = vmatprep.mubr.bf16.mxu0 %v6668_v55  ;;  %v545_v11 = vrot.slane %v543_v2, 4  ;;  %v548_v12 = vrot.slane %v546_v3, 5  ;;  %v556_v14 = vshrl.u32 %v281_v49, 16  ;;  %v562_v15 = vshll.u32 %v282_v54, 16  ;;  %v285_v55 = vld [vmem:[%s8779_s8 + $0x80] sm:$0x1] }
  0x20   : > { %11992 = vst [vmem:[#allocation3_spill] sm:$0xff] %v8843_v7  ;;  %v363_v18 = vsel %vm8813_vm2, %v358_v8, %v362_v58  ;;  %v368_v19 = vrot.slane %v367_v9, 4  ;;  %v554_v20 = vrot.slane %v552_v10, 5  ;;  %v8858_v22 = vcombine.low %v8806_v23, %v8818_v33  ;;  %7625 = vmatprep.mubr.bf16.mxu1 %v8843_v7  ;;  %v8542_v2 = vld [vmem:[%s11881_s1 + $0xb0] sm:$0xff]   ;;  %v8905_v10 = vld [vmem:[%s8779_s8 + $0x2c] sm:$0x1] }
  0x21   : > { %7604 = vmatpush3.bf16.msra.mxu0 %v8536_v28  ;;  %8518 = vmatpush3.bf16.msra.mxu1 %v8536_v28  ;;  %v549_v24 = vor.u32 %v548_v12, %v545_v11  ;;  %v558_v25 = vrot.slane %v556_v14, 4  ;;  %v564_v26 = vrot.slane %v562_v15, 5  ;;  %v375_v28 = vshrl.u32 %v8846_v16, 16  ;;  %v8908_v11 = vld [vmem:[%s8779_s8 + $0x84] sm:$0xf] }
  0x22   : > { %7605 = vmatprep.subr.bf16.mxu0 %v8537_v59  ;;  %8511 = vmatprep.subr.bf16.mxu1 %v8537_v59  ;;  %v373_v30 = vsel %vm8813_vm2, %v368_v19, %v372_v62  ;;  %v378_v31 = vshll.u32 %v8846_v16, 16  ;;  %v384_v32 = vshll.u32 %v8854_v21, 16  ;;  %v388_v34 = vshrl.u32 %v8854_v21, 16 }
  0x23   : > { %v8871_v36 = vcombine.low %v363_v18, %v373_v30  ;;  %v550_v37 = vrot.slane %v549_v24, 4  ;;  %v559_v38 = vor.u32 %v558_v25, %v554_v20  ;;  %v377_v40 = vrot.slane %v375_v28, 4  ;;  %v8912_v18 = vld [vmem:[%s8779_s8 + $0x88] sm:$0xf] }
  0x24   : > { %v380_v44 = vrot.slane %v378_v31, 5  ;;  %v386_v45 = vrot.slane %v384_v32, 5  ;;  %v390_v46 = vrot.slane %v388_v34, 4  ;;  %v394_v47 = vshll.u32 %v8862_v27, 16  ;;  %v8544_v28 = vld [vmem:[%s11881_s1 + $0xa8] sm:$0xff]  }
  0x25   : > { %7606 = vmatpush3.bf16.msra.mxu0 %v8537_v59  ;;  %8519 = vmatpush3.bf16.msra.mxu1 %v8537_v59  ;;  %11993 = vst [vmem:[#allocation4_spill] sm:$0xff] %v8871_v36  ;;  %v555_v48 = vsel %vm8813_vm2, %v550_v37, %v554_v20  ;;  %v560_v49 = vrot.slane %v559_v38, 4  ;;  %v567_v50 = vshrl.u32 %v283_v35, 16  ;;  %v570_v51 = vshll.u32 %v283_v35, 16  ;;  %v8541_v59 = vld [vmem:[%s11881_s1 + $0x30] sm:$0xff]  }
  0x26   : > { %7607 = vmatprep.subr.bf16.mxu0 %v8538_v17  ;;  %8512 = vmatprep.subr.bf16.mxu1 %v8538_v17  ;;  %v381_v52 = vor.u32 %v380_v44, %v377_v40  ;;  %v391_v53 = vor.u32 %v390_v46, %v386_v45  ;;  %v396_v54 = vrot.slane %v394_v47, 5  ;;  %v576_v56 = vshll.u32 %v8874_v41, 16  ;;  %v8932_v44 = vld [vmem:[%s8779_s8 + $0x8c] sm:$0x1] }
  0x27   : > { %v565_v58 = vsel %vm8813_vm2, %v560_v49, %v564_v26  ;;  %v569_v60 = vrot.slane %v567_v50, 4  ;;  %v572_v61 = vrot.slane %v570_v51, 5  ;;  %v580_v62 = vshrl.u32 %v8874_v41, 16  ;;  %v8543_v26 = vld [vmem:[%s11881_s1 + $0x28] sm:$0xff]   ;;  %v8942_v51 = vld [vmem:[%s8779_s8 + $0x30] sm:$0xf] }
  0x28   : > { %v8899_v1 = vcombine.low %v555_v48, %v565_v58  ;;  %v382_v3 = vrot.slane %v381_v52, 4  ;;  %v392_v8 = vrot.slane %v391_v53, 4  ;;  %v578_v9 = vrot.slane %v576_v56, 5 }
  0x29   : > { %7608 = vmatpush3.bf16.msra.mxu0 %v8538_v17  ;;  %8520 = vmatpush3.bf16.msra.mxu1 %v8538_v17  ;;  %v573_v12 = vor.u32 %v572_v61, %v569_v60  ;;  %v582_v14 = vrot.slane %v580_v62, 4  ;;  %v586_v15 = vshll.u32 %v285_v55, 16  ;;  %v399_v17 = vshrl.u32 %v8888_v57, 16  ;;  %v8546_v62 = vld [vmem:[%s11881_s1 + $0xa0] sm:$0xff]  }
  0x2a   : > { %11994 = vst [vmem:[#allocation5_spill] sm:$0xff] %v8899_v1  ;;  %7641 = vmatprep.subr.bf16.mxu1 %v8539_v42  ;;  %7689 = vmatprep.subr.bf16.mxu0 %v8540_v43  ;;  %v387_v19 = vsel %vm8813_vm2, %v382_v3, %v386_v45  ;;  %v397_v20 = vsel %vm8813_vm2, %v392_v8, %v396_v54  ;;  %v402_v24 = vshll.u32 %v8888_v57, 16  ;;  %v408_v25 = vshll.u32 %v8897_v0, 16 }
  0x2b   : > { %v8928_v30 = vcombine.low %v387_v19, %v397_v20  ;;  %v574_v31 = vrot.slane %v573_v12, 4  ;;  %v583_v32 = vor.u32 %v582_v14, %v578_v9  ;;  %v588_v34 = vrot.slane %v586_v15, 5  ;;  %v8964_v19 = vld [vmem:[%s8779_s8 + $0x38] sm:$0x1] }
  0x2c   : > { %7610 = vmatmul.mubr.bf16.vlgmr.msra.gmra.mxu0 %v8871_v36  ;;  %7626 = vmatmul.mubr.bf16.vlgmr.msra.gmra.mxu1 %v8899_v1  ;;  %v401_v35 = vrot.slane %v399_v17, 4  ;;  %v404_v37 = vrot.slane %v402_v24, 5  ;;  %v410_v38 = vrot.slane %v408_v25, 5  ;;  %v412_v40 = vshrl.u32 %v8897_v0, 16  ;;  %v9110_v1 = vld [vmem:[%s8779_s8 + $0x58] sm:$0xf] }
  0x2d   : > { %7642 = vmatpush3.bf16.msra.mxu1 %v8539_v42  ;;  %7690 = vmatpush3.bf16.msra.mxu0 %v8540_v43  ;;  %11995 = vst [vmem:[#allocation6_spill] sm:$0xff] %v8928_v30  ;;  %v579_v42 = vsel %vm8813_vm2, %v574_v31, %v578_v9  ;;  %v584_v43 = vrot.slane %v583_v32, 4  ;;  %v418_v45 = vshll.u32 %v8905_v10, 16  ;;  %v591_v46 = vshrl.u32 %v8908_v11, 16 }
  0x2e   : > { %7643 = vmatprep.subr.bf16.mxu1 %v8541_v59  ;;  %7691 = vmatprep.subr.bf16.mxu0 %v8542_v2  ;;  %v405_v47 = vor.u32 %v404_v37, %v401_v35  ;;  %v414_v48 = vrot.slane %v412_v40, 4  ;;  %v594_v49 = vshll.u32 %v8908_v11, 16  ;;  %v600_v50 = vshll.u32 %v8912_v18, 16 }
  0x2f   : > { %7613 = vmatprep.mubr.bf16.mxu0 %v8928_v30  ;;  %v589_v52 = vsel %vm8813_vm2, %v584_v43, %v588_v34  ;;  %v420_v53 = vrot.slane %v418_v45, 5  ;;  %v593_v54 = vrot.slane %v591_v46, 4  ;;  %v604_v55 = vshrl.u32 %v8912_v18, 16  ;;  %v8969_v34 = vld [vmem:[%s8779_s8 + $0x90] sm:$0xf] }
  0x30   : > { %v8947_v56 = vcombine.low %v579_v42, %v589_v52  ;;  %v406_v58 = vrot.slane %v405_v47, 4  ;;  %v415_v60 = vor.u32 %v414_v48, %v410_v38  ;;  %v596_v61 = vrot.slane %v594_v49, 5  ;;  %v8975_v42 = vld [vmem:[%s8779_s8 + $0x94] sm:$0xf]  ;;  %v8984_v47 = vld [vmem:[%s8779_s8 + $0x98] sm:$0x1] }
  0x31   : > { %7644 = vmatpush3.bf16.msra.mxu1 %v8541_v59  ;;  %7692 = vmatpush3.bf16.msra.mxu0 %v8542_v2  ;;  %v8545_v59 = vld [vmem:[%s11881_s1 + $0x20] sm:$0xff]   ;;  %v8956_v2 = vld [vmem:[%s8779_s8 + $0x34] sm:$0xf]  ;;  %v602_v3 = vrot.slane %v600_v50, 5  ;;  %v606_v8 = vrot.slane %v604_v55, 4  ;;  %v610_v9 = vshll.u32 %v8932_v44, 16 }
  0x32   : > { %11996 = vst [vmem:[#allocation7_spill] sm:$0xff] %v8947_v56  ;;  %7645 = vmatprep.subr.bf16.mxu1 %v8543_v26  ;;  %7693 = vmatprep.subr.bf16.mxu0 %v8544_v28  ;;  %v423_v12 = vshrl.u32 %v8942_v51, 16  ;;  %v411_v14 = vsel %vm8813_vm2, %v406_v58, %v410_v38  ;;  %v416_v15 = vrot.slane %v415_v60, 4  ;;  %v597_v17 = vor.u32 %v596_v61, %v593_v54  ;;  %v8548_v48 = vld [vmem:[%s11881_s1 + $0x98] sm:$0xff]   ;;  %v8996_v55 = vld [vmem:[%s8779_s8 + $0x40] sm:$0xf] }
  0x33   : > { %7629 = vmatprep.mubr.bf16.mxu1 %v8947_v56  ;;  %v426_v20 = vshll.u32 %v8942_v51, 16  ;;  %v607_v24 = vor.u32 %v606_v8, %v602_v3  ;;  %v612_v25 = vrot.slane %v610_v9, 5  ;;  %v432_v32 = vshll.u32 %v8956_v2, 16  ;;  %v8993_v54 = vld [vmem:[%s8779_s8 + $0x3c] sm:$0xf]  ;;  %v8549_v58 = vld [vmem:[%s11881_s1 + $0x10] sm:$0xff]  }
  0x34   : > { %v425_v31 = vrot.slane %v423_v12, 4  ;;  %v421_v35 = vsel %vm8813_vm2, %v416_v15, %v420_v53  ;;  %v598_v37 = vrot.slane %v597_v17, 4  ;;  %v436_v40 = vshrl.u32 %v8956_v2, 16  ;;  %v8550_v9 = vld [vmem:[%s11881_s1 + $0x90] sm:$0xff]  }
  0x35   : > { %7646 = vmatpush3.bf16.msra.mxu1 %v8543_v26  ;;  %7694 = vmatpush3.bf16.msra.mxu0 %v8544_v28  ;;  %v428_v38 = vrot.slane %v426_v20, 5  ;;  %v8547_v26 = vld [vmem:[%s11881_s1 + $0x18] sm:$0xff]   ;;  %v8980_v28 = vcombine.low %v411_v14, %v421_v35  ;;  %v608_v43 = vrot.slane %v607_v24, 4  ;;  %v434_v45 = vrot.slane %v432_v32, 5 }
  0x36   : > { %7647 = vmatprep.subr.bf16.mxu1 %v8545_v59  ;;  %7695 = vmatprep.subr.bf16.mxu0 %v8546_v62  ;;  %v442_v46 = vshll.u32 %v8964_v19, 16  ;;  %v603_v49 = vsel %vm8813_vm2, %v598_v37, %v602_v3  ;;  %v438_v52 = vrot.slane %v436_v40, 4  ;;  %v615_v53 = vshrl.u32 %v8969_v34, 16  ;;  %v9017_v32 = vld [vmem:[%s8779_s8 + $0x9c] sm:$0xf] }
  0x37   : > { %11997 = vst [vmem:[#allocation8_spill] sm:$0xff] %v8980_v28  ;;  %v429_v50 = vor.u32 %v428_v38, %v425_v31  ;;  %7614 = vmatmul.mubr.bf16.gmra.mxu0 %v8980_v28  ;;  %v613_v60 = vsel %vm8813_vm2, %v608_v43, %v612_v25  ;;  %v618_v3 = vshll.u32 %v8969_v34, 16  ;;  %v624_v8 = vshll.u32 %v8975_v42, 16  ;;  %v9014_v31 = vld [vmem:[%s8779_s8 + $0x44] sm:$0x1] }
  0x38   : > { %v444_v61 = vrot.slane %v442_v46, 5  ;;  %v9009_v12 = vcombine.low %v603_v49, %v613_v60  ;;  %v439_v15 = vor.u32 %v438_v52, %v434_v45  ;;  %v617_v17 = vrot.slane %v615_v53, 4  ;;  %v9025_v40 = vld [vmem:[%s8779_s8 + $0xa0] sm:$0xf] }
  0x39   : > { %7648 = vmatpush3.bf16.msra.mxu1 %v8545_v59  ;;  %7696 = vmatpush3.bf16.msra.mxu0 %v8546_v62  ;;  %v430_v14 = vrot.slane %v429_v50, 4  ;;  %v620_v20 = vrot.slane %v618_v3, 5  ;;  %v626_v59 = vrot.slane %v624_v8, 5  ;;  %v628_v24 = vshrl.u32 %v8975_v42, 16  ;;  %v8551_v3 = vld [vmem:[%s11881_s1 + $0x8] sm:$0xff]  }
  0x3a   : > { %11998 = vst [vmem:[#allocation9_spill] sm:$0xff] %v9009_v12  ;;  %7649 = vmatprep.subr.bf16.mxu1 %v8547_v26  ;;  %v634_v25 = vshll.u32 %v8984_v47, 16  ;;  %7697 = vmatprep.subr.bf16.mxu0 %v8548_v48  ;;  %v440_v35 = vrot.slane %v439_v15, 4  ;;  %v447_v37 = vshrl.u32 %v8993_v54, 16  ;;  %v450_v38 = vshll.u32 %v8993_v54, 16 }
  0x3b   : > { %7630 = vmatmul.mubr.bf16.gmra.mxu1 %v9009_v12  ;;  %v435_v62 = vsel %vm8813_vm2, %v430_v14, %v434_v45  ;;  %v621_v43 = vor.u32 %v620_v20, %v617_v17  ;;  %v630_v46 = vrot.slane %v628_v24, 4  ;;  %v456_v50 = vshll.u32 %v8996_v55, 16 }
  0x3c   : > { %v636_v49 = vrot.slane %v634_v25, 5  ;;  %v445_v52 = vsel %vm8813_vm2, %v440_v35, %v444_v61  ;;  %v449_v53 = vrot.slane %v447_v37, 4  ;;  %v452_v60 = vrot.slane %v450_v38, 5  ;;  %v9045_v35 = vld [vmem:[%s8779_s8 + $0xa4] sm:$0x1] }
  0x3d   : > { %7650 = vmatpush3.bf16.msra.mxu1 %v8547_v26  ;;  %v460_v45 = vshrl.u32 %v8996_v55, 16  ;;  %7698 = vmatpush3.bf16.msra.mxu0 %v8548_v48  ;;  %v9034_v8 = vcombine.low %v435_v62, %v445_v52  ;;  %v622_v14 = vrot.slane %v621_v43, 4  ;;  %v631_v15 = vor.u32 %v630_v46, %v626_v59  ;;  %v8552_v26 = vld [vmem:[%s11881_s1 + $0x88] sm:$0xff]  }
  0x3e   : > { %7651 = vmatprep.subr.bf16.mxu1 %v8549_v58  ;;  %v458_v17 = vrot.slane %v456_v50, 5  ;;  %7699 = vmatprep.subr.bf16.mxu0 %v8550_v9  ;;  %v453_v61 = vor.u32 %v452_v60, %v449_v53  ;;  %v466_v48 = vshll.u32 %v9014_v31, 16  ;;  %v639_v24 = vshrl.u32 %v9017_v32, 16  ;;  %v9050_v53 = vld [vmem:[%s8779_s8 + $0x48] sm:$0xf] }
  0x3f   : > { %11999 = vst [vmem:[#allocation10_spill] sm:$0xff] %v9034_v8  ;;  %v462_v20 = vrot.slane %v460_v45, 4  ;;  %7617 = vmatprep.mubr.bf16.mxu0 %v9034_v8  ;;  %v627_v25 = vsel %vm8813_vm2, %v622_v14, %v626_v59  ;;  %v632_v62 = vrot.slane %v631_v15, 4  ;;  %v642_v37 = vshll.u32 %v9017_v32, 16  ;;  %v8553_v59 = vld [vmem:[%s11881_s1] sm:$0xff]  }
  0x40   : > { %v648_v38 = vshll.u32 %v9025_v40, 16  ;;  %v454_v43 = vrot.slane %v453_v61, 4  ;;  %v468_v50 = vrot.slane %v466_v48, 5  ;;  %v641_v52 = vrot.slane %v639_v24, 4  ;;  %v9059_v15 = vld [vmem:[%s8779_s8 + $0x4c] sm:$0xf] }
  0x41   : > { %7652 = vmatpush3.bf16.msra.mxu1 %v8549_v58  ;;  %v463_v46 = vor.u32 %v462_v20, %v458_v17  ;;  %7700 = vmatpush3.bf16.msra.mxu0 %v8550_v9  ;;  %v637_v60 = vsel %vm8813_vm2, %v632_v62, %v636_v49  ;;  %v644_v45 = vrot.slane %v642_v37, 5  ;;  %v652_v58 = vshrl.u32 %v9025_v40, 16  ;;  %v8554_v9 = vld [vmem:[%s11881_s1 + $0x80] sm:$0xff]   ;;  %v9070_v37 = vld [vmem:[%s8779_s8 + $0x50] sm:$0x1] }
  0x42   : > { %7653 = vmatprep.subr.bf16.mxu1 %v8551_v3  ;;  %v650_v14 = vrot.slane %v648_v38, 5  ;;  %7701 = vmatprep.subr.bf16.mxu0 %v8552_v26  ;;  %v9064_v61 = vcombine.low %v627_v25, %v637_v60  ;;  %v459_v20 = vsel %vm8813_vm2, %v454_v43, %v458_v17  ;;  %v658_v49 = vshll.u32 %v9045_v35, 16 }
  0x43   : > { %v464_v48 = vrot.slane %v463_v46, 4  ;;  %v645_v24 = vor.u32 %v644_v45, %v641_v52  ;;  %v654_v62 = vrot.slane %v652_v58, 4  ;;  %v471_v38 = vshrl.u32 %v9050_v53, 16  ;;  %v9080_v46 = vld [vmem:[%s8779_s8 + $0xa8] sm:$0xf]  ;;  %v9085_v52 = vld [vmem:[%s11881_s1 + $0xf8] sm:$0xff]  }
  0x44   : > { %12000 = vst [vmem:[#allocation11_spill] sm:$0xff] %v9064_v61  ;;  %v474_v63 = vshll.u32 %v9050_v53, 16  ;;  %7633 = vmatprep.mubr.bf16.mxu1 %v9064_v61  ;;  %v660_v60 = vrot.slane %v658_v49, 5  ;;  %v480_v17 = vshll.u32 %v9059_v15, 16  ;;  %v484_v43 = vshrl.u32 %v9059_v15, 16  ;;  %12001 = vst [vmem:[#allocation12_spill] sm:$0xff] %v9080_v46 }
  0x45   : > { %7654 = vmatpush3.bf16.msra.mxu1 %v8551_v3  ;;  %v469_v25 = vsel %vm8813_vm2, %v464_v48, %v468_v50  ;;  %7702 = vmatpush3.bf16.msra.mxu0 %v8552_v26  ;;  %v646_v45 = vrot.slane %v645_v24, 4  ;;  %v655_v58 = vor.u32 %v654_v62, %v650_v14  ;;  %v473_v50 = vrot.slane %v471_v38, 4  ;;  %v9090_v48 = vld [vmem:[%s8779_s8 + $0xac] sm:$0xf]  ;;  %v9095_v49 = vld [vmem:[%s11881_s1 + $0x138] sm:$0xff]  }
  0x46   : > { %v9087_v3 = vcombine.low %v459_v20, %v469_v25  ;;  %12003 = vst [vmem:[#allocation14_spill] sm:$0xff] %v9090_v48  ;;  %7655 = vmatprep.subr.bf16.mxu1 %v8553_v59  ;;  %7703 = vmatprep.subr.bf16.mxu0 %v8554_v9  ;;  %v476_v26 = vrot.slane %v474_v63, 5  ;;  %v482_v13 = vrot.slane %v480_v17, 5  ;;  %v486_v61 = vrot.slane %v484_v43, 4  ;;  %v9099_v20 = vld [vmem:[%s8779_s8 + $0xb0] sm:$0x1] }
  0x47   : > { %v490_v12 = vshll.u32 %v9070_v37, 16  ;;  %12004 = vst [vmem:[#allocation15_spill] sm:$0xff] %v9099_v20  ;;  %v9102_v24 = vld [vmem:[%s8779_s8 + $0x54] sm:$0xf]  ;;  %v651_v62 = vsel %vm8813_vm2, %v646_v45, %v650_v14  ;;  %v656_v38 = vrot.slane %v655_v58, 4  ;;  %v663_v25 = vshrl.u32 %v9080_v46, 16 }
  0x48   : > { %12002 = vst [vmem:[#allocation13_spill] sm:$0xff] %v9087_v3  ;;  %7618 = vmatmul.mubr.bf16.gmra.mxu0 %v9087_v3  ;;  %v666_v56 = vshll.u32 %v9080_v46, 16  ;;  %v477_v63 = vor.u32 %v476_v26, %v473_v50  ;;  %v487_v17 = vor.u32 %v486_v61, %v482_v13  ;;  %v672_v7 = vshll.u32 %v9090_v48, 16  ;;  %v9124_v3 = vld [vmem:[%s8779_s8 + $0xb4] sm:$0xf] }
  0x49   : > { %7656 = vmatpush3.bf16.msra.mxu1 %v8553_v59  ;;  %v492_v43 = vrot.slane %v490_v12, 5  ;;  %7704 = vmatpush3.bf16.msra.mxu0 %v8554_v9  ;;  %v661_v14 = vsel %vm8813_vm2, %v656_v38, %v660_v60  ;;  %v665_v45 = vrot.slane %v663_v25, 4  ;;  %v676_v59 = vshrl.u32 %v9090_v48, 16  ;;  %v9121_v9 = vld [vmem:[%s8779_s8 + $0x5c] sm:$0x1] }
  0x4a   : > { %7737 = vmatprep.subr.bf16.mxu1 %v9085_v52  ;;  %v668_v58 = vrot.slane %v666_v56, 5  ;;  %7785 = vmatprep.subr.bf16.mxu0 %v9095_v49  ;;  %v9118_v61 = vcombine.low %v651_v62, %v661_v14  ;;  %v478_v12 = vrot.slane %v477_v63, 4  ;;  %v488_v50 = vrot.slane %v487_v17, 4  ;;  %v9129_v60 = vld [vmem:[%s8779_s8 + $0xb8] sm:$0xf] }
  0x4b   : > { %v674_v26 = vrot.slane %v672_v7, 5  ;;  %v678_v28 = vrot.slane %v676_v59, 4  ;;  %v682_v30 = vshll.u32 %v9099_v20, 16  ;;  %v495_v56 = vshrl.u32 %v9102_v24, 16  ;;  %v9142_v20 = vld [vmem:[%s8779_s8 + $0xbc] sm:$0x1] }
  0x4c   : > { %12005 = vst [vmem:[#allocation16_spill] sm:$0xff] %v9118_v61  ;;  %v669_v8 = vor.u32 %v668_v58, %v665_v45  ;;  %7634 = vmatmul.mubr.bf16.gmra.mxu1 %v9118_v61  ;;  %v483_v62 = vsel %vm8813_vm2, %v478_v12, %v482_v13  ;;  %v493_v7 = vsel %vm8813_vm2, %v488_v50, %v492_v43  ;;  %v498_v38 = vshll.u32 %v9102_v24, 16 }
  0x4d   : > { %v504_v25 = vshll.u32 %v9110_v1, 16  ;;  %v9138_v63 = vcombine.low %v483_v62, %v493_v7  ;;  %v679_v14 = vor.u32 %v678_v28, %v674_v26  ;;  %v684_v45 = vrot.slane %v682_v30, 5  ;;  %12007 = vst [vmem:[#allocation18_spill] sm:$0xff] %v9142_v20 }
  0x4e   : > { %v670_v17 = vrot.slane %v669_v8, 4  ;;  %v497_v58 = vrot.slane %v495_v56, 4  ;;  %v500_v59 = vrot.slane %v498_v38, 5  ;;  %v508_v61 = vshrl.u32 %v9110_v1, 16 }
  0x4f   : > { %12006 = vst [vmem:[#allocation17_spill] sm:$0xff] %v9138_v63  ;;  %v506_v36 = vrot.slane %v504_v25, 5  ;;  %7621 = vmatprep.mubr.bf16.mxu0 %v9138_v63  ;;  %v680_v43 = vrot.slane %v679_v14, 4  ;;  %v514_v12 = vshll.u32 %v9121_v9, 16  ;;  %v687_v50 = vshrl.u32 %v9124_v3, 16 }
  0x50   : > { %v675_v13 = vsel %vm8813_vm2, %v670_v17, %v674_v26  ;;  %v501_v8 = vor.u32 %v500_v59, %v497_v58  ;;  %v510_v28 = vrot.slane %v508_v61, 4  ;;  %v690_v30 = vshll.u32 %v9124_v3, 16 }
  0x51   : > { %v696_v56 = vshll.u32 %v9129_v60, 16  ;;  %v685_v62 = vsel %vm8813_vm2, %v680_v43, %v684_v45  ;;  %v516_v7 = vrot.slane %v514_v12, 5  ;;  %v689_v38 = vrot.slane %v687_v50, 4 }
  0x52   : > { %v700_v25 = vshrl.u32 %v9129_v60, 16  ;;  %v9154_v63 = vcombine.low %v675_v13, %v685_v62  ;;  %v502_v26 = vrot.slane %v501_v8, 4  ;;  %v511_v17 = vor.u32 %v510_v28, %v506_v36 }
  0x53   : > { %v692_v14 = vrot.slane %v690_v30, 5  ;;  %v698_v46 = vrot.slane %v696_v56, 5  ;;  %v706_v61 = vshll.u32 %v9142_v20, 16  ;;  %v12009_v58 = vmov 0 }
  0x54   : > { %12008 = vst [vmem:[#allocation19_spill] sm:$0xff] %v9154_v63  ;;  %v702_v48 = vrot.slane %v700_v25, 4  ;;  %v12010_v58 = vsel %vm9159_vm5, 4294967295, %v12009_v58  ;;  %v6716_v45 = vrot.slane %v8785_v4, 9  ;;  %7637 = vmatprep.mubr.bf16.mxu1 %v9154_v63  ;;  %v507_v59 = vsel %vm8813_vm2, %v502_v26, %v506_v36 }
  0x55   : > { %12011 = vst [vmem:[#allocation20_spill] sm:$0xff] %v12010_v58  ;;  %v512_v13 = vrot.slane %v511_v17, 4  ;;  %v693_v43 = vor.u32 %v692_v14, %v689_v38  ;;  %v1326_v12 = vrot.slane %v8788_v5, 5  ;;  %v708_v8 = vrot.slane %v706_v61, 5 }
  0x56   : > { %v703_v50 = vor.u32 %v702_v48, %v698_v46  ;;  %v6717_v28 = vrot.slane %v8806_v23, 9  ;;  %v1333_v30 = vrot.slane %v8818_v33, 5  ;;  %v12013_v26 = vrot.slane %v8791_v6, 5 }
  0x57   : > { %v517_v56 = vsel %vm8813_vm2, %v512_v13, %v516_v7  ;;  %v694_v62 = vrot.slane %v693_v43, 4  ;;  %v1327_v25 = vsel %vm9159_vm5, %v6716_v45, %v1326_v12  ;;  %v1328_v63 = vrot.slane %v1326_v12, 4 }
  0x58   : > { %v9174_v20 = vcombine.low %v507_v59, %v517_v56  ;;  %v704_v36 = vrot.slane %v703_v50, 4  ;;  %v1335_v38 = vrot.slane %v1333_v30, 4  ;;  %v9184_v33 = vcombine.low %v8846_v16, %v8854_v21 }
  0x59   : > { %v699_v48 = vsel %vm8813_vm2, %v694_v62, %v698_v46  ;;  %v1330_v23 = vsel %vm9159_vm5, %v1328_v63, %v12013_v26  ;;  %v6718_v7 = vrot.slane %v8846_v16, 9  ;;  %v6692_v14 = vcombine.low %v8785_v4, %v8788_v5 }
  0x5a   : > { %12012 = vst [vmem:[#allocation21_spill] sm:$0xff] %v9174_v20  ;;  %7622 = vmatmul.mubr.bf16.gmra.mxu0 %v9174_v20  ;;  %v709_v17 = vsel %vm8813_vm2, %v704_v36, %v708_v8  ;;  %v6748_v46 = vcombine.low %v1327_v25, %v1330_v23  ;;  %v1340_v6 = vrot.slane %v8854_v21, 5  ;;  %v1334_v63 = vsel %vm9159_vm5, %v6717_v28, %v1333_v30  ;;  %v8561_v36 = vld [vmem:[%s11881_s1 + $0xf0] sm:$0xff]  }
  0x5b   : > { %v9193_v61 = vcombine.low %v699_v48, %v709_v17  ;;  %v12015_v45 = vrot.slane %v8822_v39, 5  ;;  %v1343_v59 = vrot.slane %v8862_v27, 5  ;;  %v1347_v5 = vrot.slane %v8897_v0, 5  ;;  %v12032_v58 = vld [vmem:[#allocation19_spill] sm:$0xff] }
  0x5c   : > { %7705 = vmatprep.mubr.bf16.mxu0 %v6748_v46  ;;  %v1341_v13 = vsel %vm9159_vm5, %v6718_v7, %v1340_v6  ;;  %v1342_v4 = vrot.slane %v1340_v6, 4  ;;  %v6719_v21 = vrot.slane %v8888_v57, 9  ;;  %v1350_v43 = vrot.slane %v8905_v10, 5  ;;  %v8562_v10 = vld [vmem:[%s11881_s1 + $0x130] sm:$0xff]  }
  0x5d   : > { %12014 = vst [vmem:[#allocation22_spill] sm:$0xff] %v9193_v61  ;;  %v1337_v16 = vsel %vm9159_vm5, %v1335_v38, %v12015_v45  ;;  %7638 = vmatmul.mubr.bf16.gmra.mxu1 %v9193_v61  ;;  %v1354_v39 = vrot.slane %v8956_v2, 5  ;;  %v1349_v50 = vrot.slane %v1347_v5, 4  ;;  %v6720_v8 = vrot.slane %v8942_v51, 9 }
  0x5e   : > { %7657 = vmatprep.mubr.bf16.mxu1 %v6692_v14  ;;  %v9209_v12 = vcombine.low %v1334_v63, %v1337_v16  ;;  %v1344_v27 = vsel %vm9159_vm5, %v1342_v4, %v1343_v59  ;;  %v1357_v56 = vrot.slane %v8964_v19, 5  ;;  %v1361_v62 = vrot.slane %v8996_v55, 5  ;;  %v8566_v14 = vld [vmem:[%s11881_s1 + $0x128] sm:$0xff]  }
  0x5f   : > { %v9214_v28 = vcombine.low %v1341_v13, %v1344_v27  ;;  %v1356_v30 = vrot.slane %v1354_v39, 4  ;;  %v1348_v25 = vsel %vm9159_vm5, %v6719_v21, %v1347_v5  ;;  %v6721_v38 = vrot.slane %v8993_v54, 9  ;;  %v8565_v16 = vld [vmem:[%s11881_s1 + $0xe8] sm:$0xff]   ;;  %v9256_v13 = vld [vmem:[%s8779_s8 + $0x64] sm:$0xf] }
  0x60   : > { %v1351_v19 = vsel %vm9159_vm5, %v1349_v50, %v1350_v43  ;;  %v1355_v48 = vsel %vm9159_vm5, %v6720_v8, %v1354_v39  ;;  %v1364_v26 = vrot.slane %v9014_v31, 5  ;;  %v1368_v23 = vrot.slane %v9059_v15, 5 }
  0x61   : > { %v1358_v7 = vsel %vm9159_vm5, %v1356_v30, %v1357_v56  ;;  %v1363_v17 = vrot.slane %v1361_v62, 4  ;;  %v6722_v46 = vrot.slane %v9050_v53, 9  ;;  %v1375_v6 = vrot.slane %v9110_v1, 5  ;;  %v9291_v30 = vld [vmem:[%s8779_s8 + $0x60] sm:$0xf] }
  0x62   : > { %7706 = vmatmul.mubr.bf16.vlgmr.msra.gmra.mxu0 %v9209_v12  ;;  %v1370_v31 = vrot.slane %v1368_v23, 4  ;;  %v1371_v63 = vrot.slane %v9070_v37, 5  ;;  %v9249_v45 = vcombine.low %v1355_v48, %v1358_v7  ;;  %v6723_v59 = vrot.slane %v9102_v24, 9 }
  0x63   : > { %7786 = vmatpush3.bf16.msra.mxu0 %v9095_v49  ;;  %7709 = vmatprep.mubr.bf16.mxu0 %v9214_v28  ;;  %v9247_v49 = vcombine.low %v1348_v25, %v1351_v19  ;;  %v1382_v37 = vrot.slane %v9256_v13, 5  ;;  %v1365_v4 = vsel %vm9159_vm5, %v1363_v17, %v1364_v26  ;;  %v1377_v5 = vrot.slane %v1375_v6, 4 }
  0x64   : > { %7787 = vmatprep.subr.bf16.mxu0 %v8562_v10  ;;  %v1378_v21 = vrot.slane %v9121_v9, 5  ;;  %v9266_v43 = vcombine.low %v8888_v57, %v8897_v0  ;;  %v1369_v39 = vsel %vm9159_vm5, %v6722_v46, %v1368_v23  ;;  %v1372_v27 = vsel %vm9159_vm5, %v1370_v31, %v1371_v63  ;;  %v8569_v0 = vld [vmem:[%s11881_s1 + $0xe0] sm:$0xff]  }
  0x65   : > { %7658 = vmatmul.mubr.bf16.vlgmr.msra.gmra.mxu1 %v8858_v22  ;;  %v9274_v50 = vcombine.low %v8942_v51, %v8956_v2  ;;  %v9278_v8 = vcombine.low %v8993_v54, %v8996_v55  ;;  %v9282_v57 = vcombine.low %v9050_v53, %v9059_v15  ;;  %v8570_v9 = vld [vmem:[%s11881_s1 + $0x120] sm:$0xff]   ;;  %v6724_v51 = vrot.slane %v9291_v30, 9  ;;  %v8703_v53 = vld [vmem:[%s8779_s8 + $0x68] sm:$0x1] }
  0x66   : > { %7738 = vmatpush3.bf16.msra.mxu1 %v9085_v52  ;;  %7661 = vmatprep.mubr.bf16.mxu1 %v9184_v33  ;;  %v1362_v52 = vsel %vm9159_vm5, %v6721_v38, %v1361_v62  ;;  %v9299_v54 = vsel %vm9159_vm5, %v6723_v59, %v1375_v6  ;;  %v1384_v55 = vrot.slane %v1382_v37, 4  ;;  %v1385_v15 = vrot.slane %v8703_v53, 5  ;;  %v8574_v62 = vld [vmem:[%s11881_s1 + $0x118] sm:$0xff]   ;;  %v8577_v53 = vld [vmem:[%s11881_s1 + $0xd0] sm:$0xff]  }
  0x67   : > { %7739 = vmatprep.subr.bf16.mxu1 %v8561_v36  ;;  %7788 = vmatpush3.bf16.msra.mxu0 %v8562_v10  ;;  %v9295_v2 = vcombine.low %v1362_v52, %v1365_v4  ;;  %v9303_v56 = vcombine.low %v1369_v39, %v1372_v27  ;;  %v1379_v10 = vsel %vm9159_vm5, %v1377_v5, %v1378_v21  ;;  %v6727_v19 = vrot.slane %v8908_v11, 9  ;;  %v8573_v6 = vld [vmem:[%s11881_s1 + $0xd8] sm:$0xff]   ;;  %v8578_v4 = vld [vmem:[%s11881_s1 + $0x110] sm:$0xff]   ;;  %v12016_v5 = vld [vmem:[#allocation14_spill] sm:$0xff] }
  0x68   : > { %7789 = vmatprep.subr.bf16.mxu0 %v8566_v14  ;;  %v9312_v25 = vcombine.low %v8908_v11, %v8912_v18  ;;  %v1403_v48 = vrot.slane %v8912_v18, 5  ;;  %v1406_v26 = vrot.slane %v8932_v44, 5  ;;  %v1383_v23 = vsel %vm9159_vm5, %v6724_v51, %v1382_v37  ;;  %v12017_v21 = vld [vmem:[#allocation12_spill] sm:$0xff]  ;;  %v12018_v51 = vld [vmem:[#allocation15_spill] sm:$0xff] }
  0x69   : > { %v1396_v7 = vrot.slane %v8874_v41, 5  ;;  %v9327_v17 = vcombine.low %v8969_v34, %v8975_v42  ;;  %v1386_v11 = vsel %vm9159_vm5, %v1384_v55, %v1385_v15  ;;  %v1410_v46 = vrot.slane %v8975_v42, 5 }
  0x6a   : > { %7710 = vmatmul.mubr.bf16.gmra.mxu0 %v9247_v49  ;;  %7740 = vmatpush3.bf16.msra.mxu1 %v8561_v36  ;;  %v9315_v36 = vld [vmem:[%s8779_s8 + $0x70] sm:$0xf]  ;;  %v1404_v18 = vsel %vm9159_vm5, %v6727_v19, %v1403_v48  ;;  %v1405_v44 = vrot.slane %v1403_v48, 4  ;;  %v1413_v31 = vrot.slane %v8984_v47, 5  ;;  %v6729_v63 = vrot.slane %v9017_v32, 9 }
  0x6b   : > { %7713 = vmatprep.mubr.bf16.mxu0 %v9249_v45  ;;  %7741 = vmatprep.subr.bf16.mxu1 %v8565_v16  ;;  %v1389_v38 = vrot.slane %v9315_v36, 5  ;;  %v1412_v37 = vrot.slane %v1410_v46, 4  ;;  %v1420_v52 = vrot.slane %v9045_v35, 5  ;;  %v9360_v39 = vcombine.low %v12017_v21, %v12016_v5 }
  0x6c   : > { %7790 = vmatpush3.bf16.msra.mxu0 %v8566_v14  ;;  %v6728_v14 = vrot.slane %v8969_v34, 9  ;;  %v9342_v34 = vcombine.low %v9017_v32, %v9025_v40  ;;  %v1407_v59 = vsel %vm9159_vm5, %v1405_v44, %v1406_v26  ;;  %v6730_v27 = vrot.slane %v12017_v21, 9 }
  0x6d   : > { %7662 = vmatmul.mubr.bf16.gmra.mxu1 %v9266_v43  ;;  %7791 = vmatprep.subr.bf16.mxu0 %v8570_v9  ;;  %v9351_v47 = vcombine.low %v1404_v18, %v1407_v59  ;;  %v1414_v35 = vsel %vm9159_vm5, %v1412_v37, %v1413_v31  ;;  %v1427_v55 = vrot.slane %v12018_v51, 5  ;;  %v9378_v19 = vcombine.low %v9124_v3, %v9129_v60  ;;  %v8705_v31 = vld [vmem:[%s8779_s8 + $0x6c] sm:$0xf]  ;;  %v8706_v59 = vld [vmem:[%s8779_s8 + $0x74] sm:$0x1]  ;;  %v8586_v51 = vld [vmem:[%s11881_s1 + $0x100] sm:$0xff]  }
  0x6e   : > { %7665 = vmatprep.mubr.bf16.mxu1 %v9274_v50  ;;  %7742 = vmatpush3.bf16.msra.mxu1 %v8565_v16  ;;  %v1417_v16 = vrot.slane %v9025_v40, 5  ;;  %v1411_v42 = vsel %vm9159_vm5, %v6728_v14, %v1410_v46  ;;  %v6731_v48 = vrot.slane %v9124_v3, 9  ;;  %v1431_v44 = vrot.slane %v9129_v60, 5  ;;  %v8582_v3 = vld [vmem:[%s11881_s1 + $0x108] sm:$0xff]  }
  0x6f   : > { %7743 = vmatprep.subr.bf16.mxu1 %v8569_v0  ;;  %v9372_v15 = vcombine.low %v1411_v42, %v1414_v35  ;;  %v9388_v46 = vcombine.low %v9299_v54, %v1379_v10  ;;  %v1392_v60 = vrot.slane %v8706_v59, 5  ;;  %v9401_v37 = vcombine.low %v1383_v23, %v1386_v11  ;;  %v8708_v35 = vld [vmem:[%s8779_s8 + $0x80] sm:$0x1] }
  0x70   : > { %7792 = vmatpush3.bf16.msra.mxu0 %v8570_v9  ;;  %v1418_v32 = vsel %vm9159_vm5, %v6729_v63, %v1417_v16  ;;  %v1419_v40 = vrot.slane %v1417_v16, 4  ;;  %v1424_v9 = vrot.slane %v12016_v5, 5  ;;  %v6725_v63 = vrot.slane %v8705_v31, 9  ;;  %v8581_v5 = vld [vmem:[%s11881_s1 + $0xc8] sm:$0xff]  }
  0x71   : > { %7793 = vmatprep.subr.bf16.mxu0 %v8574_v62  ;;  %v1432_v54 = vsel %vm9159_vm5, %v6731_v48, %v1431_v44  ;;  %v1433_v10 = vrot.slane %v1431_v44, 4  ;;  %v1398_v21 = vrot.slane %v1396_v7, 4  ;;  %v9418_v11 = vcombine.low %v9102_v24, %v9110_v1  ;;  %v8709_v48 = vld [vmem:[%s8779_s8 + $0x7c] sm:$0xf]  ;;  %v9482_v44 = vld [vmem:[%s8779_s8 + $0xc8] sm:$0x1] }
  0x72   : > { %7714 = vmatmul.mubr.bf16.gmra.mxu0 %v9295_v2  ;;  %7744 = vmatpush3.bf16.msra.mxu1 %v8569_v0  ;;  %v1421_v0 = vsel %vm9159_vm5, %v1419_v40, %v1420_v52  ;;  %v1425_v14 = vsel %vm9159_vm5, %v6730_v27, %v1424_v9  ;;  %v1426_v18 = vrot.slane %v1424_v9, 4  ;;  %v1391_v52 = vrot.slane %v1389_v38, 4 }
  0x73   : > { %7717 = vmatprep.mubr.bf16.mxu0 %v9303_v56  ;;  %7745 = vmatprep.subr.bf16.mxu1 %v8573_v6  ;;  %v9381_v26 = vcombine.low %v1418_v32, %v1421_v0  ;;  %v8707_v32 = vld [vmem:[%s8779_s8 + $0x78] sm:$0xf]  ;;  %v1399_v27 = vrot.slane %v8708_v35, 5  ;;  %v1390_v1 = vsel %vm9159_vm5, %v6725_v63, %v1389_v38  ;;  %v9459_v0 = vcombine.low %v8705_v31, %v9315_v36  ;;  %v9476_v36 = vld [vmem:[%s8779_s8 + $0xc0] sm:$0xf]  ;;  %v12023_v35 = vld [vmem:[#allocation10_spill] sm:$0xff] }
  0x74   : > { %7794 = vmatpush3.bf16.msra.mxu0 %v8574_v62  ;;  %v12019_v62 = vld [vmem:[#allocation18_spill] sm:$0xff]  ;;  %v1428_v42 = vsel %vm9159_vm5, %v1426_v18, %v1427_v55  ;;  %v6726_v40 = vrot.slane %v8707_v32, 9  ;;  %v9428_v55 = vcombine.low %v9291_v30, %v9256_v13  ;;  %v1393_v24 = vsel %vm9159_vm5, %v1391_v52, %v1392_v60  ;;  %v8588_v38 = vld [vmem:[%s11881_s1 + $0x1b8] sm:$0xff]   ;;  %v9479_v18 = vld [vmem:[%s8779_s8 + $0xc4] sm:$0xf] }
  0x75   : > { %7666 = vmatmul.mubr.bf16.gmra.mxu1 %v9278_v8  ;;  %7795 = vmatprep.subr.bf16.mxu0 %v8578_v4  ;;  %v1434_v16 = vrot.slane %v12019_v62, 5  ;;  %v1400_v30 = vsel %vm9159_vm5, %v1398_v21, %v1399_v27  ;;  %v2311_v31 = vrot.slane %v9479_v18, 5  ;;  %v6822_v63 = vrot.slane %v9476_v36, 9  ;;  %v12020_v60 = vld [vmem:[#allocation4_spill] sm:$0xff]  ;;  %v12021_v52 = vld [vmem:[#allocation6_spill] sm:$0xff]  ;;  %v8593_v21 = vld [vmem:[%s11881_s1 + $0x160] sm:$0xff]  }
  0x76   : > { %7669 = vmatprep.mubr.bf16.mxu1 %v9282_v57  ;;  %7746 = vmatpush3.bf16.msra.mxu1 %v8573_v6  ;;  %v9409_v6 = vcombine.low %v1425_v14, %v1428_v42  ;;  %v1397_v13 = vsel %vm9159_vm5, %v6726_v40, %v1396_v7  ;;  %v8587_v7 = vld [vmem:[%s11881_s1 + $0x178] sm:$0xff]   ;;  %v9463_v14 = vcombine.low %v8707_v32, %v8709_v48  ;;  %v2314_v62 = vrot.slane %v9482_v44, 5  ;;  %v8592_v32 = vld [vmem:[%s11881_s1 + $0x1a8] sm:$0xff]   ;;  %v12024_v27 = vld [vmem:[#allocation13_spill] sm:$0xff] }
  0x77   : > { %7747 = vmatprep.subr.bf16.mxu1 %v8577_v53  ;;  %v1435_v23 = vsel %vm9159_vm5, %v1433_v10, %v1434_v16  ;;  %v9453_v41 = vcombine.low %v1397_v13, %v1400_v30  ;;  %v2312_v16 = vsel %vm9159_vm5, %v6822_v63, %v2311_v31  ;;  %v8589_v10 = vld [vmem:[%s11881_s1 + $0x170] sm:$0xff]   ;;  %v12022_v40 = vld [vmem:[#allocation8_spill] sm:$0xff]  ;;  %v8600_v13 = vld [vmem:[%s11881_s1 + $0x188] sm:$0xff]  }
  0x78   : > { %7796 = vmatpush3.bf16.msra.mxu0 %v8578_v4  ;;  %v9420_v9 = vcombine.low %v1432_v54, %v1435_v23  ;;  %v8585_v4 = vld [vmem:[%s11881_s1 + $0xc0] sm:$0xff]   ;;  %v8590_v54 = vld [vmem:[%s11881_s1 + $0x1b0] sm:$0xff]   ;;  %v8596_v23 = vld [vmem:[%s11881_s1 + $0x198] sm:$0xff]  }
  0x79   : > { %7797 = vmatprep.subr.bf16.mxu0 %v8582_v3  ;;  %v8599_v30 = vld [vmem:[%s11881_s1 + $0x148] sm:$0xff]   ;;  %v12026_v48 = vld [vmem:[#allocation3_spill] sm:$0xff]  ;;  %v8605_v63 = vld [vmem:[%s11881_s1 + $0x238] sm:$0xff]  }
  0x7a   : > { %7718 = vmatmul.mubr.bf16.gmra.mxu0 %v9388_v46  ;;  %7748 = vmatpush3.bf16.msra.mxu1 %v8577_v53  ;;  %v9451_v53 = vcombine.low %v1390_v1, %v1393_v24  ;;  %v8598_v1 = vld [vmem:[%s11881_s1 + $0x190] sm:$0xff]  }
  0x7b   : > { %7721 = vmatprep.mubr.bf16.mxu0 %v9401_v37  ;;  %7749 = vmatprep.subr.bf16.mxu1 %v8581_v5  ;;  %v8597_v24 = vld [vmem:[%s11881_s1 + $0x150] sm:$0xff]  }
  0x7c   : > { %7798 = vmatpush3.bf16.msra.mxu0 %v8582_v3  ;;  %v2313_v3 = vrot.slane %v2311_v31, 4  ;;  %v12027_v31 = vld [vmem:[#allocation5_spill] sm:$0xff] }
  0x7d   : > { %7670 = vmatmul.mubr.bf16.gmra.mxu1 %v9418_v11  ;;  %7799 = vmatprep.subr.bf16.mxu0 %v8586_v51 }
  0x7e   : > { %7673 = vmatprep.mubr.bf16.mxu1 %v9428_v55  ;;  %7750 = vmatpush3.bf16.msra.mxu1 %v8581_v5  ;;  %v2315_v59 = vsel %vm9159_vm5, %v2313_v3, %v2314_v62  ;;  %v8594_v5 = vld [vmem:[%s11881_s1 + $0x1a0] sm:$0xff]   ;;  %v8604_v3 = vld [vmem:[%s11881_s1 + $0x1f8] sm:$0xff]   ;;  %v12028_v62 = vld [vmem:[#allocation7_spill] sm:$0xff] }
  0x7f   : > { %7751 = vmatprep.subr.bf16.mxu1 %v8585_v4  ;;  %v9494_v42 = vcombine.low %v2312_v16, %v2315_v59  ;;  %v12029_v16 = vld [vmem:[#allocation9_spill] sm:$0xff]  ;;  %v2023_v59 = vshrl.u32 %v9476_v36, 16 }
  0x80   : > { %7800 = vmatpush3.bf16.msra.mxu0 %v8586_v51  ;;  %v8595_v51 = vld [vmem:[%s11881_s1 + $0x158] sm:$0xff]  }
  0x81   : > { %7881 = vmatprep.subr.bf16.mxu0 %v8588_v38 }
  0x82   : > { %7722 = vmatmul.mubr.bf16.gmra.mxu0 %v9451_v53  ;;  %7752 = vmatpush3.bf16.msra.mxu1 %v8585_v4  ;;  %v12025_v4 = vld [vmem:[#allocation17_spill] sm:$0xff] }
  0x83   : > { %7725 = vmatprep.mubr.bf16.mxu0 %v9453_v41  ;;  %7833 = vmatprep.subr.bf16.mxu1 %v8587_v7 }
  0x85   : > { %7674 = vmatmul.mubr.bf16.gmra.mxu1 %v9459_v0 }
  0x86   : > { %7677 = vmatprep.mubr.bf16.mxu1 %v9463_v14 }
  0x8a   : > { %7726 = vmatmul.mubr.bf16.gmra.mxu0 %v9351_v47 }
  0x8b   : > { %7729 = vmatprep.mubr.bf16.mxu0 %v9372_v15 }
  0x8d   : > { %7678 = vmatmul.mubr.bf16.gmra.mxu1 %v9312_v25 }
  0x8e   : > { %7681 = vmatprep.mubr.bf16.mxu1 %v9327_v17 }
  0x92   : > { %7730 = vmatmul.mubr.bf16.gmra.mxu0 %v9381_v26 }
  0x93   : > { %7733 = vmatprep.mubr.bf16.mxu0 %v9409_v6 }
  0x95   : > { %7682 = vmatmul.mubr.bf16.gmra.mxu1 %v9342_v34 }
  0x96   : > { %7685 = vmatprep.mubr.bf16.mxu1 %v9360_v39 }
  0x9a   : > { %7734 = vmatmul.mubr.bf16.gmra.mxu0 %v9420_v9 }
  0x9b   : > { %7801 = vmatprep.mubr.bf16.mxu0 %v12020_v60 }
  0x9d   : > { %7686 = vmatmul.mubr.bf16.gmra.mxu1 %v9378_v19 }
  0x9e   : > { %7753 = vmatprep.mubr.bf16.mxu1 %v8858_v22  ;;  %v8591_v22 = vld [vmem:[%s11881_s1 + $0x168] sm:$0xff]  }
  0xa2   : > { %7802 = vmatmul.mubr.bf16.vlgmr.msra.gmra.mxu0 %v12021_v52 }
  0xa3   : > { %7882 = vmatpush3.bf16.msra.mxu0 %v8588_v38  ;;  %7805 = vmatprep.mubr.bf16.mxu0 %v12022_v40  ;;  %v8603_v38 = vld [vmem:[%s11881_s1 + $0x180] sm:$0xff]  }
  0xa4   : > { %7883 = vmatprep.subr.bf16.mxu0 %v8590_v54 }
  0xa5   : > { %7754 = vmatmul.mubr.bf16.vlgmr.msra.gmra.mxu1 %v9184_v33 }
  0xa6   : > { %7834 = vmatpush3.bf16.msra.mxu1 %v8587_v7  ;;  %7757 = vmatprep.mubr.bf16.mxu1 %v9266_v43  ;;  %v8602_v7 = vld [vmem:[%s11881_s1 + $0x140] sm:$0xff]  }
  0xa7   : > { %7835 = vmatprep.subr.bf16.mxu1 %v8589_v10  ;;  %7884 = vmatpush3.bf16.msra.mxu0 %v8590_v54  ;;  %v2026_v54 = vshll.u32 %v9476_v36, 16 }
  0xa8   : > { %7885 = vmatprep.subr.bf16.mxu0 %v8592_v32 }
  0xaa   : > { %7806 = vmatmul.mubr.bf16.gmra.mxu0 %v12023_v35  ;;  %7836 = vmatpush3.bf16.msra.mxu1 %v8589_v10  ;;  %v2036_v10 = vshrl.u32 %v9479_v18, 16 }
  0xab   : > { %7809 = vmatprep.mubr.bf16.mxu0 %v12024_v27  ;;  %7837 = vmatprep.subr.bf16.mxu1 %v8591_v22 }
  0xac   : > { %7886 = vmatpush3.bf16.msra.mxu0 %v8592_v32  ;;  %v2032_v32 = vshll.u32 %v9479_v18, 16 }
  0xad   : > { %7758 = vmatmul.mubr.bf16.gmra.mxu1 %v9274_v50  ;;  %7887 = vmatprep.subr.bf16.mxu0 %v8594_v5 }
  0xae   : > { %7761 = vmatprep.mubr.bf16.mxu1 %v9278_v8  ;;  %7838 = vmatpush3.bf16.msra.mxu1 %v8591_v22  ;;  %v2025_v22 = vrot.slane %v2023_v59, 4 }
  0xaf   : > { %7839 = vmatprep.subr.bf16.mxu1 %v8593_v21 }
  0xb0   : > { %7888 = vmatpush3.bf16.msra.mxu0 %v8594_v5  ;;  %v2028_v5 = vrot.slane %v2026_v54, 5 }
  0xb1   : > { %7889 = vmatprep.subr.bf16.mxu0 %v8596_v23 }
  0xb2   : > { %7810 = vmatmul.mubr.bf16.gmra.mxu0 %v12025_v4  ;;  %7840 = vmatpush3.bf16.msra.mxu1 %v8593_v21  ;;  %v2034_v21 = vrot.slane %v2032_v32, 5 }
  0xb3   : > { %7813 = vmatprep.mubr.bf16.mxu0 %v9174_v20  ;;  %7841 = vmatprep.subr.bf16.mxu1 %v8595_v51 }
  0xb4   : > { %7890 = vmatpush3.bf16.msra.mxu0 %v8596_v23  ;;  %v2038_v23 = vrot.slane %v2036_v10, 4  ;;  %v9587_v10 = vcombine.low %v9476_v36, %v9479_v18  ;;  %v8606_v36 = vld [vmem:[%s11881_s1 + $0x1f0] sm:$0xff]  }
  0xb5   : > { %7762 = vmatmul.mubr.bf16.gmra.mxu1 %v9282_v57  ;;  %7891 = vmatprep.subr.bf16.mxu0 %v8598_v1 }
  0xb6   : > { %7765 = vmatprep.mubr.bf16.mxu1 %v9418_v11  ;;  %7842 = vmatpush3.bf16.msra.mxu1 %v8595_v51  ;;  %v12030_v51 = vld [vmem:[#allocation11_spill] sm:$0xff] }
  0xb7   : > { %7843 = vmatprep.subr.bf16.mxu1 %v8597_v24 }
  0xb8   : > { %7892 = vmatpush3.bf16.msra.mxu0 %v8598_v1  ;;  %v12031_v1 = vld [vmem:[#allocation16_spill] sm:$0xff] }
  0xb9   : > { %7893 = vmatprep.subr.bf16.mxu0 %v8600_v13 }
  0xba   : > { %7814 = vmatmul.mubr.bf16.gmra.mxu0 %v12026_v48  ;;  %7844 = vmatpush3.bf16.msra.mxu1 %v8597_v24  ;;  %v2029_v24 = vor.u32 %v2028_v5, %v2025_v22  ;;  %v8615_v22 = vld [vmem:[%s11881_s1 + $0x210] sm:$0xff]  }
  0xbb   : > { %7817 = vmatprep.mubr.bf16.mxu0 %v12027_v31  ;;  %7845 = vmatprep.subr.bf16.mxu1 %v8599_v30 }
  0xbc   : > { %7894 = vmatpush3.bf16.msra.mxu0 %v8600_v13  ;;  %v2039_v13 = vor.u32 %v2038_v23, %v2034_v21 }
  0xbd   : > { %7766 = vmatmul.mubr.bf16.gmra.mxu1 %v9428_v55  ;;  %7895 = vmatprep.subr.bf16.mxu0 %v8603_v38 }
  0xbe   : > { %7769 = vmatprep.mubr.bf16.mxu1 %v9459_v0  ;;  %7846 = vmatpush3.bf16.msra.mxu1 %v8599_v30  ;;  %v2042_v30 = vshll.u32 %v9482_v44, 16 }
  0xbf   : > { %7847 = vmatprep.subr.bf16.mxu1 %v8602_v7 }
  0xc0   : > { %7896 = vmatpush3.bf16.msra.mxu0 %v8603_v38  ;;  %v2030_v38 = vrot.slane %v2029_v24, 4  ;;  %v2044_v60 = vrot.slane %v2042_v30, 5  ;;  %v8620_v30 = vld [vmem:[%s11881_s1 + $0x200] sm:$0xff]  }
  0xc1   : > { %7977 = vmatprep.subr.bf16.mxu0 %v8605_v63 }
  0xc2   : > { %7818 = vmatmul.mubr.bf16.gmra.mxu0 %v12028_v62  ;;  %7848 = vmatpush3.bf16.msra.mxu1 %v8602_v7  ;;  %v2040_v7 = vrot.slane %v2039_v13, 4  ;;  %v2035_v59 = vsel %vm8813_vm2, %v2030_v38, %v2034_v21  ;;  %v8614_v21 = vld [vmem:[%s11881_s1 + $0x1d0] sm:$0xff]  }
  0xc3   : > { %7821 = vmatprep.mubr.bf16.mxu0 %v12029_v16  ;;  %7929 = vmatprep.subr.bf16.mxu1 %v8604_v3 }
  0xc4   : > { %v2045_v54 = vsel %vm8813_vm2, %v2040_v7, %v2044_v60  ;;  %v8607_v60 = vld [vmem:[%s11881_s1 + $0x230] sm:$0xff]   ;;  %v8619_v7 = vld [vmem:[%s11881_s1 + $0x1c0] sm:$0xff]  }
  0xc5   : > { %7770 = vmatmul.mubr.bf16.gmra.mxu1 %v9463_v14  ;;  %v9583_v44 = vcombine.low %v2035_v59, %v2045_v54 }
  0xc6   : > { %7773 = vmatprep.mubr.bf16.mxu1 %v9312_v25 }
  0xc7   : > { %12033 = vst [vmem:[#allocation14_spill] sm:$0xff] %v9583_v44 }
  0xca   : > { %7822 = vmatmul.mubr.bf16.gmra.mxu0 %v12030_v51 }
  0xcb   : > { %7825 = vmatprep.mubr.bf16.mxu0 %v12031_v1 }
  0xcd   : > { %7774 = vmatmul.mubr.bf16.gmra.mxu1 %v9327_v17 }
  0xce   : > { %7777 = vmatprep.mubr.bf16.mxu1 %v9342_v34 }
  0xd2   : > { %7826 = vmatmul.mubr.bf16.gmra.mxu0 %v12032_v58 }
  0xd3   : > { %7829 = vmatprep.mubr.bf16.mxu0 %v9193_v61 }
  0xd5   : > { %7778 = vmatmul.mubr.bf16.gmra.mxu1 %v9360_v39 }
  0xd6   : > { %7781 = vmatprep.mubr.bf16.mxu1 %v9378_v19 }
  0xda   : > { %7830 = vmatmul.mubr.bf16.gmra.mxu0 %v9583_v44 }
  0xdb   : > { %7897 = vmatprep.mubr.bf16.mxu0 %v9184_v33  ;;  %v8609_v33 = vld [vmem:[%s11881_s1 + $0x228] sm:$0xff]  }
  0xdd   : > { %7782 = vmatmul.mubr.bf16.gmra.mxu1 %v9587_v10 }
  0xde   : > { %7849 = vmatprep.mubr.bf16.mxu1 %v9209_v12  ;;  %v8608_v12 = vld [vmem:[%s11881_s1 + $0x1e8] sm:$0xff]  }
  0xe2   : > { %7898 = vmatmul.mubr.bf16.vlgmr.msra.gmra.mxu0 %v9266_v43  ;;  %v8611_v43 = vld [vmem:[%s11881_s1 + $0x220] sm:$0xff]  }
  0xe3   : > { %7978 = vmatpush3.bf16.msra.mxu0 %v8605_v63  ;;  %7901 = vmatprep.mubr.bf16.mxu0 %v9274_v50  ;;  %v8610_v50 = vld [vmem:[%s11881_s1 + $0x1e0] sm:$0xff]  }
  0xe4   : > { %7979 = vmatprep.subr.bf16.mxu0 %v8607_v60 }
  0xe5   : > { %7850 = vmatmul.mubr.bf16.vlgmr.msra.gmra.mxu1 %v9214_v28 }
  0xe6   : > { %7930 = vmatpush3.bf16.msra.mxu1 %v8604_v3  ;;  %7853 = vmatprep.mubr.bf16.mxu1 %v9247_v49  ;;  %v8612_v3 = vld [vmem:[%s11881_s1 + $0x1d8] sm:$0xff]  }
  0xe7   : > { %7931 = vmatprep.subr.bf16.mxu1 %v8606_v36  ;;  %7980 = vmatpush3.bf16.msra.mxu0 %v8607_v60 }
  0xe8   : > { %7981 = vmatprep.subr.bf16.mxu0 %v8609_v33 }
  0xea   : > { %7902 = vmatmul.mubr.bf16.gmra.mxu0 %v9278_v8  ;;  %7932 = vmatpush3.bf16.msra.mxu1 %v8606_v36  ;;  %v8613_v8 = vld [vmem:[%s11881_s1 + $0x218] sm:$0xff]  }
  0xeb   : > { %7905 = vmatprep.mubr.bf16.mxu0 %v9282_v57  ;;  %7933 = vmatprep.subr.bf16.mxu1 %v8608_v12 }
  0xec   : > { %v9617_v18 = vpop.f32.mrf.mxu0  ;;  %7982 = vmatpush3.bf16.msra.mxu0 %v8609_v33  ;;  %v9620_v63 = vpop.f32.mrf.mxu1 }
  0xed   : > { %7854 = vmatmul.mubr.bf16.gmra.mxu1 %v9249_v45  ;;  %7983 = vmatprep.subr.bf16.mxu0 %v8611_v43 }
  0xee   : > { %7857 = vmatprep.mubr.bf16.mxu1 %v9295_v2  ;;  %7934 = vmatpush3.bf16.msra.mxu1 %v8608_v12  ;;  %v9626_v57 = vpop.f32.mrf.mxu0  ;;  %v9631_v32 = vpop.f32.mrf.mxu1 }
  0xef   : > { %7935 = vmatprep.subr.bf16.mxu1 %v8610_v50 }
  0xf0   : > { %7984 = vmatpush3.bf16.msra.mxu0 %v8611_v43  ;;  %v9637_v5 = vpop.f32.mrf.mxu0  ;;  %v9644_v23 = vpop.f32.mrf.mxu1 }
  0xf1   : > { %7985 = vmatprep.subr.bf16.mxu0 %v8613_v8 }
  0xf2   : > { %7906 = vmatmul.mubr.bf16.gmra.mxu0 %v9418_v11  ;;  %7936 = vmatpush3.bf16.msra.mxu1 %v8610_v50  ;;  %v8617_v11 = vld [vmem:[%s11881_s1 + $0x208] sm:$0xff]   ;;  %v9650_v24 = vpop.f32.mrf.mxu0  ;;  %v9655_v13 = vpop.f32.mrf.mxu1 }
  0xf3   : > { %7909 = vmatprep.mubr.bf16.mxu0 %v9428_v55  ;;  %7937 = vmatprep.subr.bf16.mxu1 %v8612_v3  ;;  %v8616_v55 = vld [vmem:[%s11881_s1 + $0x1c8] sm:$0xff]   ;;  %12034 = vst [vmem:[#allocation12_spill] sm:$0xff] %v9655_v13 }
  0xf4   : > { %7986 = vmatpush3.bf16.msra.mxu0 %v8613_v8  ;;  %v9707_v8 = vld [vmem:[%s8779_s8 + $0xd0] sm:$0xf] }
  0xf5   : > { %7858 = vmatmul.mubr.bf16.gmra.mxu1 %v9303_v56  ;;  %7987 = vmatprep.subr.bf16.mxu0 %v8615_v22 }
  0xf6   : > { %7861 = vmatprep.mubr.bf16.mxu1 %v9388_v46  ;;  %7938 = vmatpush3.bf16.msra.mxu1 %v8612_v3 }
  0xf7   : > { %7939 = vmatprep.subr.bf16.mxu1 %v8614_v21  ;;  %v9661_v38 = vpop.f32.mrf.mxu0 }
  0xf8   : > { %7988 = vmatpush3.bf16.msra.mxu0 %v8615_v22 }
  0xf9   : > { %7989 = vmatprep.subr.bf16.mxu0 %v8617_v11  ;;  %v9671_v54 = vpop.f32.mrf.mxu0 }
  0xfa   : > { %7910 = vmatmul.mubr.bf16.gmra.mxu0 %v9459_v0  ;;  %7940 = vmatpush3.bf16.msra.mxu1 %v8614_v21 }
  0xfb   : > { %7913 = vmatprep.mubr.bf16.mxu0 %v9463_v14  ;;  %7941 = vmatprep.subr.bf16.mxu1 %v8616_v55  ;;  %v9668_v59 = vpop.f32.mrf.mxu1  ;;  %v9676_v14 = vpop.f32.mrf.mxu0 }
  0xfc   : > { %7990 = vmatpush3.bf16.msra.mxu0 %v8617_v11 }
  0xfd   : > { %7862 = vmatmul.mubr.bf16.gmra.mxu1 %v9401_v37  ;;  %7991 = vmatprep.subr.bf16.mxu0 %v8620_v30  ;;  %v9673_v0 = vpop.f32.mrf.mxu1  ;;  %v9683_v36 = vpop.f32.mrf.mxu0 }
  0xfe   : > { %7865 = vmatprep.mubr.bf16.mxu1 %v9451_v53  ;;  %7942 = vmatpush3.bf16.msra.mxu1 %v8616_v55 }
  0xff   : > { %7943 = vmatprep.subr.bf16.mxu1 %v8619_v7  ;;  %v9680_v60 = vpop.f32.mrf.mxu1 }
 0x100   : > { %7992 = vmatpush3.bf16.msra.mxu0 %v8620_v30 }
 0x101   : > { %v9685_v33 = vpop.f32.mrf.mxu1 }
 0x102   : > { %7914 = vmatmul.mubr.bf16.gmra.mxu0 %v9312_v25  ;;  %7944 = vmatpush3.bf16.msra.mxu1 %v8619_v7  ;;  %12035 = vst [vmem:[#allocation15_spill] sm:$0xff] %v9685_v33 }
 0x103   : > { %7917 = vmatprep.mubr.bf16.mxu0 %v9327_v17 }
 0x105   : > { %7866 = vmatmul.mubr.bf16.gmra.mxu1 %v9453_v41 }
 0x106   : > { %7869 = vmatprep.mubr.bf16.mxu1 %v9351_v47 }
 0x108   : > { %v9688_v25 = vpop.f32.mrf.mxu0 }
 0x10a   : > { %7918 = vmatmul.mubr.bf16.gmra.mxu0 %v9342_v34  ;;  %v9695_v12 = vpop.f32.mrf.mxu0  ;;  %v9704_v34 = vld [vmem:[%s8779_s8 + $0xcc] sm:$0xf] }
 0x10b   : > { %7921 = vmatprep.mubr.bf16.mxu0 %v9360_v39  ;;  %v6864_v22 = vcombine.low %v9704_v34, %v9707_v8 }
 0x10c   : > { %v9692_v17 = vpop.f32.mrf.mxu1  ;;  %v9700_v50 = vpop.f32.mrf.mxu0 }
 0x10d   : > { %7870 = vmatmul.mubr.bf16.gmra.mxu1 %v9372_v15 }
 0x10e   : > { %7873 = vmatprep.mubr.bf16.mxu1 %v9381_v26  ;;  %v9697_v43 = vpop.f32.mrf.mxu1  ;;  %v9712_v3 = vpop.f32.mrf.mxu0 }
 0x10f   : > { %12036 = vst [vmem:[#allocation18_spill] sm:$0xff] %v9697_v43 }
 0x110   : > { %v9710_v39 = vpop.f32.mrf.mxu1 }
 0x111   : > { %12037 = vst [vmem:[#allocation23_spill] sm:$0xff] %v9710_v39 }
 0x112   : > { %7922 = vmatmul.mubr.bf16.gmra.mxu0 %v9378_v19  ;;  %v9717_v19 = vpop.f32.mrf.mxu1 }
 0x113   : > { %7925 = vmatprep.mubr.bf16.mxu0 %v9587_v10  ;;  %12038 = vst [vmem:[#allocation24_spill] sm:$0xff] %v9717_v19 }
 0x115   : > { %7874 = vmatmul.mubr.bf16.gmra.mxu1 %v9409_v6 }
 0x116   : > { %7877 = vmatprep.mubr.bf16.mxu1 %v9420_v9 }
 0x11a   : > { %v9719_v21 = vpop.f32.mrf.mxu0  ;;  %7926 = vmatmul.mubr.bf16.gmra.mxu0 %v6864_v22 }
 0x11b   : > { %7993 = vmatprep.mubr.bf16.mxu0 %v9214_v28 }
 0x11c   : > { %v9722_v10 = vpop.f32.mrf.mxu0 }
 0x11d   : > { %v9724_v11 = vpop.f32.mrf.mxu1  ;;  %7878 = vmatmul.mubr.bf16.gmra.mxu1 %v9494_v42 }
 0x11e   : > { %12039 = vst [vmem:[#allocation25_spill] sm:$0xff] %v9724_v11  ;;  %v9727_v55 = vpop.f32.mrf.mxu0  ;;  %7945 = vmatprep.mubr.bf16.mxu1 %v12021_v52 }
 0x11f   : > { %v9730_v30 = vpop.f32.mrf.mxu1 }
 0x120   : > { %12040 = vst [vmem:[#allocation26_spill] sm:$0xff] %v9730_v30  ;;  %v9732_v7 = vpop.f32.mrf.mxu0 }
 0x121   : > { %v9734_v19 = vpop.f32.mrf.mxu1 }
 0x122   : > { %12041 = vst [vmem:[#allocation27_spill] sm:$0xff] %v9734_v19  ;;  %v7707_v33 = vpop.f32.mrf.mxu0  ;;  %7994 = vmatmul.mubr.bf16.vlgmr.msra.gmra.mxu0 %v9247_v49 }
 0x123   : > { %v9737_v28 = vpop.f32.mrf.mxu1  ;;  %7997 = vmatprep.mubr.bf16.mxu0 %v9249_v45 }
 0x124   : > { %12042 = vst [vmem:[#allocation28_spill] sm:$0xff] %v9737_v28  ;;  %v1599_v22 = vpop.f32.mrf.mxu0 }
 0x125   : > { %v7659_v13 = vpop.f32.mrf.mxu1  ;;  %7946 = vmatmul.mubr.bf16.vlgmr.msra.gmra.mxu1 %v12022_v40 }
 0x126   : > { %v1187_v11 = vadd.f32 %v7659_v13, %v9617_v18  ;;  %v7708_v52 = vpop.f32.mrf.mxu0  ;;  %7949 = vmatprep.mubr.bf16.mxu1 %v12023_v35 }
 0x127   : > { %v1178_v30 = vpop.f32.mrf.mxu1 }
 0x128   : > { %v9743_v39 = vadd.f32 %v7707_v33, %v1187_v11  ;;  %v1179_v19 = vadd.f32 %v1178_v30, %v9626_v57  ;;  %v1602_v43 = vpop.f32.mrf.mxu0 }
 0x129   : > { %v7660_v49 = vpop.f32.mrf.mxu1 }
 0x12a   : > { %v9746_v44 = vadd.f32 %v1599_v22, %v1179_v19  ;;  %v1190_v45 = vadd.f32 %v7660_v49, %v9637_v5  ;;  %v7711_v28 = vpop.f32.mrf.mxu0  ;;  %7998 = vmatmul.mubr.bf16.gmra.mxu0 %v9295_v2 }
 0x12b   : > { %v1181_v40 = vpop.f32.mrf.mxu1  ;;  %8001 = vmatprep.mubr.bf16.mxu0 %v9303_v56 }
 0x12c   : > { %v9751_v18 = vadd.f32 %v7708_v52, %v1190_v45  ;;  %v1182_v13 = vadd.f32 %v1181_v40, %v9650_v24  ;;  %v1615_v33 = vpop.f32.mrf.mxu0 }
 0x12d   : > { %v7663_v11 = vpop.f32.mrf.mxu1  ;;  %7950 = vmatmul.mubr.bf16.gmra.mxu1 %v12024_v27 }
 0x12e   : > { %v9755_v57 = vadd.f32 %v1602_v43, %v1182_v13  ;;  %v1203_v19 = vadd.f32 %v7663_v11, %v9661_v38  ;;  %v7712_v30 = vpop.f32.mrf.mxu0  ;;  %7953 = vmatprep.mubr.bf16.mxu1 %v12025_v4 }
 0x12f   : > { %v1194_v5 = vpop.f32.mrf.mxu1 }
 0x130   : > { %v9759_v2 = vadd.f32 %v7711_v28, %v1203_v19  ;;  %v1195_v56 = vadd.f32 %v1194_v5, %v9671_v54  ;;  %v1618_v52 = vpop.f32.mrf.mxu0 }
 0x131   : > { %v7664_v22 = vpop.f32.mrf.mxu1 }
 0x132   : > { %v9762_v49 = vadd.f32 %v1615_v33, %v1195_v56  ;;  %v1206_v40 = vadd.f32 %v7664_v22, %v9676_v14  ;;  %v7715_v24 = vpop.f32.mrf.mxu0  ;;  %8002 = vmatmul.mubr.bf16.gmra.mxu0 %v9388_v46 }
 0x133   : > { %v1197_v43 = vpop.f32.mrf.mxu1  ;;  %8005 = vmatprep.mubr.bf16.mxu0 %v9401_v37 }
 0x134   : > { %v9767_v38 = vadd.f32 %v7712_v30, %v1206_v40  ;;  %v1198_v45 = vadd.f32 %v1197_v43, %v9683_v36  ;;  %v1631_v28 = vpop.f32.mrf.mxu0 }
 0x135   : > { %v7667_v13 = vpop.f32.mrf.mxu1  ;;  %7954 = vmatmul.mubr.bf16.gmra.mxu1 %v9174_v20 }
 0x136   : > { %v9771_v54 = vadd.f32 %v1618_v52, %v1198_v45  ;;  %v1219_v33 = vadd.f32 %v7667_v13, %v9688_v25  ;;  %v7716_v11 = vpop.f32.mrf.mxu0  ;;  %7957 = vmatprep.mubr.bf16.mxu1 %v12026_v48 }
 0x137   : > { %v1210_v14 = vpop.f32.mrf.mxu1 }
 0x138   : > { %v9775_v46 = vadd.f32 %v7715_v24, %v1219_v33  ;;  %v1211_v37 = vadd.f32 %v1210_v14, %v9695_v12  ;;  %v1634_v19 = vpop.f32.mrf.mxu0 }
 0x139   : > { %v7668_v30 = vpop.f32.mrf.mxu1 }
 0x13a   : > { %v9778_v5 = vadd.f32 %v1631_v28, %v1211_v37  ;;  %v1222_v36 = vadd.f32 %v7668_v30, %v9700_v50  ;;  %v7719_v56 = vpop.f32.mrf.mxu0  ;;  %8006 = vmatmul.mubr.bf16.gmra.mxu0 %v9451_v53  ;;  %v2843_v30 = vshrl.u32 %v9704_v34, 16 }
 0x13b   : > { %v1213_v52 = vpop.f32.mrf.mxu1  ;;  %8009 = vmatprep.mubr.bf16.mxu0 %v9453_v41 }
 0x13c   : > { %v9783_v25 = vadd.f32 %v7716_v11, %v1222_v36  ;;  %v1214_v22 = vadd.f32 %v1213_v52, %v9712_v3  ;;  %v1647_v40 = vpop.f32.mrf.mxu0  ;;  %v2846_v36 = vshll.u32 %v9704_v34, 16 }
 0x13d   : > { %v7671_v24 = vpop.f32.mrf.mxu1  ;;  %7958 = vmatmul.mubr.bf16.gmra.mxu1 %v12027_v31 }
 0x13e   : > { %v9787_v12 = vadd.f32 %v1634_v19, %v1214_v22  ;;  %v1235_v43 = vadd.f32 %v7671_v24, %v9719_v21  ;;  %v7720_v45 = vpop.f32.mrf.mxu0  ;;  %7961 = vmatprep.mubr.bf16.mxu1 %v12028_v62  ;;  %v8622_v22 = vld [vmem:[%s11883_s3 + $0x38] sm:$0xff]  }
 0x13f   : > { %v1226_v50 = vpop.f32.mrf.mxu1  ;;  %8073 = vmatprep.subr.bf16.mxu0 %v8622_v22 }
 0x140   : > { %v9791_v53 = vadd.f32 %v7719_v56, %v1235_v43  ;;  %v1227_v41 = vadd.f32 %v1226_v50, %v9722_v10  ;;  %v1650_v28 = vpop.f32.mrf.mxu0  ;;  %v8621_v10 = vld [vmem:[%s11883_s3 + $0x78] sm:$0xff]   ;;  %v2845_v50 = vrot.slane %v2843_v30, 4  ;;  %8074 = vmatpush3.bf16.msra.mxu0 %v8622_v22 }
 0x141   : > { %v7672_v13 = vpop.f32.mrf.mxu1  ;;  %8025 = vmatprep.subr.bf16.mxu1 %v8621_v10 }
 0x142   : > { %v9794_v33 = vadd.f32 %v1647_v40, %v1227_v41  ;;  %v1238_v3 = vadd.f32 %v7672_v13, %v9727_v55  ;;  %v7723_v11 = vpop.f32.mrf.mxu0  ;;  %8010 = vmatmul.mubr.bf16.gmra.mxu0 %v9351_v47  ;;  %v2852_v47 = vshll.u32 %v9707_v8, 16  ;;  %8026 = vmatpush3.bf16.msra.mxu1 %v8621_v10  ;;  %v306_v10 = vld [vmem:[%s8779_s8 + $0xd4] sm:$0x1] }
 0x143   : > { %v1229_v14 = vpop.f32.mrf.mxu1  ;;  %8013 = vmatprep.mubr.bf16.mxu0 %v9372_v15  ;;  %v2856_v15 = vshrl.u32 %v9707_v8, 16 }
 0x144   : > { %v9799_v21 = vadd.f32 %v7720_v45, %v1238_v3  ;;  %v1230_v37 = vadd.f32 %v1229_v14, %v9732_v7  ;;  %v1663_v19 = vpop.f32.mrf.mxu0 }
 0x145   : > { %v7675_v55 = vpop.f32.mrf.mxu1  ;;  %7962 = vmatmul.mubr.bf16.gmra.mxu1 %v12029_v16  ;;  %v2858_v13 = vrot.slane %v2856_v15, 4  ;;  %v8624_v15 = vld [vmem:[%s11883_s3 + $0x30] sm:$0xff]  }
 0x146   : > { %v9810_v56 = vadd.f32 %v1650_v28, %v1230_v37  ;;  %v1251_v7 = vadd.f32 %v7675_v55, %v9620_v63  ;;  %v7724_v52 = vpop.f32.mrf.mxu0  ;;  %7965 = vmatprep.mubr.bf16.mxu1 %v12030_v51  ;;  %v2848_v63 = vrot.slane %v2846_v36, 5  ;;  %v9822_v28 = vrot.slane %v2852_v47, 5  ;;  %8075 = vmatprep.subr.bf16.mxu0 %v8624_v15 }
 0x147   : > { %v1242_v40 = vpop.f32.mrf.mxu1  ;;  %8076 = vmatpush3.bf16.msra.mxu0 %v8624_v15 }
 0x148   : > { %v9817_v24 = vadd.f32 %v7723_v11, %v1251_v7  ;;  %v1243_v43 = vadd.f32 %v1242_v40, %v9631_v32  ;;  %v9820_v45 = vpop.f32.mrf.mxu0  ;;  %v3131_v32 = vrot.slane %v9707_v8, 5  ;;  %v2859_v8 = vor.u32 %v2858_v13, %v9822_v28 }
 0x149   : > { %v7676_v41 = vpop.f32.mrf.mxu1  ;;  %v6898_v7 = vrot.slane %v9704_v34, 9  ;;  %v3134_v40 = vrot.slane %v306_v10, 5 }
 0x14a   : > { %v9824_v3 = vadd.f32 %v1663_v19, %v1243_v43  ;;  %v1254_v14 = vadd.f32 %v7676_v41, %v9644_v23  ;;  %v7727_v37 = vpop.f32.mrf.mxu0  ;;  %8014 = vmatmul.mubr.bf16.gmra.mxu0 %v9381_v26  ;;  %v8623_v19 = vld [vmem:[%s11883_s3 + $0x70] sm:$0xff]   ;;  %v2849_v23 = vor.u32 %v2848_v63, %v2845_v50  ;;  %v3133_v22 = vrot.slane %v3131_v32, 4 }
 0x14b   : > { %v9829_v11 = vpop.f32.mrf.mxu1  ;;  %8017 = vmatprep.mubr.bf16.mxu0 %v9409_v6  ;;  %v2862_v6 = vshll.u32 %v306_v10, 16  ;;  %8027 = vmatprep.subr.bf16.mxu1 %v8623_v19  ;;  %v2860_v34 = vrot.slane %v2859_v8, 4 }
 0x14c   : > { %v9833_v30 = vadd.f32 %v7724_v52, %v1254_v14  ;;  %v1679_v36 = vpop.f32.mrf.mxu0  ;;  %8028 = vmatpush3.bf16.msra.mxu1 %v8623_v19  ;;  %v2850_v41 = vrot.slane %v2849_v23, 4  ;;  %v3135_v23 = vsel %vm9159_vm5, %v3133_v22, %v3134_v40  ;;  %v12045_v40 = vld [vmem:[#allocation18_spill] sm:$0xff] }
 0x14d   : > { %v7679_v55 = vpop.f32.mrf.mxu1  ;;  %7966 = vmatmul.mubr.bf16.gmra.mxu1 %v12031_v1  ;;  %v2864_v10 = vrot.slane %v2862_v6, 5  ;;  %v12044_v6 = vld [vmem:[#allocation14_spill] sm:$0xff] }
 0x14e   : > { %v1267_v26 = vadd.f32 %v7679_v55, %v9668_v59  ;;  %v7728_v47 = vpop.f32.mrf.mxu0  ;;  %7969 = vmatprep.mubr.bf16.mxu1 %v12032_v58 }
 0x14f   : > { %v1258_v52 = vpop.f32.mrf.mxu1 }
 0x150   : > { %v9846_v43 = vadd.f32 %v7727_v37, %v1267_v26  ;;  %v1259_v59 = vadd.f32 %v1258_v52, %v9673_v0  ;;  %v9849_v50 = vpop.f32.mrf.mxu0  ;;  %v3132_v37 = vsel %vm9159_vm5, %v6898_v7, %v3131_v32  ;;  %v8626_v7 = vld [vmem:[%s11883_s3 + $0x28] sm:$0xff]  }
 0x151   : > { %v7680_v63 = vpop.f32.mrf.mxu1  ;;  %v6915_v15 = vcombine.low %v3132_v37, %v3135_v23  ;;  %8077 = vmatprep.subr.bf16.mxu0 %v8626_v7  ;;  %v8627_v37 = vld [vmem:[%s11883_s3 + $0x60] sm:$0xff]  }
 0x152   : > { %v9851_v13 = vadd.f32 %v1679_v36, %v1259_v59  ;;  %v1270_v14 = vadd.f32 %v7680_v63, %v9680_v60  ;;  %v7731_v55 = vpop.f32.mrf.mxu0  ;;  %8018 = vmatmul.mubr.bf16.gmra.mxu0 %v9420_v9  ;;  %v8625_v60 = vld [vmem:[%s11883_s3 + $0x68] sm:$0xff]  }
 0x153   : > { %v9855_v19 = vpop.f32.mrf.mxu1  ;;  %8021 = vmatprep.mubr.bf16.mxu0 %v9494_v42  ;;  %v2855_v42 = vsel %vm8813_vm2, %v2850_v41, %v9822_v28  ;;  %8029 = vmatprep.subr.bf16.mxu1 %v8625_v60  ;;  %v12046_v41 = vld [vmem:[#allocation23_spill] sm:$0xff] }
 0x154   : > { %v9862_v26 = vadd.f32 %v7728_v47, %v1270_v14  ;;  %v1695_v36 = vpop.f32.mrf.mxu0  ;;  %v2865_v47 = vsel %vm8813_vm2, %v2860_v34, %v2864_v10  ;;  %8030 = vmatpush3.bf16.msra.mxu1 %v8625_v60  ;;  %8078 = vmatpush3.bf16.msra.mxu0 %v8626_v7  ;;  %v12047_v60 = vld [vmem:[#allocation25_spill] sm:$0xff] }
 0x155   : > { %v7683_v9 = vpop.f32.mrf.mxu1  ;;  %7970 = vmatmul.mubr.bf16.gmra.mxu1 %v9193_v61  ;;  %v6889_v63 = vcombine.low %v2855_v42, %v2865_v47  ;;  %8031 = vmatprep.subr.bf16.mxu1 %v8627_v37 }
 0x156   : > { %v1283_v8 = vadd.f32 %v7683_v9, %v9692_v17  ;;  %v7732_v32 = vpop.f32.mrf.mxu0  ;;  %7973 = vmatprep.mubr.bf16.mxu1 %v12044_v6 }
 0x157   : > { %v1274_v52 = vpop.f32.mrf.mxu1 }
 0x158   : > { %v9878_v22 = vadd.f32 %v7731_v55, %v1283_v8  ;;  %v1275_v28 = vadd.f32 %v1274_v52, %v12045_v40  ;;  %v9881_v59 = vpop.f32.mrf.mxu0  ;;  %8032 = vmatpush3.bf16.msra.mxu1 %v8627_v37 }
 0x159   : > { %v7684_v17 = vpop.f32.mrf.mxu1 }
 0x15a   : > { %v9883_v29 = vadd.f32 %v1695_v36, %v1275_v28  ;;  %v1286_v14 = vadd.f32 %v7684_v17, %v12046_v41  ;;  %v7735_v34 = vpop.f32.mrf.mxu0  ;;  %8022 = vmatmul.mubr.bf16.gmra.mxu0 %v6915_v15  ;;  %v8628_v36 = vld [vmem:[%s11883_s3 + $0x20] sm:$0xff]   ;;  %v12049_v28 = vld [vmem:[#allocation27_spill] sm:$0xff] }
 0x15b   : > { %v9886_v10 = vpop.f32.mrf.mxu1  ;;  %8079 = vmatprep.subr.bf16.mxu0 %v8628_v36 }
 0x15c   : > { %v9888_v0 = vadd.f32 %v7732_v32, %v1286_v14  ;;  %v1711_v55 = vpop.f32.mrf.mxu0  ;;  %v12048_v32 = vld [vmem:[#allocation26_spill] sm:$0xff]  ;;  %8080 = vmatpush3.bf16.msra.mxu0 %v8628_v36 }
 0x15d   : > { %v7687_v23 = vpop.f32.mrf.mxu1  ;;  %7974 = vmatmul.mubr.bf16.gmra.mxu1 %v6889_v63 }
 0x15e   : > { %v1299_v9 = vadd.f32 %v7687_v23, %v12047_v60  ;;  %v7736_v42 = vpop.f32.mrf.mxu0 }
 0x15f   : > { %v1290_v8 = vpop.f32.mrf.mxu1 }
 0x160   : > { %v9897_v47 = vadd.f32 %v7735_v34, %v1299_v9  ;;  %v1291_v15 = vadd.f32 %v1290_v8, %v12048_v32  ;;  %v9900_v7 = vpop.f32.mrf.mxu0  ;;  %v8629_v34 = vld [vmem:[%s11883_s3 + $0x58] sm:$0xff]  }
 0x161   : > { %v7688_v52 = vpop.f32.mrf.mxu1  ;;  %8033 = vmatprep.subr.bf16.mxu1 %v8629_v34 }
 0x162   : > { %v9902_v40 = vadd.f32 %v1711_v55, %v1291_v15  ;;  %v1302_v17 = vadd.f32 %v7688_v52, %v12049_v28  ;;  %v7803_v63 = vpop.f32.mrf.mxu0  ;;  %v8630_v55 = vld [vmem:[%s11883_s3 + $0x18] sm:$0xff]   ;;  %8034 = vmatpush3.bf16.msra.mxu1 %v8629_v34 }
 0x163   : > { %v9905_v41 = vpop.f32.mrf.mxu1  ;;  %8081 = vmatprep.subr.bf16.mxu0 %v8630_v55 }
 0x164   : > { %v9907_v14 = vadd.f32 %v7736_v42, %v1302_v17  ;;  %v2149_v23 = vpop.f32.mrf.mxu0  ;;  %8082 = vmatpush3.bf16.msra.mxu0 %v8630_v55 }
 0x165   : > { %v7755_v37 = vpop.f32.mrf.mxu1 }
 0x166   : > { %v1992_v60 = vadd.f32 %v7755_v37, %v9743_v39  ;;  %v7804_v9 = vpop.f32.mrf.mxu0 }
 0x167   : > { %v1863_v36 = vpop.f32.mrf.mxu1 }
 0x168   : > { %v9916_v8 = vadd.f32 %v7803_v63, %v1992_v60  ;;  %v1990_v42 = vadd.f32 %v1863_v36, %v9746_v44  ;;  %v9919_v32 = vpop.f32.mrf.mxu0  ;;  %v11925_v63 = vmov 0.0   ;;  %v8632_v36 = vld [vmem:[%s11883_s3 + $0x10] sm:$0xff]  }
 0x169   : > { %v7756_v15 = vpop.f32.mrf.mxu1  ;;  %3475 = vst [vmem:[#allocation2 + $0x30] sm:$0xff] %v11925_v63  ;;  %3476 = vst [vmem:[#allocation2 + $0x38] sm:$0xff] %v11925_v63  ;;  %8083 = vmatprep.subr.bf16.mxu0 %v8632_v36 }
 0x16a   : > { %v9921_v52 = vadd.f32 %v2149_v23, %v1990_v42  ;;  %v1993_v39 = vadd.f32 %v7756_v15, %v9751_v18  ;;  %v7807_v28 = vpop.f32.mrf.mxu0  ;;  %3469 = vst [vmem:[#allocation2] sm:$0xff] %v11925_v63  ;;  %3471 = vst [vmem:[#allocation2 + $0x10] sm:$0x3] %v11925_v63  ;;  %8084 = vmatpush3.bf16.msra.mxu0 %v8632_v36 }
 0x16b   : > { %v9924_v17 = vpop.f32.mrf.mxu1  ;;  %3472 = vst [vmem:[#allocation2 + $0x18] sm:$0xff] %v11925_v63  ;;  %3473 = vst [vmem:[#allocation2 + $0x20] sm:$0xff] %v11925_v63 }
 0x16c   : > { %v9926_v37 = vadd.f32 %v7804_v9, %v1993_v39  ;;  %v2165_v6 = vpop.f32.mrf.mxu0  ;;  %3474 = vst [vmem:[#allocation2 + $0x28] sm:$0x3] %v11925_v63  ;;  %3477 = vst [vmem:[#allocation2 + $0x40] sm:$0x3] %v11925_v63 }
 0x16d   : > { %v7759_v34 = vpop.f32.mrf.mxu1  ;;  %3478 = vst [vmem:[#allocation2 + $0x48] sm:$0xff] %v11925_v63  ;;  %3479 = vst [vmem:[#allocation2 + $0x50] sm:$0xff] %v11925_v63 }
 0x16e   : > { %3480 = vst [vmem:[#allocation2 + $0x58] sm:$0x3] %v11925_v63  ;;  %3481 = vst [vmem:[#allocation2 + $0x60] sm:$0xff] %v11925_v63  ;;  %v1996_v44 = vadd.f32 %v7759_v34, %v9759_v2  ;;  %v7808_v18 = vpop.f32.mrf.mxu0  ;;  %v8631_v2 = vld [vmem:[%s11883_s3 + $0x50] sm:$0xff]  }
 0x16f   : > { %3482 = vst [vmem:[#allocation2 + $0x68] sm:$0xff] %v11925_v63  ;;  %3483 = vst [vmem:[#allocation2 + $0x70] sm:$0x3] %v11925_v63  ;;  %v1879_v23 = vpop.f32.mrf.mxu1  ;;  %8035 = vmatprep.subr.bf16.mxu1 %v8631_v2 }
 0x170   : > { %3484 = vst [vmem:[#allocation2 + $0x78] sm:$0xff] %v11925_v63  ;;  %3485 = vst [vmem:[#allocation2 + $0x80] sm:$0xff] %v11925_v63  ;;  %v9980_v60 = vadd.f32 %v7807_v28, %v1996_v44  ;;  %v1994_v9 = vadd.f32 %v1879_v23, %v9762_v49  ;;  %v9983_v55 = vpop.f32.mrf.mxu0  ;;  %8036 = vmatpush3.bf16.msra.mxu1 %v8631_v2  ;;  %v8636_v2 = vld [vmem:[%s11883_s3] sm:$0xff]  }
 0x171   : > { %3486 = vst [vmem:[#allocation2 + $0x88] sm:$0x3] %v11925_v63  ;;  %3487 = vst [vmem:[#allocation2 + $0x90] sm:$0xff] %v11925_v63  ;;  %v7760_v42 = vpop.f32.mrf.mxu1 }
 0x172   : > { %3488 = vst [vmem:[#allocation2 + $0x98] sm:$0xff] %v11925_v63  ;;  %3489 = vst [vmem:[#allocation2 + $0xa0] sm:$0x3] %v11925_v63  ;;  %v9988_v15 = vadd.f32 %v2165_v6, %v1994_v9  ;;  %v1997_v39 = vadd.f32 %v7760_v42, %v9767_v38  ;;  %v8634_v6 = vld [vmem:[%s11883_s3 + $0x8] sm:$0xff]  }
 0x173   : > { %3490 = vst [vmem:[#allocation2 + $0xa8] sm:$0xff] %v11925_v63  ;;  %3491 = vst [vmem:[#allocation2 + $0xb0] sm:$0xff] %v11925_v63  ;;  %v9994_v28 = vpop.f32.mrf.mxu1  ;;  %8085 = vmatprep.subr.bf16.mxu0 %v8634_v6  ;;  %v8633_v42 = vld [vmem:[%s11883_s3 + $0x48] sm:$0xff]  }
 0x174   : > { %3492 = vst [vmem:[#allocation2 + $0xb8] sm:$0x3] %v11925_v63  ;;  %3493 = vst [vmem:[#allocation2 + $0xc0] sm:$0xff] %v11925_v63  ;;  %v9996_v49 = vadd.f32 %v7808_v18, %v1997_v39  ;;  %8086 = vmatpush3.bf16.msra.mxu0 %v8634_v6  ;;  %8037 = vmatprep.subr.bf16.mxu1 %v8633_v42 }
 0x175   : > { %3494 = vst [vmem:[#allocation2 + $0xc8] sm:$0xff] %v11925_v63  ;;  %3495 = vst [vmem:[#allocation2 + $0xd0] sm:$0x3] %v11925_v63  ;;  %v7763_v44 = vpop.f32.mrf.mxu1  ;;  %8038 = vmatpush3.bf16.msra.mxu1 %v8633_v42  ;;  %8087 = vmatprep.subr.bf16.mxu0 %v8636_v2  ;;  %v8720_v42 = vmov 0.0|0.0  }
 0x176   : > { %3496 = vst [vmem:[#allocation2 + $0xd8] sm:$0xff] %v11925_v63  ;;  %3497 = vst [vmem:[#allocation2 + $0xe0] sm:$0xff] %v11925_v63  ;;  %v2000_v38 = vadd.f32 %v7763_v44, %v9775_v46  ;;  %8089 = vmatprep.mubr.bf16.mxu0 %v8720_v42 }
 0x177   : > { %3498 = vst [vmem:[#allocation2 + $0xe8] sm:$0x3] %v11925_v63  ;;  %3499 = vst [vmem:[#allocation2 + $0xf0] sm:$0xff] %v11925_v63  ;;  %v1895_v9 = vpop.f32.mrf.mxu1 }
 0x178   : > { %3500 = vst [vmem:[#allocation2 + $0xf8] sm:$0xff] %v11925_v63  ;;  %3501 = vst [vmem:[#allocation2 + $0x100] sm:$0x3] %v11925_v63  ;;  %v1998_v36 = vadd.f32 %v1895_v9, %v9778_v5  ;;  %v8635_v5 = vld [vmem:[%s11883_s3 + $0x40] sm:$0xff]   ;;  %8088 = vmatpush3.bf16.msra.mxu0 %v8636_v2  ;;  %v10022_v9 = vld [vmem:[#allocation2 + $0x10] sm:$0x3] }
 0x179   : > { %3502 = vst [vmem:[#allocation2 + $0x108] sm:$0xff] %v11925_v63  ;;  %3503 = vst [vmem:[#allocation2 + $0x110] sm:$0xff] %v11925_v63  ;;  %v7764_v61 = vpop.f32.mrf.mxu1  ;;  %8039 = vmatprep.subr.bf16.mxu1 %v8635_v5 }
 0x17a   : > { %3504 = vst [vmem:[#allocation2 + $0x118] sm:$0x3] %v11925_v63  ;;  %3505 = vst [vmem:[#allocation2 + $0x120] sm:$0xff] %v11925_v63  ;;  %v2001_v44 = vadd.f32 %v7764_v61, %v9783_v25  ;;  %v3694_v61 = vrot.slane %v10022_v9, 1  ;;  %8040 = vmatpush3.bf16.msra.mxu1 %v8635_v5 }
 0x17b   : > { %3506 = vst [vmem:[#allocation2 + $0x128] sm:$0xff] %v11925_v63  ;;  %3507 = vst [vmem:[#allocation2 + $0x130] sm:$0x3] %v11925_v63  ;;  %v10016_v6 = vpop.f32.mrf.mxu1 }
 0x17c   : > { %3508 = vst [vmem:[#allocation2 + $0x138] sm:$0xff] %v11925_v63  ;;  %3509 = vst [vmem:[#allocation2 + $0x140] sm:$0xff] %v11925_v63 }
 0x17d   : > { %3510 = vst [vmem:[#allocation2 + $0x148] sm:$0x3] %v11925_v63  ;;  %3511 = vst [vmem:[#allocation2 + $0x150] sm:$0xff] %v11925_v63  ;;  %v7767_v25 = vpop.f32.mrf.mxu1 }
 0x17e   : > { %3512 = vst [vmem:[#allocation2 + $0x158] sm:$0xff] %v11925_v63  ;;  %3513 = vst [vmem:[#allocation2 + $0x160] sm:$0x3] %v11925_v63 }
 0x17f   : > { %3514 = vst [vmem:[#allocation2 + $0x168] sm:$0xff] %v11925_v63  ;;  %3515 = vst [vmem:[#allocation2 + $0x170] sm:$0xff] %v11925_v63  ;;  %v1911_v16 = vpop.f32.mrf.mxu1 }
 0x180   : > { %3516 = vst [vmem:[#allocation2 + $0x178] sm:$0x3] %v11925_v63  ;;  %3517 = vst [vmem:[#allocation2 + $0x180] sm:$0xff] %v11925_v63 }
 0x181   : > { %3518 = vst [vmem:[#allocation2 + $0x188] sm:$0xff] %v11925_v63  ;;  %3519 = vst [vmem:[#allocation2 + $0x190] sm:$0x3] %v11925_v63  ;;  %v7768_v48 = vpop.f32.mrf.mxu1 }
 0x182   : > { %3522 = vst [vmem:[#allocation2 + $0x1a8] sm:$0x3] %v11925_v63  ;;  %v7811_v63 = vpop.f32.mrf.mxu0  ;;  %v2005_v42 = vadd.f32 %v7768_v48, %v9799_v21 }
 0x183   : > { %v10005_v18 = vadd.f32 %v7811_v63, %v2000_v38  ;;  %v12050_v63 = vmov 0.0  }
 0x184   : > { %v2181_v34 = vpop.f32.mrf.mxu0  ;;  %v3691_v38 = vrot.slane %v12050_v63, 1 }
 0x185   : > { %v10013_v46 = vadd.f32 %v2181_v34, %v1998_v36  ;;  %v2004_v36 = vadd.f32 %v7767_v25, %v9791_v53  ;;  %v10037_v53 = vpop.f32.mrf.mxu1 }
 0x186   : > { %v7812_v23 = vpop.f32.mrf.mxu0  ;;  %v3695_v2 = vsel %vm3690_vm6, %v3691_v38, %v3694_v61 }
 0x187   : > { %v10024_v1 = vadd.f32 %v7812_v23, %v2001_v44  ;;  %v3803_v62 = vpack.c.bf16 %v3695_v2, %v3691_v38  ;;  %v2002_v23 = vadd.f32 %v1911_v16, %v9794_v33  ;;  %v7771_v25 = vpop.f32.mrf.mxu1 }
 0x188   : > { %v10008_v39 = vpop.f32.mrf.mxu0 }
 0x189   : > { %12051 = vst [vmem:[#allocation20_spill] sm:$0xff] %v10024_v1  ;;  %8041 = vmatprep.mubr.bf16.mxu1 %v3803_v62 }
 0x18a   : > { %v7815_v58 = vpop.f32.mrf.mxu0 }
 0x18b   : > { %v10029_v31 = vadd.f32 %v7815_v58, %v2004_v36  ;;  %v2008_v58 = vadd.f32 %v7771_v25, %v9817_v24  ;;  %v1927_v36 = vpop.f32.mrf.mxu1 }
 0x18c   : > { %v2197_v34 = vpop.f32.mrf.mxu0  ;;  %v2006_v33 = vadd.f32 %v1927_v36, %v9824_v3  ;;  %v10063_v3 = vld [vmem:[%s11883_s3 + $0xf8] sm:$0xff]  }
 0x18d   : > { %12052 = vst [vmem:[#allocation18_spill] sm:$0xff] %v10029_v31  ;;  %v10034_v20 = vadd.f32 %v2197_v34, %v2002_v23  ;;  %v7772_v34 = vpop.f32.mrf.mxu1  ;;  %12059 = vst [vmem:[#allocation31_spill] sm:$0xff] %v10063_v3  ;;  %8169 = vmatprep.subr.bf16.mxu0 %v10063_v3 }
 0x18e   : > { %v7816_v51 = vpop.f32.mrf.mxu0  ;;  %v2009_v48 = vadd.f32 %v7772_v34, %v9833_v30 }
 0x18f   : > { %12053 = vst [vmem:[#allocation23_spill] sm:$0xff] %v10034_v20  ;;  %v10039_v5 = vadd.f32 %v7816_v51, %v2005_v42  ;;  %v10053_v51 = vld [vmem:[%s11883_s3 + $0xb8] sm:$0xff]   ;;  %v10055_v24 = vpop.f32.mrf.mxu1 }
 0x190   : > { %v10032_v44 = vpop.f32.mrf.mxu0  ;;  %12057 = vst [vmem:[#allocation29_spill] sm:$0xff] %v10053_v51  ;;  %8121 = vmatprep.subr.bf16.mxu1 %v10053_v51 }
 0x191   : > { %12054 = vst [vmem:[#allocation25_spill] sm:$0xff] %v10039_v5  ;;  %v7775_v42 = vpop.f32.mrf.mxu1 }
 0x192   : > { %v7819_v4 = vpop.f32.mrf.mxu0  ;;  %v2012_v30 = vadd.f32 %v7775_v42, %v9846_v43 }
 0x193   : > { %v10042_v16 = vadd.f32 %v7819_v4, %v2008_v58  ;;  %v1943_v25 = vpop.f32.mrf.mxu1 }
 0x194   : > { %v2213_v61 = vpop.f32.mrf.mxu0 }
 0x195   : > { %12055 = vst [vmem:[#allocation26_spill] sm:$0xff] %v10042_v16  ;;  %v10047_v2 = vadd.f32 %v2213_v61, %v2006_v33  ;;  %v7776_v33 = vpop.f32.mrf.mxu1 }
 0x196   : > { %v7820_v38 = vpop.f32.mrf.mxu0 }
 0x197   : > { %12056 = vst [vmem:[#allocation27_spill] sm:$0xff] %v10047_v2  ;;  %v10057_v23 = vadd.f32 %v7820_v38, %v2009_v48  ;;  %v2010_v38 = vadd.f32 %v1943_v25, %v9851_v13  ;;  %v2013_v48 = vadd.f32 %v7776_v33, %v9862_v26  ;;  %v10075_v35 = vpop.f32.mrf.mxu1 }
 0x198   : > { %v10045_v62 = vpop.f32.mrf.mxu0 }
 0x199   : > { %12058 = vst [vmem:[#allocation30_spill] sm:$0xff] %v10057_v23  ;;  %v7779_v42 = vpop.f32.mrf.mxu1 }
 0x19a   : > { %v7823_v21 = vpop.f32.mrf.mxu0  ;;  %v2016_v3 = vadd.f32 %v7779_v42, %v9878_v22 }
 0x19b   : > { %v10067_v58 = vadd.f32 %v7823_v21, %v2012_v30  ;;  %v1959_v30 = vpop.f32.mrf.mxu1 }
 0x19c   : > { %v2229_v4 = vpop.f32.mrf.mxu0  ;;  %v2014_v13 = vadd.f32 %v1959_v30, %v9883_v29 }
 0x19d   : > { %12060 = vst [vmem:[#allocation32_spill] sm:$0xff] %v10067_v58  ;;  %v10072_v34 = vadd.f32 %v2229_v4, %v2010_v38  ;;  %v7780_v4 = vpop.f32.mrf.mxu1 }
 0x19e   : > { %v7824_v61 = vpop.f32.mrf.mxu0  ;;  %v2017_v26 = vadd.f32 %v7780_v4, %v9888_v0 }
 0x19f   : > { %12061 = vst [vmem:[#allocation33_spill] sm:$0xff] %v10072_v34  ;;  %v10077_v51 = vadd.f32 %v7824_v61, %v2013_v48  ;;  %v10088_v61 = vpop.f32.mrf.mxu1 }
 0x1a0   : > { %v10070_v36 = vpop.f32.mrf.mxu0 }
 0x1a1   : > { %12062 = vst [vmem:[#allocation34_spill] sm:$0xff] %v10077_v51  ;;  %v7783_v22 = vpop.f32.mrf.mxu1 }
 0x1a2   : > { %v7827_v27 = vpop.f32.mrf.mxu0  ;;  %v2020_v42 = vadd.f32 %v7783_v22, %v9897_v47 }
 0x1a3   : > { %v10080_v58 = vadd.f32 %v7827_v27, %v2016_v3  ;;  %v1975_v3 = vpop.f32.mrf.mxu1 }
 0x1a4   : > { %v2245_v43 = vpop.f32.mrf.mxu0  ;;  %v2018_v29 = vadd.f32 %v1975_v3, %v9902_v40 }
 0x1a5   : > { %12063 = vst [vmem:[#allocation35_spill] sm:$0xff] %v10080_v58  ;;  %v10085_v38 = vadd.f32 %v2245_v43, %v2014_v13  ;;  %v7784_v43 = vpop.f32.mrf.mxu1 }
 0x1a6   : > { %v7828_v21 = vpop.f32.mrf.mxu0  ;;  %v2021_v0 = vadd.f32 %v7784_v43, %v9907_v14 }
 0x1a7   : > { %12064 = vst [vmem:[#allocation36_spill] sm:$0xff] %v10085_v38  ;;  %v10090_v48 = vadd.f32 %v7828_v21, %v2017_v26  ;;  %v10103_v21 = vpop.f32.mrf.mxu1 }
 0x1a8   : > { %v10083_v25 = vpop.f32.mrf.mxu0 }
 0x1a9   : > { %12065 = vst [vmem:[#allocation37_spill] sm:$0xff] %v10090_v48  ;;  %v10109_v22 = vpop.f32.mrf.mxu1 }
 0x1aa   : > { %v7831_v33 = vpop.f32.mrf.mxu0 }
 0x1ab   : > { %v10093_v58 = vadd.f32 %v7831_v33, %v2020_v42  ;;  %v10113_v40 = vpop.f32.mrf.mxu1 }
 0x1ac   : > { %v2261_v51 = vpop.f32.mrf.mxu0 }
 0x1ad   : > { %12066 = vst [vmem:[#allocation38_spill] sm:$0xff] %v10093_v58  ;;  %v10098_v13 = vadd.f32 %v2261_v51, %v2018_v29  ;;  %v10117_v51 = vpop.f32.mrf.mxu1 }
 0x1ae   : > { %v7832_v27 = vpop.f32.mrf.mxu0 }
 0x1af   : > { %12067 = vst [vmem:[#allocation39_spill] sm:$0xff] %v10098_v13  ;;  %v10105_v26 = vadd.f32 %v7832_v27, %v2021_v0  ;;  %v10121_v14 = vpop.f32.mrf.mxu1 }
 0x1b0   : > { %v10096_v30 = vpop.f32.mrf.mxu0 }
 0x1b1   : > { %12068 = vst [vmem:[#allocation40_spill] sm:$0xff] %v10105_v26  ;;  %v10125_v27 = vpop.f32.mrf.mxu1 }
 0x1b2   : > { %v10101_v4 = vpop.f32.mrf.mxu0 }
 0x1b3   : > { %v10129_v0 = vpop.f32.mrf.mxu1 }
 0x1b4   : > { %v10107_v47 = vpop.f32.mrf.mxu0 }
 0x1b5   : > { %v10133_v13 = vpop.f32.mrf.mxu1 }
 0x1b6   : > { %v10111_v33 = vpop.f32.mrf.mxu0 }
 0x1b7   : > { %v10137_v48 = vpop.f32.mrf.mxu1 }
 0x1b8   : > { %v10115_v42 = vpop.f32.mrf.mxu0 }
 0x1b9   : > { %12069 = vst [vmem:[#allocation41_spill] sm:$0xff] %v10115_v42  ;;  %v10141_v34 = vpop.f32.mrf.mxu1 }
 0x1ba   : > { %v10119_v3 = vpop.f32.mrf.mxu0 }
 0x1bb   : > { %12070 = vst [vmem:[#allocation42_spill] sm:$0xff] %v10119_v3  ;;  %v10145_v2 = vpop.f32.mrf.mxu1 }
 0x1bc   : > { %v10123_v29 = vpop.f32.mrf.mxu0 }
 0x1bd   : > { %12071 = vst [vmem:[#allocation43_spill] sm:$0xff] %v10123_v29  ;;  %v10149_v5 = vpop.f32.mrf.mxu1 }
 0x1be   : > { %v10127_v43 = vpop.f32.mrf.mxu0  ;;  %12078 = vst [vmem:[#allocation50_spill] sm:$0xff] %v10149_v5 }
 0x1bf   : > { %12072 = vst [vmem:[#allocation44_spill] sm:$0xff] %v10127_v43 }
 0x1c0   : > { %v10131_v26 = vpop.f32.mrf.mxu0 }
 0x1c1   : > { %12073 = vst [vmem:[#allocation45_spill] sm:$0xff] %v10131_v26  ;;  %v10153_v26 = vpop.f32.mrf.mxu1 }
 0x1c2   : > { %v10135_v58 = vpop.f32.mrf.mxu0  ;;  %12080 = vst [vmem:[#allocation52_spill] sm:$0xff] %v10153_v26 }
 0x1c3   : > { %12074 = vst [vmem:[#allocation46_spill] sm:$0xff] %v10135_v58  ;;  %v10157_v58 = vpop.f32.mrf.mxu1 }
 0x1c4   : > { %v10139_v38 = vpop.f32.mrf.mxu0  ;;  %12082 = vst [vmem:[#allocation54_spill] sm:$0xff] %v10157_v58 }
 0x1c5   : > { %12075 = vst [vmem:[#allocation47_spill] sm:$0xff] %v10139_v38  ;;  %v10161_v38 = vpop.f32.mrf.mxu1 }
 0x1c6   : > { %v10143_v23 = vpop.f32.mrf.mxu0  ;;  %12084 = vst [vmem:[#allocation56_spill] sm:$0xff] %v10161_v38 }
 0x1c7   : > { %12076 = vst [vmem:[#allocation48_spill] sm:$0xff] %v10143_v23  ;;  %v10165_v23 = vpop.f32.mrf.mxu1 }
 0x1c8   : > { %v10147_v16 = vpop.f32.mrf.mxu0  ;;  %12086 = vst [vmem:[#allocation58_spill] sm:$0xff] %v10165_v23 }
 0x1c9   : > { %12077 = vst [vmem:[#allocation49_spill] sm:$0xff] %v10147_v16  ;;  %v10169_v16 = vpop.f32.mrf.mxu1 }
 0x1ca   : > { %v10151_v43 = vpop.f32.mrf.mxu0  ;;  %12088 = vst [vmem:[#allocation60_spill] sm:$0xff] %v10169_v16 }
 0x1cb   : > { %12079 = vst [vmem:[#allocation51_spill] sm:$0xff] %v10151_v43  ;;  %v10173_v43 = vpop.f32.mrf.mxu1 }
 0x1cc   : > { %v10155_v20 = vpop.f32.mrf.mxu0  ;;  %12090 = vst [vmem:[#allocation62_spill] sm:$0xff] %v10173_v43 }
 0x1cd   : > { %12081 = vst [vmem:[#allocation53_spill] sm:$0xff] %v10155_v20  ;;  %v10177_v20 = vpop.f32.mrf.mxu1 }
 0x1ce   : > { %v10159_v29 = vpop.f32.mrf.mxu0  ;;  %12092 = vst [vmem:[#allocation64_spill] sm:$0xff] %v10177_v20 }
 0x1cf   : > { %12083 = vst [vmem:[#allocation55_spill] sm:$0xff] %v10159_v29  ;;  %v10181_v29 = vpop.f32.mrf.mxu1 }
 0x1d0   : > { %v10163_v3 = vpop.f32.mrf.mxu0  ;;  %12094 = vst [vmem:[#allocation66_spill] sm:$0xff] %v10181_v29 }
 0x1d1   : > { %12085 = vst [vmem:[#allocation57_spill] sm:$0xff] %v10163_v3  ;;  %v10185_v3 = vpop.f32.mrf.mxu1 }
 0x1d2   : > { %v10167_v42 = vpop.f32.mrf.mxu0  ;;  %12096 = vst [vmem:[#allocation68_spill] sm:$0xff] %v10185_v3 }
 0x1d3   : > { %12087 = vst [vmem:[#allocation59_spill] sm:$0xff] %v10167_v42  ;;  %v10189_v42 = vpop.f32.mrf.mxu1 }
 0x1d4   : > { %v10171_v31 = vpop.f32.mrf.mxu0  ;;  %12098 = vst [vmem:[#allocation70_spill] sm:$0xff] %v10189_v42 }
 0x1d5   : > { %12089 = vst [vmem:[#allocation61_spill] sm:$0xff] %v10171_v31  ;;  %v10193_v31 = vpop.f32.mrf.mxu1 }
 0x1d6   : > { %v10175_v26 = vpop.f32.mrf.mxu0  ;;  %12100 = vst [vmem:[#allocation72_spill] sm:$0xff] %v10193_v31 }
 0x1d7   : > { %12091 = vst [vmem:[#allocation63_spill] sm:$0xff] %v10175_v26  ;;  %v10197_v26 = vpop.f32.mrf.mxu1 }
 0x1d8   : > { %v10179_v58 = vpop.f32.mrf.mxu0  ;;  %12102 = vst [vmem:[#allocation74_spill] sm:$0xff] %v10197_v26  ;;  %v12109_v26 = vld [vmem:[#allocation28_spill] sm:$0xff] }
 0x1d9   : > { %12093 = vst [vmem:[#allocation65_spill] sm:$0xff] %v10179_v58  ;;  %v10201_v58 = vpop.f32.mrf.mxu1 }
 0x1da   : > { %v10183_v38 = vpop.f32.mrf.mxu0  ;;  %12104 = vst [vmem:[#allocation76_spill] sm:$0xff] %v10201_v58 }
 0x1db   : > { %12095 = vst [vmem:[#allocation67_spill] sm:$0xff] %v10183_v38  ;;  %v12106_v38 = vld [vmem:[#allocation12_spill] sm:$0xff]  ;;  %v10209_v5 = vpop.f32.mrf.mxu1 }
 0x1dc   : > { %v10187_v23 = vpop.f32.mrf.mxu0  ;;  %v1246_v3 = vadd.f32 %v9829_v11, %v12106_v38 }
 0x1dd   : > { %12097 = vst [vmem:[#allocation69_spill] sm:$0xff] %v10187_v23  ;;  %v12107_v23 = vld [vmem:[#allocation15_spill] sm:$0xff]  ;;  %v10217_v1 = vpop.f32.mrf.mxu1 }
 0x1de   : > { %v10191_v16 = vpop.f32.mrf.mxu0  ;;  %v1262_v42 = vadd.f32 %v9855_v19, %v12107_v23  ;;  %v1991_v19 = vadd.f32 %v9924_v17, %v9755_v57  ;;  %v1995_v23 = vadd.f32 %v9994_v28, %v9771_v54 }
 0x1df   : > { %12099 = vst [vmem:[#allocation71_spill] sm:$0xff] %v10191_v16  ;;  %v12108_v16 = vld [vmem:[#allocation24_spill] sm:$0xff] }
 0x1e0   : > { %v10195_v43 = vpop.f32.mrf.mxu0  ;;  %v1278_v31 = vadd.f32 %v9886_v10, %v12108_v16  ;;  %v1747_v11 = vadd.f32 %v9849_v50, %v1262_v42  ;;  %v10227_v10 = vpop.f32.mrf.mxu1  ;;  %v2556_v42 = vadd.f32 %v10141_v34, %v10005_v18  ;;  %v12119_v34 = vld [vmem:[#allocation23_spill] sm:$0xff] }
 0x1e1   : > { %12101 = vst [vmem:[#allocation73_spill] sm:$0xff] %v10195_v43 }
 0x1e2   : > { %v10199_v20 = vpop.f32.mrf.mxu0  ;;  %v1751_v16 = vadd.f32 %v9881_v59, %v1278_v31  ;;  %v2011_v57 = vadd.f32 %v10075_v35, %v1747_v11  ;;  %v10239_v17 = vpop.f32.mrf.mxu1  ;;  %v2277_v31 = vadd.f32 %v9919_v32, %v1991_v19  ;;  %v2546_v35 = vadd.f32 %v10113_v40, %v9921_v52  ;;  %v12118_v19 = vld [vmem:[#allocation43_spill] sm:$0xff] }
 0x1e3   : > { %12103 = vst [vmem:[#allocation75_spill] sm:$0xff] %v10199_v20  ;;  %v1294_v20 = vadd.f32 %v9905_v41, %v12109_v26  ;;  %v1999_v41 = vadd.f32 %v10016_v6, %v9787_v12  ;;  %v2281_v12 = vadd.f32 %v9983_v55, %v1995_v23  ;;  %v2549_v6 = vadd.f32 %v10117_v51, %v9926_v37  ;;  %v12111_v51 = vld [vmem:[#allocation20_spill] sm:$0xff] }
 0x1e4   : > { %v10203_v29 = vpop.f32.mrf.mxu0  ;;  %v2015_v54 = vadd.f32 %v10088_v61, %v1751_v16  ;;  %v2547_v37 = vadd.f32 %v10121_v14, %v2277_v31  ;;  %v2552_v61 = vadd.f32 %v10125_v27, %v9980_v60  ;;  %v2810_v40 = vadd.f32 %v10107_v47, %v2546_v35  ;;  %v12120_v23 = vld [vmem:[#allocation56_spill] sm:$0xff]  ;;  %v12124_v31 = vld [vmem:[#allocation45_spill] sm:$0xff] }
 0x1e5   : > { %12105 = vst [vmem:[#allocation77_spill] sm:$0xff] %v10203_v29  ;;  %v1743_v29 = vadd.f32 %v9820_v45, %v1246_v3  ;;  %v1755_v26 = vadd.f32 %v9900_v7, %v1294_v20  ;;  %v2003_v45 = vadd.f32 %v10037_v53, %v9810_v56  ;;  %v2548_v20 = vadd.f32 %v10109_v22, %v9916_v8  ;;  %v10249_v56 = vpop.f32.mrf.mxu1  ;;  %v12112_v3 = vld [vmem:[#allocation50_spill] sm:$0xff]  ;;  %v12121_v16 = vld [vmem:[#allocation44_spill] sm:$0xff] }
 0x1e6   : > { %v10213_v43 = vpop.f32.mrf.mxu0  ;;  %v2285_v7 = vadd.f32 %v10008_v39, %v1999_v41  ;;  %v10266_v39 = vrot.slane %v12050_v63, 2  ;;  %v10269_v52 = vadd.f32 %v10083_v25, %v2015_v54  ;;  %v2553_v63 = vadd.f32 %v10133_v13, %v9996_v49  ;;  %v12113_v13 = vld [vmem:[#allocation52_spill] sm:$0xff] }
 0x1e7   : > { %v2007_v50 = vadd.f32 %v10055_v24, %v1743_v29  ;;  %v2019_v59 = vadd.f32 %v10103_v21, %v1755_v26  ;;  %v2289_v32 = vadd.f32 %v10032_v44, %v2003_v45  ;;  %v10261_v24 = vadd.f32 %v10070_v36, %v2011_v57  ;;  %v10263_v8 = vpop.f32.mrf.mxu1  ;;  %v12114_v29 = vld [vmem:[#allocation18_spill] sm:$0xff]  ;;  %v12122_v26 = vld [vmem:[#allocation25_spill] sm:$0xff] }
 0x1e8   : > { %v10219_v58 = vpop.f32.mrf.mxu0  ;;  %12110 = vst [vmem:[#allocation12_spill] sm:$0xff] %v10266_v39  ;;  %v2550_v44 = vadd.f32 %v10129_v0, %v9988_v15  ;;  %v2812_v21 = vadd.f32 %v10101_v4, %v2548_v20  ;;  %v4258_v22 = vrot.slane %v10022_v9, 2  ;;  %v2813_v60 = vadd.f32 %v10111_v33, %v2549_v6  ;;  %v12115_v9 = vld [vmem:[#allocation54_spill] sm:$0xff]  ;;  %v12116_v33 = vld [vmem:[#allocation41_spill] sm:$0xff] }
 0x1e9   : > { %v2293_v55 = vadd.f32 %v10045_v62, %v2007_v50  ;;  %v10279_v36 = vadd.f32 %v10096_v30, %v2019_v59  ;;  %v10284_v25 = vpop.f32.mrf.mxu1  ;;  %v2551_v15 = vadd.f32 %v10137_v48, %v2281_v12  ;;  %v2554_v4 = vadd.f32 %v10145_v2, %v10013_v46  ;;  %v12117_v48 = vld [vmem:[#allocation42_spill] sm:$0xff] }
 0x1ea   : > { %v10232_v38 = vpop.f32.mrf.mxu0  ;;  %v2557_v49 = vadd.f32 %v12112_v3, %v12111_v51  ;;  %v2555_v14 = vadd.f32 %v12113_v13, %v2285_v7  ;;  %v2560_v27 = vadd.f32 %v12115_v9, %v12114_v29  ;;  %v2811_v0 = vadd.f32 %v12116_v33, %v2547_v37  ;;  %v12123_v45 = vld [vmem:[#allocation58_spill] sm:$0xff]  ;;  %v12126_v7 = vld [vmem:[#allocation60_spill] sm:$0xff]  ;;  %v12129_v3 = vld [vmem:[#allocation49_spill] sm:$0xff] }
 0x1eb   : > { %v10299_v47 = vpop.f32.mrf.mxu1  ;;  %v2816_v11 = vadd.f32 %v12117_v48, %v2552_v61  ;;  %v10304_v18 = vadd.f32 %v12118_v19, %v2550_v44  ;;  %v2558_v46 = vadd.f32 %v12120_v23, %v12119_v34  ;;  %v10309_v41 = vadd.f32 %v12121_v16, %v2553_v63  ;;  %v12125_v59 = vld [vmem:[#allocation46_spill] sm:$0xff]  ;;  %v12127_v61 = vld [vmem:[#allocation47_spill] sm:$0xff]  ;;  %v12128_v63 = vld [vmem:[#allocation48_spill] sm:$0xff] }
 0x1ec   : > { %v10242_v28 = vpop.f32.mrf.mxu0  ;;  %v2561_v50 = vadd.f32 %v12123_v45, %v12122_v26  ;;  %v10315_v54 = vsel %vm4254_vm7, %v10266_v39, %v4258_v22  ;;  %v10318_v12 = vadd.f32 %v12124_v31, %v2551_v15  ;;  %v10321_v20 = vadd.f32 %v12125_v59, %v2556_v42  ;;  %v12130_v22 = vld [vmem:[#allocation51_spill] sm:$0xff]  ;;  %v10339_v15 = vld [vmem:[%s11882_s2] ss:$0 sm:$0xff]  ;;  %v12134_v19 = vld [vmem:[#allocation62_spill] sm:$0xff] }
 0x1ed   : > { %v7947_v57 = vpop.f32.mrf.mxu1  ;;  %v2559_v35 = vadd.f32 %v12126_v7, %v2289_v32  ;;  %v10325_v44 = vadd.f32 %v12127_v61, %v2554_v4  ;;  %v10328_v51 = vadd.f32 %v12128_v63, %v2557_v49  ;;  %v10331_v13 = vadd.f32 %v12129_v3, %v2555_v14  ;;  %v12132_v14 = vld [vmem:[#allocation55_spill] sm:$0xff]  ;;  %v12136_v16 = vld [vmem:[#allocation64_spill] sm:$0xff]  ;;  %v12137_v45 = vld [vmem:[#allocation30_spill] sm:$0xff] }
 0x1ee   : > { %v10256_v53 = vpop.f32.mrf.mxu0  ;;  %v3098_v6 = vadd.f32 %v7947_v57, %v2812_v21  ;;  %v10334_v29 = vadd.f32 %v12130_v22, %v2560_v27  ;;  %v12131_v21 = vld [vmem:[#allocation53_spill] sm:$0xff]  ;;  %v10347_v48 = vadd.f32 %v12132_v14, %v2561_v50  ;;  %v12133_v27 = vld [vmem:[#allocation26_spill] sm:$0xff]  ;;  %v12135_v23 = vld [vmem:[#allocation27_spill] sm:$0xff] }
 0x1ef   : > { %v2969_v32 = vpop.f32.mrf.mxu1  ;;  %v10342_v42 = vadd.f32 %v12131_v21, %v2558_v46  ;;  %v2564_v34 = vadd.f32 %v12134_v19, %v12133_v27  ;;  %v2562_v26 = vadd.f32 %v12136_v16, %v12135_v23  ;;  %v12138_v57 = vld [vmem:[#allocation66_spill] sm:$0xff]  ;;  %v12139_v59 = vld [vmem:[#allocation57_spill] sm:$0xff]  ;;  %v12140_v50 = vld [vmem:[#allocation68_spill] sm:$0xff] }
 0x1f0   : > { %v10276_v62 = vpop.f32.mrf.mxu0  ;;  %v3096_v9 = vadd.f32 %v2969_v32, %v2810_v40  ;;  %v2565_v31 = vadd.f32 %v12138_v57, %v12137_v45  ;;  %v2563_v63 = vadd.f32 %v12140_v50, %v2293_v55  ;;  %v12141_v3 = vld [vmem:[#allocation32_spill] sm:$0xff]  ;;  %v12142_v22 = vld [vmem:[#allocation70_spill] sm:$0xff]  ;;  %v12143_v21 = vld [vmem:[#allocation33_spill] sm:$0xff] }
 0x1f1   : > { %v7948_v46 = vpop.f32.mrf.mxu1  ;;  %v2568_v32 = vadd.f32 %v12142_v22, %v12141_v3  ;;  %v12144_v14 = vld [vmem:[#allocation72_spill] sm:$0xff]  ;;  %v12145_v19 = vld [vmem:[#allocation34_spill] sm:$0xff]  ;;  %v12148_v55 = vld [vmem:[#allocation61_spill] sm:$0xff] }
 0x1f2   : > { %v7995_v30 = vpop.f32.mrf.mxu0  ;;  %v2566_v27 = vadd.f32 %v12144_v14, %v12143_v21  ;;  %v12146_v23 = vld [vmem:[#allocation74_spill] sm:$0xff]  ;;  %v12149_v50 = vld [vmem:[#allocation63_spill] sm:$0xff]  ;;  %v12150_v22 = vld [vmem:[#allocation76_spill] sm:$0xff] }
 0x1f3   : > { %v3368_v4 = vadd.f32 %v7995_v30, %v3098_v6  ;;  %v10356_v30 = vadd.f32 %v12139_v59, %v2559_v35  ;;  %v3099_v6 = vadd.f32 %v7948_v46, %v2813_v60  ;;  %v2569_v16 = vadd.f32 %v12146_v23, %v12145_v19  ;;  %v2972_v45 = vpop.f32.mrf.mxu1  ;;  %v12147_v60 = vld [vmem:[#allocation59_spill] sm:$0xff]  ;;  %v12151_v19 = vld [vmem:[#allocation65_spill] sm:$0xff] }
 0x1f4   : > { %v3239_v2 = vpop.f32.mrf.mxu0  ;;  %v10371_v46 = vadd.f32 %v12148_v55, %v2562_v26  ;;  %v10374_v3 = vadd.f32 %v12149_v50, %v2565_v31  ;;  %v2567_v21 = vadd.f32 %v12150_v22, %v10261_v24  ;;  %v12152_v23 = vld [vmem:[#allocation67_spill] sm:$0xff] }
 0x1f5   : > { %v3407_v40 = vadd.f32 %v10339_v15, %v3368_v4  ;;  %v3366_v7 = vadd.f32 %v3239_v2, %v3096_v9  ;;  %v3097_v4 = vadd.f32 %v2972_v45, %v2811_v0  ;;  %v10368_v9 = vadd.f32 %v12147_v60, %v2564_v34  ;;  %v7951_v14 = vpop.f32.mrf.mxu1  ;;  %v12153_v45 = vld [vmem:[#allocation69_spill] sm:$0xff]  ;;  %v12154_v60 = vld [vmem:[#allocation71_spill] sm:$0xff] }
 0x1f6   : > { %v7996_v37 = vpop.f32.mrf.mxu0  ;;  %v3102_v0 = vadd.f32 %v7951_v14, %v2816_v11  ;;  %v10380_v34 = vadd.f32 %v12151_v19, %v2563_v63  ;;  %v10383_v26 = vadd.f32 %v12152_v23, %v2568_v32  ;;  %v10386_v31 = vadd.f32 %v12153_v45, %v2566_v27  ;;  %v12155_v63 = vld [vmem:[#allocation73_spill] sm:$0xff]  ;;  %v12156_v32 = vld [vmem:[#allocation35_spill] sm:$0xff]  ;;  %v12157_v27 = vld [vmem:[#allocation36_spill] sm:$0xff] }
 0x1f7   : > { %v3439_v57 = vmax.f32 %v3407_v40, 0.0  ;;  %v3405_v35 = vadd.f32 %v10339_v15, %v3366_v7  ;;  %v3369_v59 = vadd.f32 %v7996_v37, %v3099_v6  ;;  %v10389_v55 = vadd.f32 %v12154_v60, %v2569_v16  ;;  %v2985_v24 = vpop.f32.mrf.mxu1  ;;  %v12158_v16 = vld [vmem:[#allocation37_spill] sm:$0xff]  ;;  %v12159_v19 = vld [vmem:[#allocation38_spill] sm:$0xff]  ;;  %v12160_v23 = vld [vmem:[#allocation39_spill] sm:$0xff] }
 0x1f8   : > { %v3242_v33 = vpop.f32.mrf.mxu0  ;;  %v3100_v11 = vadd.f32 %v2985_v24, %v10304_v18  ;;  %v2572_v50 = vadd.f32 %v10209_v5, %v12156_v32  ;;  %v2570_v22 = vadd.f32 %v10217_v1, %v12157_v27  ;;  %v2573_v14 = vadd.f32 %v10227_v10, %v12158_v16  ;;  %v12161_v45 = vld [vmem:[#allocation40_spill] sm:$0xff] }
 0x1f9   : > { %3526 = vst [vmem:[#allocation2 + $0x31] sm:$0xff] %v3439_v57  ;;  %v3437_v40 = vmax.f32 %v3405_v35, 0.0  ;;  %v3408_v7 = vadd.f32 %v10339_v15, %v3369_v59  ;;  %v3367_v37 = vadd.f32 %v3242_v33, %v3097_v4  ;;  %v10394_v4 = vadd.f32 %v12155_v63, %v2567_v21 }
 0x1fa   : > { %v7999_v61 = vpop.f32.mrf.mxu0  ;;  %v2571_v21 = vadd.f32 %v10239_v17, %v10269_v52  ;;  %v2576_v5 = vadd.f32 %v10249_v56, %v12159_v19  ;;  %v2574_v1 = vadd.f32 %v10263_v8, %v12160_v23  ;;  %v2577_v10 = vadd.f32 %v10284_v25, %v12161_v45  ;;  %v12163_v52 = vld [vmem:[#allocation77_spill] sm:$0xff] }
 0x1fb   : > { %3524 = vst [vmem:[#allocation2 + $0x19] sm:$0xff] %v3437_v40  ;;  %v3440_v57 = vmax.f32 %v3408_v7, 0.0  ;;  %v3406_v35 = vadd.f32 %v10339_v15, %v3367_v37  ;;  %v3372_v33 = vadd.f32 %v7999_v61, %v3102_v0  ;;  %v7952_v40 = vpop.f32.mrf.mxu1  ;;  %v10418_v56 = vadd.f32 %v12163_v52, %v2570_v22 }
 0x1fc   : > { %v3255_v2 = vpop.f32.mrf.mxu0  ;;  %v3103_v18 = vadd.f32 %v7952_v40, %v10309_v41  ;;  %v10421_v8 = vadd.f32 %v10213_v43, %v2573_v14  ;;  %v2575_v25 = vadd.f32 %v10299_v47, %v10279_v36  ;;  %v10430_v22 = vadd.f32 %v10219_v58, %v2571_v21 }
 0x1fd   : > { %3527 = vst [vmem:[#allocation2 + $0x39] sm:$0xff] %v3440_v57  ;;  %v3438_v7 = vmax.f32 %v3406_v35, 0.0  ;;  %v3411_v61 = vadd.f32 %v10339_v15, %v3372_v33  ;;  %v3370_v37 = vadd.f32 %v3255_v2, %v3100_v11  ;;  %v2988_v60 = vpop.f32.mrf.mxu1  ;;  %v12162_v33 = vld [vmem:[#allocation75_spill] sm:$0xff]  ;;  %v10433_v43 = vadd.f32 %v10232_v38, %v2576_v5 }
 0x1fe   : > { %v8000_v6 = vpop.f32.mrf.mxu0  ;;  %v3101_v41 = vadd.f32 %v2988_v60, %v10318_v12  ;;  %v10415_v17 = vadd.f32 %v12162_v33, %v2572_v50  ;;  %v10436_v16 = vadd.f32 %v10242_v28, %v2574_v1  ;;  %v10439_v36 = vadd.f32 %v10256_v53, %v2577_v10 }
 0x1ff   : > { %3525 = vst [vmem:[#allocation2 + $0x21] sm:$0xff] %v3438_v7  ;;  %v3443_v24 = vmax.f32 %v3411_v61, 0.0  ;;  %v3409_v2 = vadd.f32 %v10339_v15, %v3370_v37  ;;  %v3373_v57 = vadd.f32 %v8000_v6, %v3103_v18  ;;  %v7955_v11 = vpop.f32.mrf.mxu1  ;;  %v10446_v38 = vadd.f32 %v10276_v62, %v2575_v25 }
 0x200   : > { %v3258_v59 = vpop.f32.mrf.mxu0  ;;  %v3106_v12 = vadd.f32 %v7955_v11, %v10321_v20  ;;  %v10427_v50 = vld [vmem:[#allocation2 + $0x30] sm:$0xff] }
 0x201   : > { %3530 = vst [vmem:[#allocation2 + $0x61] sm:$0xff] %v3443_v24  ;;  %v3441_v63 = vmax.f32 %v3409_v2, 0.0  ;;  %v3412_v6 = vadd.f32 %v10339_v15, %v3373_v57  ;;  %v3371_v32 = vadd.f32 %v3258_v59, %v3101_v41  ;;  %v3001_v47 = vpop.f32.mrf.mxu1  ;;  %v3701_v53 = vrot.slane %v10427_v50, 1 }
 0x202   : > { %v8003_v0 = vpop.f32.mrf.mxu0  ;;  %v10441_v14 = vld [vmem:[#allocation2 + $0x18] sm:$0xff]  ;;  %v3104_v58 = vadd.f32 %v3001_v47, %v10325_v44 }
 0x203   : > { %3528 = vst [vmem:[#allocation2 + $0x49] sm:$0xff] %v3441_v63  ;;  %v3444_v20 = vmax.f32 %v3412_v6, 0.0  ;;  %v3410_v59 = vadd.f32 %v10339_v15, %v3371_v32  ;;  %v3376_v40 = vadd.f32 %v8003_v0, %v3106_v12  ;;  %v7956_v61 = vpop.f32.mrf.mxu1  ;;  %v3696_v28 = vrot.slane %v10441_v14, 1  ;;  %v8640_v32 = vld [vmem:[%s11883_s3 + $0xf0] sm:$0xff]  }
 0x204   : > { %v3271_v35 = vpop.f32.mrf.mxu0  ;;  %v10449_v37 = vld [vmem:[#allocation2 + $0x38] sm:$0xff]  ;;  %v10453_v21 = vld [vmem:[#allocation2 + $0x40] sm:$0x3]  ;;  %v3107_v5 = vadd.f32 %v7956_v61, %v10328_v51 }
 0x205   : > { %3531 = vst [vmem:[#allocation2 + $0x69] sm:$0xff] %v3444_v20  ;;  %v3442_v19 = vmax.f32 %v3410_v59, 0.0  ;;  %v3415_v0 = vadd.f32 %v10339_v15, %v3376_v40  ;;  %v3374_v44 = vadd.f32 %v3271_v35, %v3104_v58  ;;  %v3004_v23 = vpop.f32.mrf.mxu1  ;;  %v10462_v10 = vpack.c.bf16 %v10449_v37, %v10427_v50 }
 0x206   : > { %v8004_v27 = vpop.f32.mrf.mxu0  ;;  %v10457_v1 = vld [vmem:[#allocation2 + $0x20] sm:$0xff]  ;;  %v3702_v60 = vrot.slane %v10449_v37, 1  ;;  %v10465_v24 = vld [vmem:[#allocation2 + $0x28] sm:$0x3]  ;;  %v3704_v2 = vrot.slane %v10453_v21, 1  ;;  %v3105_v35 = vadd.f32 %v3004_v23, %v10331_v13 }
 0x207   : > { %3529 = vst [vmem:[#allocation2 + $0x51] sm:$0xff] %v3442_v19  ;;  %v3447_v57 = vmax.f32 %v3415_v0, 0.0  ;;  %v3413_v51 = vadd.f32 %v10339_v15, %v3374_v44  ;;  %v3377_v41 = vadd.f32 %v8004_v27, %v3107_v5  ;;  %v7959_v52 = vpop.f32.mrf.mxu1  ;;  %v10472_v25 = vpack.c.bf16 %v10457_v1, %v10441_v14 }
 0x208   : > { %v3274_v7 = vpop.f32.mrf.mxu0  ;;  %v3697_v11 = vrot.slane %v10457_v1, 1  ;;  %v3699_v6 = vrot.slane %v10465_v24, 1  ;;  %v3110_v47 = vadd.f32 %v7959_v52, %v10334_v29  ;;  %v3703_v61 = vsel %vm3690_vm6, %v3701_v53, %v3702_v60 }
 0x209   : > { %3534 = vst [vmem:[#allocation2 + $0x91] sm:$0xff] %v3447_v57  ;;  %v3445_v12 = vmax.f32 %v3413_v51, 0.0  ;;  %v3416_v13 = vadd.f32 %v10339_v15, %v3377_v41  ;;  %v3375_v27 = vadd.f32 %v3274_v7, %v3105_v35  ;;  %8090 = vmatmul.mubr.bf16.vlgmr.msra.gmra.mxu0 %v10472_v25  ;;  %v3017_v59 = vpop.f32.mrf.mxu1  ;;  %v3705_v19 = vsel %vm3690_vm6, %v3702_v60, %v3704_v2  ;;  %v12164_v57 = vld [vmem:[#allocation31_spill] sm:$0xff] }
 0x20a   : > { %v8007_v62 = vpop.f32.mrf.mxu0  ;;  %v3698_v40 = vsel %vm3690_vm6, %v3696_v28, %v3697_v11  ;;  %v3700_v58 = vsel %vm3690_vm6, %v3697_v11, %v3699_v6  ;;  %v10487_v0 = vld [vmem:[#allocation2 + $0x48] sm:$0xff]  ;;  %v3108_v29 = vadd.f32 %v3017_v59, %v10342_v42  ;;  %8093 = vmatprep.mubr.bf16.mxu0 %v10462_v10  ;;  %8170 = vmatpush3.bf16.msra.mxu0 %v12164_v57  ;;  %v10493_v28 = vld [vmem:[#allocation2 + $0x60] sm:$0xff]  ;;  %v8639_v42 = vld [vmem:[%s11883_s3 + $0xb0] sm:$0xff]  }
 0x20b   : > { %3532 = vst [vmem:[#allocation2 + $0x79] sm:$0xff] %v3445_v12  ;;  %v3448_v44 = vmax.f32 %v3416_v13, 0.0  ;;  %v3414_v7 = vadd.f32 %v10339_v15, %v3375_v27  ;;  %v3380_v5 = vadd.f32 %v8007_v62, %v3110_v47  ;;  %v7960_v51 = vpop.f32.mrf.mxu1  ;;  %v10496_v60 = vpack.c.bf16 %v3700_v58, %v3698_v40  ;;  %8171 = vmatprep.subr.bf16.mxu0 %v8640_v32  ;;  %v8642_v13 = vld [vmem:[%s11883_s3 + $0xe8] sm:$0xff]  }
 0x20c   : > { %v3287_v33 = vpop.f32.mrf.mxu0  ;;  %v10498_v2 = vpack.c.bf16 %v3705_v19, %v3703_v61  ;;  %v3706_v41 = vrot.slane %v10487_v0, 1  ;;  %v10501_v35 = vld [vmem:[#allocation2 + $0x68] sm:$0xff]  ;;  %v3111_v6 = vadd.f32 %v7960_v51, %v10347_v48  ;;  %v10527_v57 = vld [vmem:[#allocation2 + $0x70] sm:$0x3] }
 0x20d   : > { %12165 = vst [vmem:[#allocation15_spill] sm:$0xff] %v10496_v60  ;;  %3535 = vst [vmem:[#allocation2 + $0x99] sm:$0xff] %v3448_v44  ;;  %v3446_v62 = vmax.f32 %v3414_v7, 0.0  ;;  %v3419_v52 = vadd.f32 %v10339_v15, %v3380_v5  ;;  %v3378_v11 = vadd.f32 %v3287_v33, %v3108_v29  ;;  %8042 = vmatmul.mubr.bf16.vlgmr.msra.gmra.mxu1 %v10496_v60  ;;  %v3020_v27 = vpop.f32.mrf.mxu1  ;;  %v3711_v33 = vrot.slane %v10493_v28, 1  ;;  %v12168_v44 = vld [vmem:[#allocation29_spill] sm:$0xff] }
 0x20e   : > { %v8008_v20 = vpop.f32.mrf.mxu0  ;;  %12166 = vst [vmem:[#allocation24_spill] sm:$0xff] %v10498_v2  ;;  %v10512_v47 = vld [vmem:[#allocation2 + $0x50] sm:$0xff]  ;;  %v10517_v40 = vpack.c.bf16 %v10501_v35, %v10493_v28  ;;  %v3712_v48 = vrot.slane %v10501_v35, 1  ;;  %8045 = vmatprep.mubr.bf16.mxu1 %v10498_v2  ;;  %8122 = vmatpush3.bf16.msra.mxu1 %v12168_v44  ;;  %v3109_v7 = vadd.f32 %v3020_v27, %v10356_v30  ;;  %v10525_v29 = vld [vmem:[#allocation2 + $0x58] sm:$0x3]  ;;  %v8641_v30 = vld [vmem:[%s11883_s3 + $0xa8] sm:$0xff]  }
 0x20f   : > { %3533 = vst [vmem:[#allocation2 + $0x81] sm:$0xff] %v3446_v62  ;;  %v3451_v58 = vmax.f32 %v3419_v52, 0.0  ;;  %v3417_v61 = vadd.f32 %v10339_v15, %v3378_v11  ;;  %v3381_v19 = vadd.f32 %v8008_v20, %v3111_v6  ;;  %v7963_v51 = vpop.f32.mrf.mxu1  ;;  %v10531_v49 = vpack.c.bf16 %v10512_v47, %v10487_v0  ;;  %8123 = vmatprep.subr.bf16.mxu1 %v8639_v42  ;;  %v10544_v20 = vld [vmem:[%s11883_s3 + $0xe0] sm:$0xff]  }
 0x210   : > { %v3290_v23 = vpop.f32.mrf.mxu0  ;;  %12167 = vst [vmem:[#allocation28_spill] sm:$0xff] %v10517_v40  ;;  %v3707_v62 = vrot.slane %v10512_v47, 1  ;;  %8172 = vmatpush3.bf16.msra.mxu0 %v8640_v32  ;;  %v3114_v44 = vadd.f32 %v7963_v51, %v10368_v9 }
 0x211   : > { %12169 = vst [vmem:[#allocation20_spill] sm:$0xff] %v10531_v49  ;;  %3538 = vst [vmem:[#allocation2 + $0xc1] sm:$0xff] %v3451_v58  ;;  %v3449_v11 = vmax.f32 %v3417_v61, 0.0  ;;  %v3420_v6 = vadd.f32 %v10339_v15, %v3381_v19  ;;  %v3379_v27 = vadd.f32 %v3290_v23, %v3109_v7  ;;  %8173 = vmatprep.subr.bf16.mxu0 %v8642_v13  ;;  %8094 = vmatmul.mubr.bf16.gmra.mxu0 %v10531_v49  ;;  %v3033_v32 = vpop.f32.mrf.mxu1 }
 0x212   : > { %v8011_v12 = vpop.f32.mrf.mxu0  ;;  %v3708_v52 = vsel %vm3690_vm6, %v3706_v41, %v3707_v62  ;;  %v3709_v58 = vrot.slane %v10525_v29, 1  ;;  %v3713_v61 = vsel %vm3690_vm6, %v3711_v33, %v3712_v48  ;;  %v3714_v23 = vrot.slane %v10527_v57, 1  ;;  %v10551_v19 = vld [vmem:[#allocation2 + $0x78] sm:$0xff]  ;;  %8097 = vmatprep.mubr.bf16.mxu0 %v10517_v40  ;;  %8124 = vmatpush3.bf16.msra.mxu1 %v8639_v42 }
 0x213   : > { %3536 = vst [vmem:[#allocation2 + $0xa9] sm:$0xff] %v3449_v11  ;;  %v3452_v9 = vmax.f32 %v3420_v6, 0.0  ;;  %v3418_v7 = vadd.f32 %v10339_v15, %v3379_v27  ;;  %v3384_v51 = vadd.f32 %v8011_v12, %v3114_v44  ;;  %v3112_v18 = vadd.f32 %v3033_v32, %v10371_v46  ;;  %v7964_v45 = vpop.f32.mrf.mxu1  ;;  %8125 = vmatprep.subr.bf16.mxu1 %v8641_v30  ;;  %v8643_v46 = vld [vmem:[%s11883_s3 + $0xa0] sm:$0xff]   ;;  %v10567_v44 = vld [vmem:[#allocation2 + $0x90] sm:$0xff] }
 0x214   : > { %v3303_v5 = vpop.f32.mrf.mxu0  ;;  %v3710_v33 = vsel %vm3690_vm6, %v3707_v62, %v3709_v58  ;;  %v3715_v53 = vsel %vm3690_vm6, %v3712_v48, %v3714_v23  ;;  %v3716_v2 = vrot.slane %v10551_v19, 1  ;;  %v10560_v11 = vld [vmem:[#allocation2 + $0x98] sm:$0xff]  ;;  %8174 = vmatpush3.bf16.msra.mxu0 %v8642_v13  ;;  %v3115_v27 = vadd.f32 %v7964_v45, %v10374_v3  ;;  %v10602_v23 = vld [vmem:[#allocation2 + $0xa0] sm:$0x3] }
 0x215   : > { %3539 = vst [vmem:[#allocation2 + $0xc9] sm:$0xff] %v3452_v9  ;;  %v3450_v42 = vmax.f32 %v3418_v7, 0.0  ;;  %v3423_v12 = vadd.f32 %v10339_v15, %v3384_v51  ;;  %v3382_v6 = vadd.f32 %v3303_v5, %v3112_v18  ;;  %8175 = vmatprep.subr.bf16.mxu0 %v10544_v20  ;;  %v10570_v48 = vpack.c.bf16 %v3710_v33, %v3708_v52  ;;  %v3036_v13 = vpop.f32.mrf.mxu1  ;;  %v8646_v3 = vld [vmem:[%s11883_s3 + $0xd8] sm:$0xff]  }
 0x216   : > { %v8012_v59 = vpop.f32.mrf.mxu0  ;;  %v10572_v32 = vpack.c.bf16 %v3715_v53, %v3713_v61  ;;  %v10574_v58 = vld [vmem:[#allocation2 + $0x80] sm:$0xff]  ;;  %v10579_v9 = vpack.c.bf16 %v10560_v11, %v10567_v44  ;;  %v3113_v53 = vadd.f32 %v3036_v13, %v10380_v34  ;;  %v10586_v61 = vld [vmem:[#allocation2 + $0x88] sm:$0x3]  ;;  %8126 = vmatpush3.bf16.msra.mxu1 %v8641_v30  ;;  %v8645_v34 = vld [vmem:[%s11883_s3 + $0x98] sm:$0xff]  }
 0x217   : > { %12170 = vst [vmem:[#allocation50_spill] sm:$0xff] %v10570_v48  ;;  %3537 = vst [vmem:[#allocation2 + $0xb1] sm:$0xff] %v3450_v42  ;;  %v3455_v18 = vmax.f32 %v3423_v12, 0.0  ;;  %v3421_v45 = vadd.f32 %v10339_v15, %v3382_v6  ;;  %v3385_v5 = vadd.f32 %v8012_v59, %v3115_v27  ;;  %8046 = vmatmul.mubr.bf16.gmra.mxu1 %v10570_v48  ;;  %v7967_v7 = vpop.f32.mrf.mxu1  ;;  %v3717_v33 = vrot.slane %v10574_v58, 1 }
 0x218   : > { %v3306_v63 = vpop.f32.mrf.mxu0  ;;  %12171 = vst [vmem:[#allocation52_spill] sm:$0xff] %v10572_v32  ;;  %12172 = vst [vmem:[#allocation18_spill] sm:$0xff] %v10579_v9  ;;  %v10591_v51 = vpack.c.bf16 %v10574_v58, %v10551_v19  ;;  %v3721_v42 = vrot.slane %v10567_v44, 1  ;;  %v3722_v12 = vrot.slane %v10560_v11, 1  ;;  %8127 = vmatprep.subr.bf16.mxu1 %v8643_v46  ;;  %8049 = vmatprep.mubr.bf16.mxu1 %v10572_v32 }
 0x219   : > { %3542 = vst [vmem:[#allocation2 + $0xf1] sm:$0xff] %v3455_v18  ;;  %v3453_v59 = vmax.f32 %v3421_v45, 0.0  ;;  %v3424_v30 = vadd.f32 %v10339_v15, %v3385_v5  ;;  %v3383_v6 = vadd.f32 %v3306_v63, %v3113_v53  ;;  %v3118_v27 = vadd.f32 %v7967_v7, %v10383_v26  ;;  %8176 = vmatpush3.bf16.msra.mxu0 %v10544_v20  ;;  %v3049_v48 = vpop.f32.mrf.mxu1  ;;  %v8648_v26 = vld [vmem:[%s11883_s3 + $0xd0] sm:$0xff]  }
 0x21a   : > { %v8015_v62 = vpop.f32.mrf.mxu0  ;;  %12173 = vst [vmem:[#allocation54_spill] sm:$0xff] %v10591_v51  ;;  %8098 = vmatmul.mubr.bf16.gmra.mxu0 %v10591_v51  ;;  %v3718_v45 = vsel %vm3690_vm6, %v3716_v2, %v3717_v33  ;;  %v3719_v5 = vrot.slane %v10586_v61, 1  ;;  %8177 = vmatprep.subr.bf16.mxu0 %v8646_v3  ;;  %v3116_v7 = vadd.f32 %v3049_v48, %v10386_v31  ;;  %v10616_v18 = vld [vmem:[#allocation2 + $0xa8] sm:$0xff]  ;;  %v8647_v31 = vld [vmem:[%s11883_s3 + $0x90] sm:$0xff]  }
 0x21b   : > { %3540 = vst [vmem:[#allocation2 + $0xd9] sm:$0xff] %v3453_v59  ;;  %v3456_v63 = vmax.f32 %v3424_v30, 0.0  ;;  %v3422_v20 = vadd.f32 %v10339_v15, %v3383_v6  ;;  %v3388_v53 = vadd.f32 %v8015_v62, %v3118_v27  ;;  %8101 = vmatprep.mubr.bf16.mxu0 %v10579_v9  ;;  %8128 = vmatpush3.bf16.msra.mxu1 %v8643_v46  ;;  %v7968_v32 = vpop.f32.mrf.mxu1  ;;  %v3724_v59 = vrot.slane %v10602_v23, 1 }
 0x21c   : > { %v3319_v52 = vpop.f32.mrf.mxu0  ;;  %v3720_v60 = vsel %vm3690_vm6, %v3717_v33, %v3719_v5  ;;  %v3723_v51 = vsel %vm3690_vm6, %v3721_v42, %v3722_v12  ;;  %8129 = vmatprep.subr.bf16.mxu1 %v8645_v34  ;;  %v3119_v46 = vadd.f32 %v7968_v32, %v10389_v55  ;;  %v10627_v27 = vld [vmem:[#allocation2 + $0xc8] sm:$0xff]  ;;  %v3726_v9 = vrot.slane %v10616_v18, 1 }
 0x21d   : > { %3543 = vst [vmem:[#allocation2 + $0xf9] sm:$0xff] %v3456_v63  ;;  %v3454_v62 = vmax.f32 %v3422_v20, 0.0  ;;  %v3427_v48 = vadd.f32 %v10339_v15, %v3388_v53  ;;  %v3386_v30 = vadd.f32 %v3319_v52, %v3116_v7  ;;  %8178 = vmatpush3.bf16.msra.mxu0 %v8646_v3  ;;  %v10629_v33 = vpack.c.bf16 %v3720_v60, %v3718_v45  ;;  %v3052_v5 = vpop.f32.mrf.mxu1  ;;  %v8650_v55 = vld [vmem:[%s11883_s3 + $0xc8] sm:$0xff]   ;;  %v10642_v45 = vld [vmem:[#allocation2 + $0xc0] sm:$0xff] }
 0x21e   : > { %v8016_v13 = vpop.f32.mrf.mxu0  ;;  %v3725_v42 = vsel %vm3690_vm6, %v3722_v12, %v3724_v59  ;;  %v10632_v2 = vld [vmem:[#allocation2 + $0xb0] sm:$0xff]  ;;  %8179 = vmatprep.subr.bf16.mxu0 %v8648_v26  ;;  %v3117_v20 = vadd.f32 %v3052_v5, %v10394_v4 }
 0x21f   : > { %12174 = vst [vmem:[#allocation41_spill] sm:$0xff] %v10629_v33  ;;  %3541 = vst [vmem:[#allocation2 + $0xe1] sm:$0xff] %v3454_v62  ;;  %v3459_v32 = vmax.f32 %v3427_v48, 0.0  ;;  %v3425_v3 = vadd.f32 %v10339_v15, %v3386_v30  ;;  %v3389_v60 = vadd.f32 %v8016_v13, %v3119_v46  ;;  %v10640_v52 = vpack.c.bf16 %v3725_v42, %v3723_v51  ;;  %v7971_v53 = vpop.f32.mrf.mxu1  ;;  %v8649_v51 = vld [vmem:[%s11883_s3 + $0x88] sm:$0xff]   ;;  %v10662_v46 = vld [vmem:[#allocation2 + $0xb8] sm:$0x3] }
 0x220   : > { %v3322_v41 = vpop.f32.mrf.mxu0  ;;  %8130 = vmatpush3.bf16.msra.mxu1 %v8645_v34  ;;  %v10648_v7 = vpack.c.bf16 %v10632_v2, %v10616_v18  ;;  %v3727_v59 = vrot.slane %v10632_v2, 1  ;;  %v10653_v13 = vpack.c.bf16 %v10627_v27, %v10642_v45  ;;  %v3122_v62 = vadd.f32 %v7971_v53, %v10415_v17  ;;  %v10664_v42 = vld [vmem:[#allocation2 + $0xd0] sm:$0x3]  ;;  %v8652_v17 = vld [vmem:[%s11883_s3 + $0xc0] sm:$0xff]  }
 0x221   : > { %12175 = vst [vmem:[#allocation42_spill] sm:$0xff] %v10640_v52  ;;  %8050 = vmatmul.mubr.bf16.gmra.mxu1 %v10629_v33  ;;  %8131 = vmatprep.subr.bf16.mxu1 %v8647_v31  ;;  %3546 = vst [vmem:[#allocation2 + $0x121] sm:$0xff] %v3459_v32  ;;  %v3457_v34 = vmax.f32 %v3425_v3, 0.0  ;;  %v3428_v4 = vadd.f32 %v10339_v15, %v3389_v60  ;;  %v3387_v5 = vadd.f32 %v3322_v41, %v3117_v20  ;;  %v3065_v63 = vpop.f32.mrf.mxu1 }
 0x222   : > { %v8019_v6 = vpop.f32.mrf.mxu0  ;;  %12176 = vst [vmem:[#allocation43_spill] sm:$0xff] %v10648_v7  ;;  %12177 = vst [vmem:[#allocation23_spill] sm:$0xff] %v10653_v13  ;;  %8053 = vmatprep.mubr.bf16.mxu1 %v10640_v52  ;;  %8180 = vmatpush3.bf16.msra.mxu0 %v8648_v26  ;;  %v3731_v32 = vrot.slane %v10642_v45, 1  ;;  %v3732_v3 = vrot.slane %v10627_v27, 1  ;;  %v3120_v26 = vadd.f32 %v3065_v63, %v10418_v56  ;;  %v10676_v52 = vld [vmem:[#allocation2 + $0xd8] sm:$0xff]  ;;  %v3729_v40 = vrot.slane %v10662_v46, 1 }
 0x223   : > { %8102 = vmatmul.mubr.bf16.gmra.mxu0 %v10648_v7  ;;  %8181 = vmatprep.subr.bf16.mxu0 %v8650_v55  ;;  %3544 = vst [vmem:[#allocation2 + $0x109] sm:$0xff] %v3457_v34  ;;  %v3460_v53 = vmax.f32 %v3428_v4, 0.0  ;;  %v3392_v48 = vadd.f32 %v8019_v6, %v3122_v62  ;;  %v3426_v60 = vadd.f32 %v10339_v15, %v3387_v5  ;;  %v7972_v33 = vpop.f32.mrf.mxu1  ;;  %v3734_v34 = vrot.slane %v10664_v42, 1  ;;  %v8651_v56 = vld [vmem:[%s11883_s3 + $0x80] sm:$0xff]  }
 0x224   : > { %v3335_v12 = vpop.f32.mrf.mxu0  ;;  %8105 = vmatprep.mubr.bf16.mxu0 %v10653_v13  ;;  %8132 = vmatpush3.bf16.msra.mxu1 %v8647_v31  ;;  %v3728_v7 = vsel %vm3690_vm6, %v3726_v9, %v3727_v59  ;;  %v3123_v31 = vadd.f32 %v7972_v33, %v10421_v8  ;;  %v3733_v4 = vsel %vm3690_vm6, %v3731_v32, %v3732_v3  ;;  %v3736_v39 = vrot.slane %v10676_v52, 1  ;;  %v10696_v33 = vld [vmem:[#allocation2 + $0xf8] sm:$0xff] }
 0x225   : > { %8133 = vmatprep.subr.bf16.mxu1 %v8649_v51  ;;  %3547 = vst [vmem:[#allocation2 + $0x129] sm:$0xff] %v3460_v53  ;;  %v3431_v6 = vadd.f32 %v10339_v15, %v3392_v48  ;;  %v3390_v63 = vadd.f32 %v3335_v12, %v3120_v26  ;;  %v3458_v9 = vmax.f32 %v3426_v60, 0.0  ;;  %v3730_v5 = vsel %vm3690_vm6, %v3727_v59, %v3729_v40  ;;  %v3068_v13 = vpop.f32.mrf.mxu1  ;;  %v10701_v40 = vld [vmem:[%s11883_s3 + $0x178] sm:$0xff]  }
 0x226   : > { %v8020_v30 = vpop.f32.mrf.mxu0  ;;  %8182 = vmatpush3.bf16.msra.mxu0 %v8650_v55  ;;  %v3735_v41 = vsel %vm3690_vm6, %v3732_v3, %v3734_v34  ;;  %v10690_v49 = vld [vmem:[#allocation2 + $0xe0] sm:$0xff]  ;;  %v10694_v8 = vpack.c.bf16 %v3730_v5, %v3728_v7  ;;  %v3121_v59 = vadd.f32 %v3068_v13, %v10430_v22  ;;  %v10722_v34 = vld [vmem:[#allocation2 + $0xe8] sm:$0x3] }
 0x227   : > { %8183 = vmatprep.subr.bf16.mxu0 %v8652_v17  ;;  %v3463_v53 = vmax.f32 %v3431_v6, 0.0  ;;  %v3429_v12 = vadd.f32 %v10339_v15, %v3390_v63  ;;  %v3393_v48 = vadd.f32 %v8020_v30, %v3123_v31  ;;  %3545 = vst [vmem:[#allocation2 + $0x111] sm:$0xff] %v3458_v9  ;;  %v10703_v55 = vpack.c.bf16 %v3735_v41, %v3733_v4  ;;  %v7975_v32 = vpop.f32.mrf.mxu1  ;;  %v10711_v30 = vld [vmem:[#allocation2 + $0xf0] sm:$0xff] }
 0x228   : > { %v3338_v20 = vpop.f32.mrf.mxu0  ;;  %12178 = vst [vmem:[#allocation56_spill] sm:$0xff] %v10694_v8  ;;  %8134 = vmatpush3.bf16.msra.mxu1 %v8649_v51  ;;  %v10708_v3 = vpack.c.bf16 %v10690_v49, %v10676_v52  ;;  %v3737_v7 = vrot.slane %v10690_v49, 1  ;;  %v10716_v51 = vld [vmem:[%s11883_s3 + $0x138] sm:$0xff]   ;;  %v3126_v22 = vadd.f32 %v7975_v32, %v10433_v43  ;;  %v10729_v4 = vpack.c.bf16 %v10696_v33, %v10711_v30 }
 0x229   : > { %12179 = vst [vmem:[#allocation44_spill] sm:$0xff] %v10703_v55  ;;  %8135 = vmatprep.subr.bf16.mxu1 %v8651_v56  ;;  %12181 = vst [vmem:[#allocation58_spill] sm:$0xff] %v10716_v51  ;;  %v3461_v60 = vmax.f32 %v3429_v12, 0.0  ;;  %v3432_v26 = vadd.f32 %v10339_v15, %v3393_v48  ;;  %8054 = vmatmul.mubr.bf16.gmra.mxu1 %v10694_v8  ;;  %v3391_v6 = vadd.f32 %v3338_v20, %v3121_v59  ;;  %v3081_v31 = vpop.f32.mrf.mxu1  ;;  %v10734_v12 = vld [vmem:[#allocation2 + $0x100] sm:$0x3] }
 0x22a   : > { %v8023_v62 = vpop.f32.mrf.mxu0  ;;  %12180 = vst [vmem:[#allocation25_spill] sm:$0xff] %v10708_v3  ;;  %3550 = vst [vmem:[#allocation2 + $0x151] sm:$0xff] %v3463_v53  ;;  %8184 = vmatpush3.bf16.msra.mxu0 %v8652_v17  ;;  %8057 = vmatprep.mubr.bf16.mxu1 %v10703_v55  ;;  %v3742_v43 = vrot.slane %v10696_v33, 1  ;;  %v3124_v53 = vadd.f32 %v3081_v31, %v10436_v16  ;;  %v3741_v17 = vrot.slane %v10711_v30, 1  ;;  %v10749_v63 = vld [vmem:[#allocation2 + $0x108] sm:$0xff] }
 0x22b   : > { %8106 = vmatmul.mubr.bf16.gmra.mxu0 %v10708_v3  ;;  %12182 = vst [vmem:[#allocation45_spill] sm:$0xff] %v10729_v4  ;;  %3548 = vst [vmem:[#allocation2 + $0x139] sm:$0xff] %v3461_v60  ;;  %v3464_v9 = vmax.f32 %v3432_v26, 0.0  ;;  %v3396_v5 = vadd.f32 %v8023_v62, %v3126_v22  ;;  %8265 = vmatprep.subr.bf16.mxu0 %v10701_v40  ;;  %v3430_v20 = vadd.f32 %v10339_v15, %v3391_v6  ;;  %v7976_v59 = vpop.f32.mrf.mxu1 }
 0x22c   : > { %v3351_v41 = vpop.f32.mrf.mxu0  ;;  %8136 = vmatpush3.bf16.msra.mxu1 %v8651_v56  ;;  %8109 = vmatprep.mubr.bf16.mxu0 %v10729_v4  ;;  %v3738_v32 = vsel %vm3690_vm6, %v3736_v39, %v3737_v7  ;;  %v3739_v62 = vrot.slane %v10722_v34, 1  ;;  %v3127_v26 = vadd.f32 %v7976_v59, %v10439_v36  ;;  %v3743_v48 = vsel %vm3690_vm6, %v3741_v17, %v3742_v43  ;;  %v10756_v36 = vld [vmem:[#allocation2 + $0x128] sm:$0xff] }
 0x22d   : > { %8217 = vmatprep.subr.bf16.mxu1 %v10716_v51  ;;  %3551 = vst [vmem:[#allocation2 + $0x159] sm:$0xff] %v3464_v9  ;;  %v3435_v16 = vadd.f32 %v10339_v15, %v3396_v5  ;;  %v3394_v60 = vadd.f32 %v3351_v41, %v3124_v53  ;;  %v3462_v6 = vmax.f32 %v3430_v20, 0.0  ;;  %v3744_v39 = vrot.slane %v10734_v12, 1  ;;  %v3084_v13 = vpop.f32.mrf.mxu1 }
 0x22e   : > { %v8024_v22 = vpop.f32.mrf.mxu0  ;;  %v3740_v31 = vsel %vm3690_vm6, %v3737_v7, %v3739_v62  ;;  %v10754_v53 = vld [vmem:[#allocation2 + $0x110] sm:$0xff]  ;;  %v3125_v17 = vadd.f32 %v3084_v13, %v10446_v38  ;;  %v10765_v62 = vld [vmem:[#allocation2 + $0x120] sm:$0xff]  ;;  %v10772_v38 = vld [vmem:[#allocation2 + $0x118] sm:$0x3]  ;;  %v12194_v3 = vrot.slane %v10427_v50, 2 }
 0x22f   : > { %v3467_v55 = vmax.f32 %v3435_v16, 0.0  ;;  %v3433_v9 = vadd.f32 %v10339_v15, %v3394_v60  ;;  %v3397_v5 = vadd.f32 %v8024_v22, %v3127_v26  ;;  %v10752_v41 = vpack.c.bf16 %v3740_v31, %v3738_v32  ;;  %3549 = vst [vmem:[#allocation2 + $0x141] sm:$0xff] %v3462_v6  ;;  %v10774_v13 = vld [vmem:[#allocation2 + $0x130] sm:$0x3] }
 0x230   : > { %v3745_v7 = vsel %vm3690_vm6, %v3742_v43, %v3744_v39  ;;  %v10762_v20 = vpack.c.bf16 %v10754_v53, %v10749_v63  ;;  %v3747_v59 = vrot.slane %v10754_v53, 1  ;;  %v3354_v26 = vpop.f32.mrf.mxu0  ;;  %v3746_v43 = vrot.slane %v10749_v63, 1 }
 0x231   : > { %12183 = vst [vmem:[#allocation46_spill] sm:$0xff] %v10752_v41  ;;  %3554 = vst [vmem:[#allocation2 + $0x181] sm:$0xff] %v3467_v55  ;;  %v3465_v32 = vmax.f32 %v3433_v9, 0.0  ;;  %v3436_v16 = vadd.f32 %v10339_v15, %v3397_v5  ;;  %8058 = vmatmul.mubr.bf16.gmra.mxu1 %v10752_v41  ;;  %v10769_v60 = vpack.c.bf16 %v3745_v7, %v3743_v48  ;;  %v3751_v9 = vrot.slane %v10765_v62, 1 }
 0x232   : > { %12184 = vst [vmem:[#allocation60_spill] sm:$0xff] %v10762_v20  ;;  %v3395_v22 = vadd.f32 %v3354_v26, %v3125_v17  ;;  %v10781_v31 = vpack.c.bf16 %v10756_v36, %v10765_v62  ;;  %v10783_v48 = vld [vmem:[#allocation2 + $0x138] sm:$0xff]  ;;  %v3752_v5 = vrot.slane %v10756_v36, 1  ;;  %v3748_v26 = vsel %vm3690_vm6, %v3746_v43, %v3747_v59 }
 0x233   : > { %12185 = vst [vmem:[#allocation47_spill] sm:$0xff] %v10769_v60  ;;  %8110 = vmatmul.mubr.bf16.gmra.mxu0 %v10762_v20  ;;  %3552 = vst [vmem:[#allocation2 + $0x169] sm:$0xff] %v3465_v32  ;;  %v3468_v39 = vmax.f32 %v3436_v16, 0.0  ;;  %8061 = vmatprep.mubr.bf16.mxu1 %v10769_v60  ;;  %v3749_v6 = vrot.slane %v10772_v38, 1  ;;  %v3754_v55 = vrot.slane %v10774_v13, 1  ;;  %v10794_v32 = vld [vmem:[#allocation2 + $0x150] sm:$0xff] }
 0x234   : > { %12186 = vst [vmem:[#allocation48_spill] sm:$0xff] %v10781_v31  ;;  %v3434_v17 = vadd.f32 %v10339_v15, %v3395_v22  ;;  %8113 = vmatprep.mubr.bf16.mxu0 %v10781_v31  ;;  %v10796_v16 = vld [vmem:[#allocation2 + $0x158] sm:$0xff]  ;;  %v3753_v60 = vsel %vm3690_vm6, %v3751_v9, %v3752_v5  ;;  %v3756_v7 = vrot.slane %v10783_v48, 1  ;;  %v10808_v31 = vld [vmem:[#allocation2 + $0x160] sm:$0x3]  ;;  %v3761_v20 = vrot.slane %v10794_v32, 1 }
 0x235   : > { %3555 = vst [vmem:[#allocation2 + $0x189] sm:$0xff] %v3468_v39  ;;  %v3750_v43 = vsel %vm3690_vm6, %v3747_v59, %v3749_v6  ;;  %v3755_v41 = vsel %vm3690_vm6, %v3752_v5, %v3754_v55  ;;  %v10806_v8 = vpack.c.bf16 %v10796_v16, %v10794_v32 }
 0x236   : > { %v3466_v22 = vmax.f32 %v3434_v17, 0.0  ;;  %v10810_v39 = vpack.c.bf16 %v3750_v43, %v3748_v26  ;;  %v10812_v56 = vpack.c.bf16 %v3755_v41, %v3753_v60  ;;  %v10814_v9 = vld [vmem:[#allocation2 + $0x140] sm:$0xff]  ;;  %v3762_v17 = vrot.slane %v10796_v16, 1  ;;  %v10818_v15 = vld [vmem:[#allocation2 + $0x148] sm:$0x3] }
 0x237   : > { %12187 = vst [vmem:[#allocation49_spill] sm:$0xff] %v10806_v8  ;;  %v10822_v59 = vpack.c.bf16 %v10814_v9, %v10783_v48  ;;  %v3757_v6 = vrot.slane %v10814_v9, 1  ;;  %v3759_v60 = vrot.slane %v10818_v15, 1  ;;  %v3764_v26 = vrot.slane %v10808_v31, 1 }
 0x238   : > { %12188 = vst [vmem:[#allocation51_spill] sm:$0xff] %v10810_v39  ;;  %12189 = vst [vmem:[#allocation53_spill] sm:$0xff] %v10812_v56  ;;  %v3763_v5 = vsel %vm3690_vm6, %v3761_v20, %v3762_v17  ;;  %v12192_v43 = vrot.slane %v10441_v14, 2  ;;  %v12193_v20 = vrot.slane %v10449_v37, 2  ;;  %v4268_v14 = vrot.slane %v10453_v21, 2 }
 0x239   : > { %3553 = vst [vmem:[#allocation2 + $0x171] sm:$0xff] %v3466_v22  ;;  %12190 = vst [vmem:[#allocation55_spill] sm:$0xff] %v10822_v59  ;;  %8062 = vmatmul.mubr.bf16.gmra.mxu1 %v10810_v39  ;;  %v12191_v22 = vrot.slane %v10457_v1, 2  ;;  %v3758_v41 = vsel %vm3690_vm6, %v3756_v7, %v3757_v6  ;;  %v4263_v39 = vrot.slane %v10465_v24, 2  ;;  %v3765_v7 = vsel %vm3690_vm6, %v3762_v17, %v3764_v26 }
 0x23a   : > { %8065 = vmatprep.mubr.bf16.mxu1 %v10812_v56  ;;  %v10839_v55 = vld [vmem:[#allocation2 + $0x168] sm:$0xff]  ;;  %v4267_v51 = vsel %vm4254_vm7, %v12194_v3, %v12193_v20  ;;  %v10855_v24 = vpack.c.bf16 %v3765_v7, %v3763_v5  ;;  %v12196_v21 = vmov %v12193_v20  ;;  %v12197_v17 = vrot.slane %v10512_v47, 2 }
 0x23b   : > { %v4262_v4 = vsel %vm4254_vm7, %v12192_v43, %v12191_v22  ;;  %8114 = vmatmul.mubr.bf16.gmra.mxu0 %v10822_v59  ;;  %v3760_v43 = vsel %vm3690_vm6, %v3757_v6, %v3759_v60  ;;  %v3766_v56 = vrot.slane %v10839_v55, 1  ;;  %v12195_v50 = vmov %v12191_v22 }
 0x23c   : > { %8117 = vmatprep.mubr.bf16.mxu0 %v10806_v8  ;;  %v10853_v59 = vpack.c.bf16 %v3760_v43, %v3758_v41  ;;  %v4264_v3 = vsel %vm4254_vm7, %v12195_v50, %v4263_v39  ;;  %v4269_v20 = vsel %vm4254_vm7, %v12196_v21, %v4268_v14  ;;  %v12198_v6 = vrot.slane %v10487_v0, 2 }
 0x23d   : > { %v10863_v8 = vpack.c.bf16 %v4264_v3, %v4262_v4  ;;  %v10865_v22 = vpack.c.bf16 %v4269_v20, %v4267_v51  ;;  %v4273_v60 = vrot.slane %v10525_v29, 2  ;;  %v12199_v1 = vrot.slane %v10501_v35, 2 }
 0x23e   : > { %v4272_v41 = vsel %vm4254_vm7, %v12198_v6, %v12197_v17  ;;  %v12200_v39 = vrot.slane %v10493_v28, 2  ;;  %v4278_v5 = vrot.slane %v10527_v57, 2  ;;  %v12201_v4 = vrot.slane %v10574_v58, 2 }
 0x23f   : > { %v12202_v51 = vrot.slane %v10551_v19, 2  ;;  %v4283_v0 = vrot.slane %v10586_v61, 2  ;;  %v12203_v29 = vmov %v12197_v17  ;;  %v12204_v7 = vrot.slane %v10560_v11, 2 }
 0x240   : > { %v4277_v37 = vsel %vm4254_vm7, %v12200_v39, %v12199_v1  ;;  %v10885_v14 = vld [vmem:[#allocation2 + $0x170] sm:$0xff]  ;;  %v10887_v43 = vld [vmem:[#allocation2 + $0x178] sm:$0x3]  ;;  %v4274_v28 = vsel %vm4254_vm7, %v12203_v29, %v4273_v60  ;;  %v12205_v57 = vrot.slane %v10567_v44, 2  ;;  %v4288_v19 = vrot.slane %v10602_v23, 2 }
 0x241   : > { %v4282_v26 = vsel %vm4254_vm7, %v12202_v51, %v12201_v4  ;;  %v12206_v3 = vrot.slane %v10632_v2, 2  ;;  %v12207_v61 = vrot.slane %v10616_v18, 2  ;;  %v10905_v20 = vpack.c.bf16 %v10885_v14, %v10839_v55  ;;  %8066 = vmatmul.mubr.bf16.gmra.mxu1 %v10853_v59 }
 0x242   : > { %v4287_v50 = vsel %vm4254_vm7, %v12205_v57, %v12204_v7  ;;  %v3767_v47 = vrot.slane %v10885_v14, 1  ;;  %v4331_v17 = vrot.slane %v10885_v14, 2  ;;  %v3769_v44 = vrot.slane %v10887_v43, 1  ;;  %8069 = vmatprep.mubr.bf16.mxu1 %v10855_v24  ;;  %v8660_v14 = vld [vmem:[%s11883_s3 + $0x160] sm:$0xff]  }
 0x243   : > { %v4292_v21 = vsel %vm4254_vm7, %v12207_v61, %v12206_v3  ;;  %v10911_v6 = vpack.c.bf16 %v4274_v28, %v4272_v41  ;;  %v12208_v23 = vmov %v12199_v1  ;;  %v12209_v60 = vmov %v12201_v4  ;;  %8118 = vmatmul.mubr.bf16.gmra.mxu0 %v10905_v20 }
 0x244   : > { %v4279_v18 = vsel %vm4254_vm7, %v12208_v23, %v4278_v5  ;;  %v4284_v1 = vsel %vm4254_vm7, %v12209_v60, %v4283_v0  ;;  %v12210_v39 = vmov %v12204_v7  ;;  %v3768_v51 = vsel %vm3690_vm6, %v3766_v56, %v3767_v47  ;;  %8185 = vmatprep.mubr.bf16.mxu0 %v10472_v25 }
 0x245   : > { %v4289_v4 = vsel %vm4254_vm7, %v12210_v39, %v4288_v19  ;;  %v3770_v41 = vsel %vm3690_vm6, %v3767_v47, %v3769_v44  ;;  %v10926_v29 = vpack.c.bf16 %v4279_v18, %v4277_v37  ;;  %v4293_v35 = vrot.slane %v10662_v46, 2 }
 0x246   : > { %v10930_v58 = vpack.c.bf16 %v3770_v41, %v3768_v51  ;;  %v10932_v5 = vpack.c.bf16 %v4284_v1, %v4282_v26  ;;  %v10934_v11 = vpack.c.bf16 %v4289_v4, %v4287_v50  ;;  %v12211_v0 = vrot.slane %v10627_v27, 2 }
 0x247   : > { %v12212_v28 = vrot.slane %v10642_v45, 2  ;;  %v12213_v7 = vmov %v12206_v3  ;;  %v4298_v46 = vrot.slane %v10664_v42, 2  ;;  %v12214_v25 = vrot.slane %v10690_v49, 2 }
 0x248   : > { %v4294_v37 = vsel %vm4254_vm7, %v12213_v7, %v4293_v35  ;;  %v12215_v57 = vrot.slane %v10676_v52, 2  ;;  %v4303_v50 = vrot.slane %v10722_v34, 2  ;;  %v12216_v45 = vrot.slane %v10696_v33, 2 }
 0x249   : > { %v4297_v56 = vsel %vm4254_vm7, %v12212_v28, %v12211_v0  ;;  %v10951_v19 = vpack.c.bf16 %v4294_v37, %v4292_v21  ;;  %v12217_v3 = vrot.slane %v10711_v30, 2  ;;  %v4308_v61 = vrot.slane %v10734_v12, 2  ;;  %v10998_v28 = vld [vmem:[#allocation2 + $0x180] sm:$0xff]  ;;  %8070 = vmatmul.mubr.bf16.gmra.mxu1 %v10930_v58 }
 0x24a   : > { %v4302_v26 = vsel %vm4254_vm7, %v12215_v57, %v12214_v25  ;;  %v12218_v42 = vrot.slane %v10754_v53, 2  ;;  %v12219_v47 = vrot.slane %v10749_v63, 2  ;;  %v12220_v44 = vmov %v12211_v0  ;;  %v12231_v57 = vld [vmem:[#allocation12_spill] sm:$0xff] }
 0x24b   : > { %v4307_v2 = vsel %vm4254_vm7, %v12217_v3, %v12216_v45  ;;  %v4299_v34 = vsel %vm4254_vm7, %v12220_v44, %v4298_v46  ;;  %v12221_v21 = vmov %v12214_v25  ;;  %v4313_v30 = vrot.slane %v10772_v38, 2  ;;  %v8656_v38 = vld [vmem:[%s11883_s3 + $0x170] sm:$0xff]   ;;  %8186 = vmatmul.mubr.bf16.vlgmr.msra.gmra.mxu0 %v10462_v10 }
 0x24c   : > { %v4312_v52 = vsel %vm4254_vm7, %v12219_v47, %v12218_v42  ;;  %v4304_v23 = vsel %vm4254_vm7, %v12221_v21, %v4303_v50  ;;  %v12222_v18 = vrot.slane %v10756_v36, 2  ;;  %v12223_v12 = vrot.slane %v10765_v62, 2  ;;  %v11024_v3 = vld [vmem:[#allocation2 + $0x190] sm:$0x3]  ;;  %8266 = vmatpush3.bf16.msra.mxu0 %v10701_v40 }
 0x24d   : > { %v10976_v1 = vpack.c.bf16 %v4299_v34, %v4297_v56  ;;  %v10978_v63 = vpack.c.bf16 %v4304_v23, %v4302_v26  ;;  %v12224_v27 = vmov %v12216_v45  ;;  %v4318_v49 = vrot.slane %v10774_v13, 2  ;;  %v11000_v13 = vld [vmem:[#allocation2 + $0x188] sm:$0xff]  ;;  %8267 = vmatprep.subr.bf16.mxu0 %v8656_v38  ;;  %v8655_v34 = vld [vmem:[%s11883_s3 + $0x130] sm:$0xff]  }
 0x24e   : > { %v4317_v60 = vsel %vm4254_vm7, %v12223_v12, %v12222_v18  ;;  %v4309_v39 = vsel %vm4254_vm7, %v12224_v27, %v4308_v61  ;;  %v12225_v62 = vmov %v12218_v42  ;;  %v12226_v41 = vrot.slane %v10814_v9, 2  ;;  %v8658_v9 = vld [vmem:[%s11883_s3 + $0x168] sm:$0xff]   ;;  %v8659_v27 = vld [vmem:[%s11883_s3 + $0x120] sm:$0xff]  }
 0x24f   : > { %v10987_v4 = vpack.c.bf16 %v4309_v39, %v4307_v2  ;;  %v4314_v51 = vsel %vm4254_vm7, %v12225_v62, %v4313_v30  ;;  %v12227_v35 = vrot.slane %v10783_v48, 2  ;;  %v4323_v0 = vrot.slane %v10818_v15, 2  ;;  %v12238_v12 = vld [vmem:[#allocation54_spill] sm:$0xff]  ;;  %v8664_v39 = vld [vmem:[%s11883_s3 + $0x150] sm:$0xff]  }
 0x250   : > { %v11003_v56 = vpack.c.bf16 %v4314_v51, %v4312_v52  ;;  %v12228_v53 = vmov %v12222_v18  ;;  %v12229_v37 = vrot.slane %v10796_v16, 2  ;;  %v12230_v48 = vrot.slane %v10794_v32, 2  ;;  %v12234_v32 = vld [vmem:[#allocation20_spill] sm:$0xff]  ;;  %8268 = vmatpush3.bf16.msra.mxu0 %v8656_v38  ;;  %v8657_v18 = vld [vmem:[%s11883_s3 + $0x128] sm:$0xff]   ;;  %v12240_v62 = vld [vmem:[#allocation43_spill] sm:$0xff] }
 0x251   : > { %v4322_v33 = vsel %vm4254_vm7, %v12227_v35, %v12226_v41  ;;  %v4319_v7 = vsel %vm4254_vm7, %v12228_v53, %v4318_v49  ;;  %v4328_v15 = vrot.slane %v10808_v31, 2  ;;  %v4330_v25 = vrot.slane %v10839_v55, 2  ;;  %8189 = vmatprep.mubr.bf16.mxu0 %v12234_v32  ;;  %8269 = vmatprep.subr.bf16.mxu0 %v8658_v9  ;;  %v12239_v49 = vld [vmem:[#allocation18_spill] sm:$0xff]  ;;  %v8661_v38 = vld [vmem:[%s11883_s3 + $0x118] sm:$0xff]   ;;  %v8668_v35 = vld [vmem:[%s11883_s3 + $0x140] sm:$0xff]  }
 0x252   : > { %v4327_v46 = vsel %vm4254_vm7, %v12230_v48, %v12229_v37  ;;  %v12232_v26 = vpack.c.bf16 %v10315_v54, %v12231_v57  ;;  %v11019_v50 = vpack.c.bf16 %v4319_v7, %v4317_v60  ;;  %v12233_v36 = vmov %v12226_v41  ;;  %v8662_v60 = vld [vmem:[%s11883_s3 + $0x158] sm:$0xff]   ;;  %v8666_v51 = vld [vmem:[%s11883_s3 + $0x148] sm:$0xff]   ;;  %v8663_v41 = vld [vmem:[%s11883_s3 + $0x110] sm:$0xff]  }
 0x253   : > { %v4324_v45 = vsel %vm4254_vm7, %v12233_v36, %v4323_v0  ;;  %v12235_v55 = vmov %v12229_v37  ;;  %v4903_v54 = vrot.slane %v10998_v28, 1  ;;  %v4904_v61 = vrot.slane %v11000_v13, 1  ;;  %v8665_v0 = vld [vmem:[%s11883_s3 + $0x108] sm:$0xff]   ;;  %v12242_v53 = vld [vmem:[#allocation25_spill] sm:$0xff]  ;;  %v8670_v7 = vld [vmem:[%s11883_s3 + $0x1f8] sm:$0xff]  }
 0x254   : > { %8137 = vmatprep.mubr.bf16.mxu1 %v12232_v26  ;;  %v11028_v31 = vpack.c.bf16 %v4324_v45, %v4322_v33  ;;  %v4329_v2 = vsel %vm4254_vm7, %v12235_v55, %v4328_v15  ;;  %v4332_v40 = vsel %vm4254_vm7, %v4330_v25, %v4331_v17  ;;  %v4333_v47 = vrot.slane %v10887_v43, 2  ;;  %v12236_v43 = vld [vmem:[#allocation58_spill] sm:$0xff]  ;;  %8270 = vmatpush3.bf16.msra.mxu0 %v8658_v9  ;;  %v12241_v33 = vld [vmem:[#allocation23_spill] sm:$0xff]  ;;  %v8667_v37 = vld [vmem:[%s11883_s3 + $0x100] sm:$0xff]  }
 0x255   : > { %v11038_v42 = vpack.c.bf16 %v4329_v2, %v4327_v46  ;;  %v4905_v16 = vsel %vm3690_vm6, %v4903_v54, %v4904_v61  ;;  %v4906_v52 = vrot.slane %v11024_v3, 1  ;;  %8138 = vmatmul.mubr.bf16.vlgmr.msra.gmra.mxu1 %v10863_v8  ;;  %8271 = vmatprep.subr.bf16.mxu0 %v8660_v14  ;;  %v12243_v48 = vld [vmem:[#allocation45_spill] sm:$0xff]  ;;  %v8669_v46 = vld [vmem:[%s11883_s3 + $0x1b8] sm:$0xff]   ;;  %v12246_v57 = vld [vmem:[#allocation55_spill] sm:$0xff]  ;;  %v11124_v36 = vpack.c.bf16 %v11000_v13, %v10998_v28 }
 0x256   : > { %v4334_v44 = vsel %vm4254_vm7, %v4331_v17, %v4333_v47  ;;  %8141 = vmatprep.mubr.bf16.mxu1 %v10865_v22  ;;  %8218 = vmatpush3.bf16.msra.mxu1 %v12236_v43  ;;  %v12237_v17 = vld [vmem:[#allocation28_spill] sm:$0xff]  ;;  %v12247_v26 = vld [vmem:[#allocation49_spill] sm:$0xff]  ;;  %v8672_v45 = vld [vmem:[%s11883_s3 + $0x1f0] sm:$0xff]  }
 0x257   : > { %v11052_v21 = vpack.c.bf16 %v4334_v44, %v4332_v40  ;;  %v4907_v23 = vsel %vm3690_vm6, %v4904_v61, %v4906_v52  ;;  %8190 = vmatmul.mubr.bf16.gmra.mxu0 %v12237_v17  ;;  %8219 = vmatprep.subr.bf16.mxu1 %v8655_v34  ;;  %v12244_v15 = vld [vmem:[#allocation60_spill] sm:$0xff]  ;;  %v12248_v55 = vld [vmem:[#allocation15_spill] sm:$0xff]  ;;  %v8674_v2 = vld [vmem:[%s11883_s3 + $0x1e8] sm:$0xff]  }
 0x258   : > { %v11055_v30 = vpack.c.bf16 %v4907_v23, %v4905_v16  ;;  %8193 = vmatprep.mubr.bf16.mxu0 %v12238_v12  ;;  %8272 = vmatpush3.bf16.msra.mxu0 %v8660_v14  ;;  %v12245_v25 = vld [vmem:[#allocation48_spill] sm:$0xff]  ;;  %v8676_v61 = vld [vmem:[%s11883_s3 + $0x1e0] sm:$0xff]   ;;  %v12250_v9 = vld [vmem:[#allocation50_spill] sm:$0xff] }
 0x259   : > { %8273 = vmatprep.subr.bf16.mxu0 %v8662_v60  ;;  %v12249_v54 = vld [vmem:[#allocation24_spill] sm:$0xff]  ;;  %v8673_v40 = vld [vmem:[%s11883_s3 + $0x1a8] sm:$0xff]   ;;  %v8675_v16 = vld [vmem:[%s11883_s3 + $0x1a0] sm:$0xff]  }
 0x25a   : > { %8220 = vmatpush3.bf16.msra.mxu1 %v8655_v34  ;;  %v8678_v47 = vld [vmem:[%s11883_s3 + $0x1d8] sm:$0xff]   ;;  %v8680_v44 = vld [vmem:[%s11883_s3 + $0x1d0] sm:$0xff]   ;;  %v12252_v34 = vld [vmem:[#allocation41_spill] sm:$0xff] }
 0x25b   : > { %8221 = vmatprep.subr.bf16.mxu1 %v8657_v18  ;;  %v12251_v52 = vld [vmem:[#allocation52_spill] sm:$0xff]  ;;  %v8682_v14 = vld [vmem:[%s11883_s3 + $0x1c8] sm:$0xff]   ;;  %v8679_v43 = vld [vmem:[%s11883_s3 + $0x190] sm:$0xff]  }
 0x25c   : > { %8274 = vmatpush3.bf16.msra.mxu0 %v8662_v60  ;;  %v8677_v23 = vld [vmem:[%s11883_s3 + $0x198] sm:$0xff]   ;;  %v8684_v60 = vld [vmem:[%s11883_s3 + $0x1c0] sm:$0xff]  }
 0x25d   : > { %8142 = vmatmul.mubr.bf16.gmra.mxu1 %v10911_v6  ;;  %8275 = vmatprep.subr.bf16.mxu0 %v8664_v39 }
 0x25e   : > { %8145 = vmatprep.mubr.bf16.mxu1 %v10926_v29  ;;  %8222 = vmatpush3.bf16.msra.mxu1 %v8657_v18  ;;  %v12253_v18 = vld [vmem:[#allocation42_spill] sm:$0xff] }
 0x25f   : > { %8194 = vmatmul.mubr.bf16.gmra.mxu0 %v12239_v49  ;;  %8223 = vmatprep.subr.bf16.mxu1 %v8659_v27 }
 0x260   : > { %8197 = vmatprep.mubr.bf16.mxu0 %v12240_v62  ;;  %8276 = vmatpush3.bf16.msra.mxu0 %v8664_v39  ;;  %v8681_v39 = vld [vmem:[%s11883_s3 + $0x188] sm:$0xff]  }
 0x261   : > { %8277 = vmatprep.subr.bf16.mxu0 %v8666_v51 }
 0x262   : > { %8224 = vmatpush3.bf16.msra.mxu1 %v8659_v27  ;;  %v12254_v27 = vld [vmem:[#allocation56_spill] sm:$0xff] }
 0x263   : > { %8225 = vmatprep.subr.bf16.mxu1 %v8661_v38 }
 0x264   : > { %8278 = vmatpush3.bf16.msra.mxu0 %v8666_v51  ;;  %v8683_v51 = vld [vmem:[%s11883_s3 + $0x180] sm:$0xff]  }
 0x265   : > { %8146 = vmatmul.mubr.bf16.gmra.mxu1 %v10932_v5  ;;  %8279 = vmatprep.subr.bf16.mxu0 %v8668_v35 }
 0x266   : > { %8149 = vmatprep.mubr.bf16.mxu1 %v10934_v11  ;;  %8226 = vmatpush3.bf16.msra.mxu1 %v8661_v38  ;;  %v8686_v38 = vld [vmem:[%s11884_s4 + $0x38] sm:$0xff]  }
 0x267   : > { %8198 = vmatmul.mubr.bf16.gmra.mxu0 %v12241_v33  ;;  %8227 = vmatprep.subr.bf16.mxu1 %v8663_v41 }
 0x268   : > { %8201 = vmatprep.mubr.bf16.mxu0 %v12242_v53  ;;  %8280 = vmatpush3.bf16.msra.mxu0 %v8668_v35  ;;  %v12256_v35 = vld [vmem:[#allocation46_spill] sm:$0xff] }
 0x269   : > { %8361 = vmatprep.subr.bf16.mxu0 %v8670_v7 }
 0x26a   : > { %8228 = vmatpush3.bf16.msra.mxu1 %v8663_v41  ;;  %v12255_v41 = vld [vmem:[#allocation44_spill] sm:$0xff] }
 0x26b   : > { %8229 = vmatprep.subr.bf16.mxu1 %v8665_v0 }
 0x26d   : > { %8150 = vmatmul.mubr.bf16.gmra.mxu1 %v10951_v19 }
 0x26e   : > { %8153 = vmatprep.mubr.bf16.mxu1 %v10976_v1  ;;  %8230 = vmatpush3.bf16.msra.mxu1 %v8665_v0  ;;  %v8685_v0 = vld [vmem:[%s11883_s3 + $0x238] sm:$0xff]  }
 0x26f   : > { %8202 = vmatmul.mubr.bf16.gmra.mxu0 %v12243_v48  ;;  %8231 = vmatprep.subr.bf16.mxu1 %v8667_v37 }
 0x270   : > { %8205 = vmatprep.mubr.bf16.mxu0 %v12244_v15 }
 0x272   : > { %8232 = vmatpush3.bf16.msra.mxu1 %v8667_v37  ;;  %v12258_v37 = vld [vmem:[#allocation51_spill] sm:$0xff] }
 0x273   : > { %8313 = vmatprep.subr.bf16.mxu1 %v8669_v46 }
 0x275   : > { %8154 = vmatmul.mubr.bf16.gmra.mxu1 %v10978_v63 }
 0x276   : > { %8157 = vmatprep.mubr.bf16.mxu1 %v10987_v4 }
 0x277   : > { %8206 = vmatmul.mubr.bf16.gmra.mxu0 %v12245_v25 }
 0x278   : > { %8209 = vmatprep.mubr.bf16.mxu0 %v12246_v57 }
 0x27d   : > { %8158 = vmatmul.mubr.bf16.gmra.mxu1 %v11003_v56 }
 0x27e   : > { %8161 = vmatprep.mubr.bf16.mxu1 %v11019_v50 }
 0x27f   : > { %8210 = vmatmul.mubr.bf16.gmra.mxu0 %v12247_v26 }
 0x280   : > { %8213 = vmatprep.mubr.bf16.mxu0 %v10905_v20 }
 0x285   : > { %8162 = vmatmul.mubr.bf16.gmra.mxu1 %v11028_v31 }
 0x286   : > { %8165 = vmatprep.mubr.bf16.mxu1 %v11038_v42 }
 0x287   : > { %8214 = vmatmul.mubr.bf16.gmra.mxu0 %v11124_v36 }
 0x288   : > { %8281 = vmatprep.mubr.bf16.mxu0 %v10863_v8  ;;  %v8671_v8 = vld [vmem:[%s11883_s3 + $0x1b0] sm:$0xff]  }
 0x28d   : > { %8166 = vmatmul.mubr.bf16.gmra.mxu1 %v11052_v21 }
 0x28e   : > { %8233 = vmatprep.mubr.bf16.mxu1 %v12248_v55  ;;  %v5172_v55 = vrot.slane %v11024_v3, 2 }
 0x28f   : > { %8282 = vmatmul.mubr.bf16.vlgmr.msra.gmra.mxu0 %v10865_v22 }
 0x290   : > { %8285 = vmatprep.mubr.bf16.mxu0 %v10911_v6  ;;  %8362 = vmatpush3.bf16.msra.mxu0 %v8670_v7  ;;  %v12257_v7 = vld [vmem:[#allocation47_spill] sm:$0xff] }
 0x291   : > { %8363 = vmatprep.subr.bf16.mxu0 %v8672_v45 }
 0x294   : > { %8364 = vmatpush3.bf16.msra.mxu0 %v8672_v45  ;;  %v5170_v45 = vrot.slane %v11000_v13, 2 }
 0x295   : > { %8234 = vmatmul.mubr.bf16.vlgmr.msra.gmra.mxu1 %v12249_v54  ;;  %8365 = vmatprep.subr.bf16.mxu0 %v8674_v2 }
 0x296   : > { %8237 = vmatprep.mubr.bf16.mxu1 %v12250_v9  ;;  %8314 = vmatpush3.bf16.msra.mxu1 %v8669_v46  ;;  %v12259_v46 = vld [vmem:[#allocation53_spill] sm:$0xff] }
 0x297   : > { %8286 = vmatmul.mubr.bf16.gmra.mxu0 %v10926_v29  ;;  %8315 = vmatprep.subr.bf16.mxu1 %v8671_v8 }
 0x298   : > { %8289 = vmatprep.mubr.bf16.mxu0 %v10932_v5  ;;  %8366 = vmatpush3.bf16.msra.mxu0 %v8674_v2  ;;  %v5169_v2 = vrot.slane %v10998_v28, 2  ;;  %v8688_v28 = vld [vmem:[%s11884_s4 + $0x30] sm:$0xff]  }
 0x299   : > { %8367 = vmatprep.subr.bf16.mxu0 %v8676_v61 }
 0x29a   : > { %8316 = vmatpush3.bf16.msra.mxu1 %v8671_v8  ;;  %v5171_v8 = vsel %vm4254_vm7, %v5169_v2, %v5170_v45 }
 0x29b   : > { %8317 = vmatprep.subr.bf16.mxu1 %v8673_v40 }
 0x29c   : > { %8368 = vmatpush3.bf16.msra.mxu0 %v8676_v61  ;;  %v5173_v61 = vsel %vm4254_vm7, %v5170_v45, %v5172_v55 }
 0x29d   : > { %8238 = vmatmul.mubr.bf16.gmra.mxu1 %v12251_v52  ;;  %8369 = vmatprep.subr.bf16.mxu0 %v8678_v47 }
 0x29e   : > { %8241 = vmatprep.mubr.bf16.mxu1 %v12252_v34  ;;  %8318 = vmatpush3.bf16.msra.mxu1 %v8673_v40  ;;  %v11211_v40 = vpack.c.bf16 %v5173_v61, %v5171_v8  ;;  %v8696_v8 = vld [vmem:[%s11884_s4 + $0x10] sm:$0xff]  }
 0x29f   : > { %8290 = vmatmul.mubr.bf16.gmra.mxu0 %v10934_v11  ;;  %8319 = vmatprep.subr.bf16.mxu1 %v8675_v16 }
 0x2a0   : > { %8293 = vmatprep.mubr.bf16.mxu0 %v10951_v19  ;;  %8370 = vmatpush3.bf16.msra.mxu0 %v8678_v47 }
 0x2a1   : > { %8371 = vmatprep.subr.bf16.mxu0 %v8680_v44 }
 0x2a2   : > { %8320 = vmatpush3.bf16.msra.mxu1 %v8675_v16 }
 0x2a3   : > { %8321 = vmatprep.subr.bf16.mxu1 %v8677_v23 }
 0x2a4   : > { %8372 = vmatpush3.bf16.msra.mxu0 %v8680_v44 }
 0x2a5   : > { %8242 = vmatmul.mubr.bf16.gmra.mxu1 %v12253_v18  ;;  %8373 = vmatprep.subr.bf16.mxu0 %v8682_v14 }
 0x2a6   : > { %8245 = vmatprep.mubr.bf16.mxu1 %v12254_v27  ;;  %8322 = vmatpush3.bf16.msra.mxu1 %v8677_v23 }
 0x2a7   : > { %8294 = vmatmul.mubr.bf16.gmra.mxu0 %v10976_v1  ;;  %8323 = vmatprep.subr.bf16.mxu1 %v8679_v43 }
 0x2a8   : > { %8297 = vmatprep.mubr.bf16.mxu0 %v10978_v63  ;;  %8374 = vmatpush3.bf16.msra.mxu0 %v8682_v14 }
 0x2a9   : > { %8375 = vmatprep.subr.bf16.mxu0 %v8684_v60 }
 0x2aa   : > { %8324 = vmatpush3.bf16.msra.mxu1 %v8679_v43 }
 0x2ab   : > { %8325 = vmatprep.subr.bf16.mxu1 %v8681_v39 }
 0x2ac   : > { %8376 = vmatpush3.bf16.msra.mxu0 %v8684_v60 }
 0x2ad   : > { %8246 = vmatmul.mubr.bf16.gmra.mxu1 %v12255_v41  ;;  %8457 = vmatprep.subr.bf16.mxu0 %v8686_v38 }
 0x2ae   : > { %8249 = vmatprep.mubr.bf16.mxu1 %v12256_v35  ;;  %8326 = vmatpush3.bf16.msra.mxu1 %v8681_v39 }
 0x2af   : > { %8298 = vmatmul.mubr.bf16.gmra.mxu0 %v10987_v4  ;;  %8327 = vmatprep.subr.bf16.mxu1 %v8683_v51 }
 0x2b0   : > { %8301 = vmatprep.mubr.bf16.mxu0 %v11003_v56 }
 0x2b2   : > { %8328 = vmatpush3.bf16.msra.mxu1 %v8683_v51 }
 0x2b3   : > { %8409 = vmatprep.subr.bf16.mxu1 %v8685_v0 }
 0x2b5   : > { %8250 = vmatmul.mubr.bf16.gmra.mxu1 %v12257_v7 }
 0x2b6   : > { %8253 = vmatprep.mubr.bf16.mxu1 %v12258_v37 }
 0x2b7   : > { %8302 = vmatmul.mubr.bf16.gmra.mxu0 %v11019_v50 }
 0x2b8   : > { %8305 = vmatprep.mubr.bf16.mxu0 %v11028_v31 }
 0x2bd   : > { %8254 = vmatmul.mubr.bf16.gmra.mxu1 %v12259_v46 }
 0x2be   : > { %8257 = vmatprep.mubr.bf16.mxu1 %v10853_v59 }
 0x2bf   : > { %8306 = vmatmul.mubr.bf16.gmra.mxu0 %v11038_v42 }
 0x2c0   : > { %8309 = vmatprep.mubr.bf16.mxu0 %v11052_v21 }
 0x2c5   : > { %8258 = vmatmul.mubr.bf16.gmra.mxu1 %v10855_v24 }
 0x2c6   : > { %8261 = vmatprep.mubr.bf16.mxu1 %v10930_v58 }
 0x2c7   : > { %8310 = vmatmul.mubr.bf16.gmra.mxu0 %v11211_v40 }
 0x2c8   : > { %8377 = vmatprep.mubr.bf16.mxu0 %v12249_v54  ;;  %v8690_v54 = vld [vmem:[%s11884_s4 + $0x28] sm:$0xff]  }
 0x2c9   : > { %v8091_v13 = vpop.f32.mrf.mxu0 }
 0x2cb   : > { %v4127_v3 = vpop.f32.mrf.mxu0 }
 0x2cd   : > { %8262 = vmatmul.mubr.bf16.gmra.mxu1 %v11055_v30  ;;  %v8043_v47 = vpop.f32.mrf.mxu1  ;;  %v8092_v16 = vpop.f32.mrf.mxu0 }
 0x2ce   : > { %8329 = vmatprep.mubr.bf16.mxu1 %v10462_v10  ;;  %v11226_v44 = vadd.f32 %v8091_v13, %v8043_v47  ;;  %v8687_v10 = vld [vmem:[%s11883_s3 + $0x230] sm:$0xff]  }
 0x2cf   : > { %8378 = vmatmul.mubr.bf16.vlgmr.msra.gmra.mxu0 %v12250_v9  ;;  %v3918_v23 = vpop.f32.mrf.mxu1  ;;  %v4130_v14 = vpop.f32.mrf.mxu0 }
 0x2d0   : > { %8381 = vmatprep.mubr.bf16.mxu0 %v12251_v52  ;;  %8458 = vmatpush3.bf16.msra.mxu0 %v8686_v38  ;;  %v11232_v9 = vadd.f32 %v4127_v3, %v3918_v23  ;;  %v8692_v52 = vld [vmem:[%s11884_s4 + $0x20] sm:$0xff]   ;;  %v8693_v3 = vld [vmem:[%s11883_s3 + $0x218] sm:$0xff]   ;;  %v8695_v23 = vld [vmem:[%s11883_s3 + $0x210] sm:$0xff]  }
 0x2d1   : > { %8459 = vmatprep.subr.bf16.mxu0 %v8688_v28  ;;  %v8044_v43 = vpop.f32.mrf.mxu1  ;;  %v8095_v60 = vpop.f32.mrf.mxu0 }
 0x2d2   : > { %v11238_v39 = vadd.f32 %v8092_v16, %v8044_v43  ;;  %v8700_v43 = vld [vmem:[%s11884_s4] sm:$0xff]  }
 0x2d3   : > { %v3921_v38 = vpop.f32.mrf.mxu1  ;;  %v4143_v51 = vpop.f32.mrf.mxu0 }
 0x2d4   : > { %8460 = vmatpush3.bf16.msra.mxu0 %v8688_v28  ;;  %v11245_v45 = vadd.f32 %v4130_v14, %v3921_v38 }
 0x2d5   : > { %8330 = vmatmul.mubr.bf16.vlgmr.msra.gmra.mxu1 %v12234_v32  ;;  %8461 = vmatprep.subr.bf16.mxu0 %v8690_v54  ;;  %v8689_v32 = vld [vmem:[%s11883_s3 + $0x228] sm:$0xff]  }
 0x2d6   : > { %8333 = vmatprep.mubr.bf16.mxu1 %v12237_v17  ;;  %8410 = vmatpush3.bf16.msra.mxu1 %v8685_v0  ;;  %v8694_v17 = vld [vmem:[%s11884_s4 + $0x18] sm:$0xff]   ;;  %v8096_v0 = vpop.f32.mrf.mxu0 }
 0x2d7   : > { %8382 = vmatmul.mubr.bf16.gmra.mxu0 %v12252_v34  ;;  %8411 = vmatprep.subr.bf16.mxu1 %v8687_v10  ;;  %v8691_v34 = vld [vmem:[%s11883_s3 + $0x220] sm:$0xff]   ;;  %v8047_v55 = vpop.f32.mrf.mxu1 }
 0x2d8   : > { %8385 = vmatprep.mubr.bf16.mxu0 %v12253_v18  ;;  %8462 = vmatpush3.bf16.msra.mxu0 %v8690_v54  ;;  %v4146_v2 = vpop.f32.mrf.mxu0  ;;  %v11253_v18 = vadd.f32 %v8095_v60, %v8047_v55 }
 0x2d9   : > { %8463 = vmatprep.subr.bf16.mxu0 %v8692_v52  ;;  %v3934_v61 = vpop.f32.mrf.mxu1 }
 0x2da   : > { %8412 = vmatpush3.bf16.msra.mxu1 %v8687_v10  ;;  %v8099_v28 = vpop.f32.mrf.mxu0  ;;  %v11260_v13 = vadd.f32 %v4143_v51, %v3934_v61  ;;  %v8697_v51 = vld [vmem:[%s11883_s3 + $0x208] sm:$0xff]  }
 0x2db   : > { %8413 = vmatprep.subr.bf16.mxu1 %v8689_v32 }
 0x2dc   : > { %8464 = vmatpush3.bf16.msra.mxu0 %v8692_v52  ;;  %v4159_v54 = vpop.f32.mrf.mxu0 }
 0x2dd   : > { %8334 = vmatmul.mubr.bf16.gmra.mxu1 %v12238_v12  ;;  %8465 = vmatprep.subr.bf16.mxu0 %v8694_v17  ;;  %v8048_v12 = vpop.f32.mrf.mxu1 }
 0x2de   : > { %8337 = vmatprep.mubr.bf16.mxu1 %v12239_v49  ;;  %8414 = vmatpush3.bf16.msra.mxu1 %v8689_v32  ;;  %v11267_v47 = vadd.f32 %v8096_v0, %v8048_v12  ;;  %v8698_v49 = vld [vmem:[%s11884_s4 + $0x8] sm:$0xff]   ;;  %v8100_v10 = vpop.f32.mrf.mxu0 }
 0x2df   : > { %8386 = vmatmul.mubr.bf16.gmra.mxu0 %v12254_v27  ;;  %8415 = vmatprep.subr.bf16.mxu1 %v8691_v34  ;;  %v3937_v16 = vpop.f32.mrf.mxu1 }
 0x2e0   : > { %8389 = vmatprep.mubr.bf16.mxu0 %v12255_v41  ;;  %8466 = vmatpush3.bf16.msra.mxu0 %v8694_v17  ;;  %v11272_v27 = vadd.f32 %v4146_v2, %v3937_v16  ;;  %v4162_v14 = vpop.f32.mrf.mxu0 }
 0x2e1   : > { %8467 = vmatprep.subr.bf16.mxu0 %v8696_v8  ;;  %v8051_v41 = vpop.f32.mrf.mxu1 }
 0x2e2   : > { %8416 = vmatpush3.bf16.msra.mxu1 %v8691_v34  ;;  %v11277_v52 = vadd.f32 %v8099_v28, %v8051_v41 }
 0x2e3   : > { %8417 = vmatprep.subr.bf16.mxu1 %v8693_v3  ;;  %v3950_v60 = vpop.f32.mrf.mxu1  ;;  %v8103_v32 = vpop.f32.mrf.mxu0 }
 0x2e4   : > { %8468 = vmatpush3.bf16.msra.mxu0 %v8696_v8  ;;  %v11284_v38 = vadd.f32 %v4159_v54, %v3950_v60 }
 0x2e5   : > { %8338 = vmatmul.mubr.bf16.gmra.mxu1 %v12240_v62  ;;  %8469 = vmatprep.subr.bf16.mxu0 %v8698_v49  ;;  %v8052_v62 = vpop.f32.mrf.mxu1  ;;  %v4175_v17 = vpop.f32.mrf.mxu0 }
 0x2e6   : > { %8341 = vmatprep.mubr.bf16.mxu1 %v12241_v33  ;;  %8418 = vmatpush3.bf16.msra.mxu1 %v8693_v3  ;;  %v11291_v0 = vadd.f32 %v8100_v10, %v8052_v62 }
 0x2e7   : > { %8390 = vmatmul.mubr.bf16.gmra.mxu0 %v12256_v35  ;;  %8419 = vmatprep.subr.bf16.mxu1 %v8695_v23  ;;  %v3953_v33 = vpop.f32.mrf.mxu1  ;;  %v8104_v34 = vpop.f32.mrf.mxu0  ;;  %v8699_v35 = vld [vmem:[%s11883_s3 + $0x200] sm:$0xff]  }
 0x2e8   : > { %8393 = vmatprep.mubr.bf16.mxu0 %v12257_v7  ;;  %8470 = vmatpush3.bf16.msra.mxu0 %v8698_v49  ;;  %v11293_v55 = vadd.f32 %v4162_v14, %v3953_v33 }
 0x2e9   : > { %8471 = vmatprep.subr.bf16.mxu0 %v8700_v43  ;;  %v4178_v2 = vpop.f32.mrf.mxu0  ;;  %v8055_v8 = vpop.f32.mrf.mxu1 }
 0x2ea   : > { %8420 = vmatpush3.bf16.msra.mxu1 %v8695_v23  ;;  %v11299_v7 = vadd.f32 %v8103_v32, %v8055_v8  ;;  %v11318_v32 = vld [vmem:[#allocation2 + $0x1a8] sm:$0x3] }
 0x2eb   : > { %8421 = vmatprep.subr.bf16.mxu1 %v8697_v51  ;;  %v8107_v61 = vpop.f32.mrf.mxu0  ;;  %v3966_v28 = vpop.f32.mrf.mxu1 }
 0x2ec   : > { %8472 = vmatpush3.bf16.msra.mxu0 %v8700_v43  ;;  %v11303_v3 = vadd.f32 %v4175_v17, %v3966_v28 }
 0x2ed   : > { %8342 = vmatmul.mubr.bf16.gmra.mxu1 %v12242_v53  ;;  %v4191_v12 = vpop.f32.mrf.mxu0  ;;  %v8056_v54 = vpop.f32.mrf.mxu1 }
 0x2ee   : > { %8345 = vmatprep.mubr.bf16.mxu1 %v12243_v48  ;;  %8422 = vmatpush3.bf16.msra.mxu1 %v8697_v51  ;;  %v11306_v49 = vadd.f32 %v8104_v34, %v8056_v54 }
 0x2ef   : > { %8394 = vmatmul.mubr.bf16.gmra.mxu0 %v12258_v37  ;;  %8423 = vmatprep.subr.bf16.mxu1 %v8699_v35  ;;  %v8108_v16 = vpop.f32.mrf.mxu0  ;;  %v3969_v53 = vpop.f32.mrf.mxu1 }
 0x2f0   : > { %8397 = vmatprep.mubr.bf16.mxu0 %v12259_v46  ;;  %v11308_v10 = vadd.f32 %v4178_v2, %v3969_v53 }
 0x2f1   : > { %v4194_v48 = vpop.f32.mrf.mxu0  ;;  %v8059_v23 = vpop.f32.mrf.mxu1 }
 0x2f2   : > { %8424 = vmatpush3.bf16.msra.mxu1 %v8699_v35  ;;  %v11311_v41 = vadd.f32 %v8107_v61, %v8059_v23 }
 0x2f3   : > { %v8111_v37 = vpop.f32.mrf.mxu0  ;;  %v3982_v14 = vpop.f32.mrf.mxu1 }
 0x2f4   : > { %v11315_v46 = vadd.f32 %v4191_v12, %v3982_v14 }
 0x2f5   : > { %8346 = vmatmul.mubr.bf16.gmra.mxu1 %v12244_v15  ;;  %v4207_v43 = vpop.f32.mrf.mxu0  ;;  %v8060_v60 = vpop.f32.mrf.mxu1 }
 0x2f6   : > { %8349 = vmatprep.mubr.bf16.mxu1 %v12245_v25  ;;  %v11320_v51 = vadd.f32 %v8108_v16, %v8060_v60  ;;  %v11324_v25 = vld [vmem:[#allocation2] sm:$0xff] }
 0x2f7   : > { %8398 = vmatmul.mubr.bf16.gmra.mxu0 %v10853_v59  ;;  %v8112_v62 = vpop.f32.mrf.mxu0  ;;  %v3985_v15 = vpop.f32.mrf.mxu1  ;;  %v5697_v34 = vrot.slane %v11324_v25, 1  ;;  %v5700_v59 = vrot.slane %v11318_v32, 1 }
 0x2f8   : > { %8401 = vmatprep.mubr.bf16.mxu0 %v10855_v24  ;;  %v11322_v17 = vadd.f32 %v4194_v48, %v3985_v15 }
 0x2f9   : > { %v4210_v33 = vpop.f32.mrf.mxu0  ;;  %v8063_v35 = vpop.f32.mrf.mxu1  ;;  %v5701_v12 = vsel %vm3690_vm6, %v5697_v34, %v5700_v59 }
 0x2fa   : > { %v11329_v24 = vadd.f32 %v8111_v37, %v8063_v35  ;;  %v5704_v48 = vpack.c.bf16 %v5701_v12, %v5697_v34 }
 0x2fb   : > { %v8115_v2 = vpop.f32.mrf.mxu0  ;;  %v3998_v8 = vpop.f32.mrf.mxu1 }
 0x2fc   : > { %v11333_v61 = vadd.f32 %v4207_v43, %v3998_v8 }
 0x2fd   : > { %8350 = vmatmul.mubr.bf16.gmra.mxu1 %v12246_v57  ;;  %v4223_v28 = vpop.f32.mrf.mxu0  ;;  %v8064_v54 = vpop.f32.mrf.mxu1 }
 0x2fe   : > { %8353 = vmatprep.mubr.bf16.mxu1 %v12247_v26  ;;  %v11337_v16 = vadd.f32 %v8112_v62, %v8064_v54  ;;  %v12260_v62 = vld [vmem:[#allocation4_spill] sm:$0xff]  ;;  %v12261_v54 = vld [vmem:[#allocation6_spill] sm:$0xff] }
 0x2ff   : > { %8402 = vmatmul.mubr.bf16.gmra.mxu0 %v10930_v58  ;;  %v8116_v53 = vpop.f32.mrf.mxu0  ;;  %v4001_v57 = vpop.f32.mrf.mxu1 }
 0x300   : > { %8405 = vmatprep.mubr.bf16.mxu0 %v11055_v30  ;;  %v11339_v23 = vadd.f32 %v4210_v33, %v4001_v57  ;;  %v5435_v33 = vpack.c.bf16 %v11324_v25, %v11324_v25 }
 0x301   : > { %v4226_v26 = vpop.f32.mrf.mxu0  ;;  %v8067_v37 = vpop.f32.mrf.mxu1 }
 0x302   : > { %v11342_v58 = vadd.f32 %v8115_v2, %v8067_v37 }
 0x303   : > { %v8119_v30 = vpop.f32.mrf.mxu0  ;;  %v4014_v14 = vpop.f32.mrf.mxu1 }
 0x304   : > { %v11345_v43 = vadd.f32 %v4223_v28, %v4014_v14 }
 0x305   : > { %8354 = vmatmul.mubr.bf16.gmra.mxu1 %v10905_v20  ;;  %v4239_v60 = vpop.f32.mrf.mxu0  ;;  %v8068_v15 = vpop.f32.mrf.mxu1 }
 0x306   : > { %8357 = vmatprep.mubr.bf16.mxu1 %v11124_v36  ;;  %v11350_v34 = vadd.f32 %v8116_v53, %v8068_v15  ;;  %v12262_v53 = vld [vmem:[#allocation8_spill] sm:$0xff] }
 0x307   : > { %8406 = vmatmul.mubr.bf16.gmra.mxu0 %v5704_v48  ;;  %v8120_v59 = vpop.f32.mrf.mxu0  ;;  %v4017_v20 = vpop.f32.mrf.mxu1 }
 0x308   : > { %8473 = vmatprep.mubr.bf16.mxu0 %v12260_v62  ;;  %v11352_v35 = vadd.f32 %v4226_v26, %v4017_v20 }
 0x309   : > { %v4242_v2 = vpop.f32.mrf.mxu0  ;;  %v8071_v36 = vpop.f32.mrf.mxu1 }
 0x30a   : > { %v11354_v8 = vadd.f32 %v8119_v30, %v8071_v36  ;;  %v12264_v36 = vld [vmem:[#allocation10_spill] sm:$0xff] }
 0x30b   : > { %v8187_v28 = vpop.f32.mrf.mxu0  ;;  %v4030_v12 = vpop.f32.mrf.mxu1 }
 0x30c   : > { %v11358_v57 = vadd.f32 %v4239_v60, %v4030_v12 }
 0x30d   : > { %8358 = vmatmul.mubr.bf16.gmra.mxu1 %v5435_v33  ;;  %v4741_v48 = vpop.f32.mrf.mxu0  ;;  %v8072_v37 = vpop.f32.mrf.mxu1 }
 0x30e   : > { %8425 = vmatprep.mubr.bf16.mxu1 %v10865_v22  ;;  %v11361_v14 = vadd.f32 %v8120_v59, %v8072_v37  ;;  %v12265_v59 = vld [vmem:[#allocation13_spill] sm:$0xff] }
 0x30f   : > { %8474 = vmatmul.mubr.bf16.vlgmr.msra.gmra.mxu0 %v12261_v54  ;;  %v8188_v26 = vpop.f32.mrf.mxu0  ;;  %v4033_v62 = vpop.f32.mrf.mxu1 }
 0x310   : > { %8477 = vmatprep.mubr.bf16.mxu0 %v12262_v53  ;;  %v11363_v15 = vadd.f32 %v4242_v2, %v4033_v62 }
 0x311   : > { %v4744_v30 = vpop.f32.mrf.mxu0 }
 0x312   : > { %12263 = vst [vmem:[#allocation26_spill] sm:$0xff] %v11363_v15 }
 0x315   : > { %v8139_v33 = vpop.f32.mrf.mxu1  ;;  %8426 = vmatmul.mubr.bf16.vlgmr.msra.gmra.mxu1 %v10911_v6 }
 0x316   : > { %v4611_v22 = vadd.f32 %v8139_v33, %v11226_v44  ;;  %8429 = vmatprep.mubr.bf16.mxu1 %v10926_v29 }
 0x317   : > { %v4482_v60 = vpop.f32.mrf.mxu1  ;;  %v8191_v20 = vpop.f32.mrf.mxu0  ;;  %8478 = vmatmul.mubr.bf16.gmra.mxu0 %v12264_v36 }
 0x318   : > { %v4609_v12 = vadd.f32 %v4482_v60, %v11232_v9  ;;  %8481 = vmatprep.mubr.bf16.mxu0 %v12265_v59  ;;  %v11371_v54 = vadd.f32 %v8187_v28, %v4611_v22 }
 0x319   : > { %v8140_v2 = vpop.f32.mrf.mxu1  ;;  %v4757_v53 = vpop.f32.mrf.mxu0 }
 0x31a   : > { %v4612_v37 = vadd.f32 %v8140_v2, %v11238_v39  ;;  %v11374_v62 = vadd.f32 %v4741_v48, %v4609_v12  ;;  %v12266_v48 = vld [vmem:[#allocation17_spill] sm:$0xff] }
 0x31b   : > { %v4485_v6 = vpop.f32.mrf.mxu1  ;;  %v8192_v44 = vpop.f32.mrf.mxu0  ;;  %v12267_v12 = vld [vmem:[#allocation21_spill] sm:$0xff] }
 0x31c   : > { %v4610_v29 = vadd.f32 %v4485_v6, %v11245_v45  ;;  %v11377_v33 = vadd.f32 %v8188_v26, %v4612_v37 }
 0x31d   : > { %v8143_v15 = vpop.f32.mrf.mxu1  ;;  %8430 = vmatmul.mubr.bf16.gmra.mxu1 %v10932_v5  ;;  %v4760_v9 = vpop.f32.mrf.mxu0 }
 0x31e   : > { %v4615_v60 = vadd.f32 %v8143_v15, %v11253_v18  ;;  %8433 = vmatprep.mubr.bf16.mxu1 %v10934_v11  ;;  %v11382_v28 = vadd.f32 %v4744_v30, %v4610_v29 }
 0x31f   : > { %v4498_v22 = vpop.f32.mrf.mxu1  ;;  %v8195_v39 = vpop.f32.mrf.mxu0  ;;  %8482 = vmatmul.mubr.bf16.gmra.mxu0 %v12266_v48 }
 0x320   : > { %v4613_v36 = vadd.f32 %v4498_v22, %v11260_v13  ;;  %8485 = vmatprep.mubr.bf16.mxu0 %v12267_v12  ;;  %v11387_v45 = vadd.f32 %v8191_v20, %v4615_v60  ;;  %v12269_v22 = vld [vmem:[#allocation5_spill] sm:$0xff] }
 0x321   : > { %v8144_v26 = vpop.f32.mrf.mxu1  ;;  %v4773_v59 = vpop.f32.mrf.mxu0 }
 0x322   : > { %v4616_v5 = vadd.f32 %v8144_v26, %v11267_v47  ;;  %v11390_v2 = vadd.f32 %v4757_v53, %v4613_v36  ;;  %v12268_v53 = vld [vmem:[#allocation3_spill] sm:$0xff] }
 0x323   : > { %v4501_v18 = vpop.f32.mrf.mxu1  ;;  %v8196_v11 = vpop.f32.mrf.mxu0 }
 0x324   : > { %v4614_v15 = vadd.f32 %v4501_v18, %v11272_v27  ;;  %v11393_v30 = vadd.f32 %v8192_v44, %v4616_v5 }
 0x325   : > { %v8147_v37 = vpop.f32.mrf.mxu1  ;;  %8434 = vmatmul.mubr.bf16.gmra.mxu1 %v10951_v19  ;;  %v4776_v13 = vpop.f32.mrf.mxu0 }
 0x326   : > { %v4619_v6 = vadd.f32 %v8147_v37, %v11277_v52  ;;  %8437 = vmatprep.mubr.bf16.mxu1 %v10976_v1  ;;  %v11398_v20 = vadd.f32 %v4760_v9, %v4614_v15  ;;  %v12271_v37 = vld [vmem:[#allocation9_spill] sm:$0xff] }
 0x327   : > { %v4514_v29 = vpop.f32.mrf.mxu1  ;;  %v8199_v47 = vpop.f32.mrf.mxu0  ;;  %8486 = vmatmul.mubr.bf16.gmra.mxu0 %v12268_v53 }
 0x328   : > { %v4617_v60 = vadd.f32 %v4514_v29, %v11284_v38  ;;  %8489 = vmatprep.mubr.bf16.mxu0 %v12269_v22  ;;  %v11403_v27 = vadd.f32 %v8195_v39, %v4619_v6 }
 0x329   : > { %v8148_v44 = vpop.f32.mrf.mxu1  ;;  %v4789_v48 = vpop.f32.mrf.mxu0 }
 0x32a   : > { %v4620_v19 = vadd.f32 %v8148_v44, %v11291_v0  ;;  %v11406_v36 = vadd.f32 %v4773_v59, %v4617_v60  ;;  %v12270_v59 = vld [vmem:[#allocation7_spill] sm:$0xff] }
 0x32b   : > { %v4517_v52 = vpop.f32.mrf.mxu1  ;;  %v8200_v1 = vpop.f32.mrf.mxu0 }
 0x32c   : > { %v4618_v9 = vadd.f32 %v4517_v52, %v11293_v55  ;;  %v11409_v12 = vadd.f32 %v8196_v11, %v4620_v19  ;;  %v12273_v52 = vld [vmem:[#allocation16_spill] sm:$0xff] }
 0x32d   : > { %v8151_v26 = vpop.f32.mrf.mxu1  ;;  %8438 = vmatmul.mubr.bf16.gmra.mxu1 %v10978_v63  ;;  %v4792_v38 = vpop.f32.mrf.mxu0 }
 0x32e   : > { %v4623_v5 = vadd.f32 %v8151_v26, %v11299_v7  ;;  %8441 = vmatprep.mubr.bf16.mxu1 %v10987_v4  ;;  %v11414_v39 = vadd.f32 %v4776_v13, %v4618_v9 }
 0x32f   : > { %v4530_v18 = vpop.f32.mrf.mxu1  ;;  %v8203_v0 = vpop.f32.mrf.mxu0  ;;  %8490 = vmatmul.mubr.bf16.gmra.mxu0 %v12270_v59 }
 0x330   : > { %v4621_v15 = vadd.f32 %v4530_v18, %v11303_v3  ;;  %8493 = vmatprep.mubr.bf16.mxu0 %v12271_v37  ;;  %v11419_v55 = vadd.f32 %v8199_v47, %v4623_v5  ;;  %v12274_v37 = vld [vmem:[#allocation19_spill] sm:$0xff] }
 0x331   : > { %v8152_v11 = vpop.f32.mrf.mxu1  ;;  %v4805_v6 = vpop.f32.mrf.mxu0 }
 0x332   : > { %v4624_v63 = vadd.f32 %v8152_v11, %v11306_v49  ;;  %v11422_v29 = vadd.f32 %v4789_v48, %v4621_v15  ;;  %v12272_v48 = vld [vmem:[#allocation11_spill] sm:$0xff] }
 0x333   : > { %v4533_v7 = vpop.f32.mrf.mxu1  ;;  %v8204_v4 = vpop.f32.mrf.mxu0 }
 0x334   : > { %v4622_v13 = vadd.f32 %v4533_v7, %v11308_v10  ;;  %v11425_v53 = vadd.f32 %v8200_v1, %v4624_v63 }
 0x335   : > { %v8155_v60 = vpop.f32.mrf.mxu1  ;;  %8442 = vmatmul.mubr.bf16.gmra.mxu1 %v11003_v56  ;;  %v4808_v3 = vpop.f32.mrf.mxu0 }
 0x336   : > { %v4627_v22 = vadd.f32 %v8155_v60, %v11311_v41  ;;  %8445 = vmatprep.mubr.bf16.mxu1 %v11019_v50  ;;  %v11430_v47 = vadd.f32 %v4792_v38, %v4622_v13 }
 0x337   : > { %v4546_v44 = vpop.f32.mrf.mxu1  ;;  %v8207_v49 = vpop.f32.mrf.mxu0  ;;  %8494 = vmatmul.mubr.bf16.gmra.mxu0 %v12272_v48 }
 0x338   : > { %v4625_v19 = vadd.f32 %v4546_v44, %v11315_v46  ;;  %8497 = vmatprep.mubr.bf16.mxu0 %v12273_v52  ;;  %v11435_v10 = vadd.f32 %v8203_v0, %v4627_v22 }
 0x339   : > { %v8156_v1 = vpop.f32.mrf.mxu1  ;;  %v4821_v9 = vpop.f32.mrf.mxu0 }
 0x33a   : > { %v4628_v56 = vadd.f32 %v8156_v1, %v11320_v51  ;;  %v11438_v26 = vadd.f32 %v4805_v6, %v4625_v19  ;;  %v12275_v6 = vld [vmem:[#allocation22_spill] sm:$0xff] }
 0x33b   : > { %v4549_v41 = vpop.f32.mrf.mxu1  ;;  %v8208_v50 = vpop.f32.mrf.mxu0  ;;  %v12276_v19 = vld [vmem:[#allocation14_spill] sm:$0xff] }
 0x33c   : > { %v4626_v38 = vadd.f32 %v4549_v41, %v11322_v17  ;;  %v11441_v5 = vadd.f32 %v8204_v4, %v4628_v56 }
 0x33d   : > { %v8159_v18 = vpop.f32.mrf.mxu1  ;;  %8446 = vmatmul.mubr.bf16.gmra.mxu1 %v11028_v31  ;;  %v4824_v46 = vpop.f32.mrf.mxu0 }
 0x33e   : > { %v4631_v59 = vadd.f32 %v8159_v18, %v11329_v24  ;;  %8449 = vmatprep.mubr.bf16.mxu1 %v11038_v42  ;;  %v11446_v0 = vadd.f32 %v4808_v3, %v4626_v38  ;;  %v5963_v24 = vrot.slane %v11324_v25, 2  ;;  %v5966_v42 = vrot.slane %v11318_v32, 2 }
 0x33f   : > { %v4562_v15 = vpop.f32.mrf.mxu1  ;;  %v8211_v51 = vpop.f32.mrf.mxu0  ;;  %8498 = vmatmul.mubr.bf16.gmra.mxu0 %v12274_v37 }
 0x340   : > { %v4629_v11 = vadd.f32 %v4562_v15, %v11333_v61  ;;  %8501 = vmatprep.mubr.bf16.mxu0 %v12275_v6  ;;  %v11451_v17 = vadd.f32 %v8207_v49, %v4631_v59  ;;  %v5967_v25 = vsel %vm4254_vm7, %v5963_v24, %v5966_v42 }
 0x341   : > { %v8160_v63 = vpop.f32.mrf.mxu1  ;;  %v4837_v7 = vpop.f32.mrf.mxu0 }
 0x342   : > { %v4632_v31 = vadd.f32 %v8160_v63, %v11337_v16  ;;  %v11456_v4 = vadd.f32 %v4821_v9, %v4629_v11 }
 0x343   : > { %v4565_v13 = vpop.f32.mrf.mxu1  ;;  %v8212_v60 = vpop.f32.mrf.mxu0 }
 0x344   : > { %v4630_v3 = vadd.f32 %v4565_v13, %v11339_v23  ;;  %v11459_v22 = vadd.f32 %v8208_v50, %v4632_v31 }
 0x345   : > { %v8163_v61 = vpop.f32.mrf.mxu1  ;;  %8450 = vmatmul.mubr.bf16.gmra.mxu1 %v11052_v21  ;;  %v4840_v44 = vpop.f32.mrf.mxu0  ;;  %v5970_v21 = vpack.c.bf16 %v5967_v25, %v5963_v24  ;;  %v12277_v24 = vld [vmem:[#allocation26_spill] sm:$0xff] }
 0x346   : > { %v4635_v49 = vadd.f32 %v8163_v61, %v11342_v58  ;;  %8453 = vmatprep.mubr.bf16.mxu1 %v11211_v40  ;;  %v11465_v16 = vadd.f32 %v4824_v46, %v4630_v3 }
 0x347   : > { %v4578_v32 = vpop.f32.mrf.mxu1  ;;  %v8215_v48 = vpop.f32.mrf.mxu0  ;;  %8502 = vmatmul.mubr.bf16.gmra.mxu0 %v12276_v19 }
 0x348   : > { %v4633_v23 = vadd.f32 %v4578_v32, %v11345_v43  ;;  %v11469_v52 = vadd.f32 %v8211_v51, %v4635_v49 }
 0x349   : > { %v8164_v1 = vpop.f32.mrf.mxu1  ;;  %v4853_v9 = vpop.f32.mrf.mxu0 }
 0x34a   : > { %v4636_v56 = vadd.f32 %v8164_v1, %v11350_v34  ;;  %v11472_v58 = vadd.f32 %v4837_v7, %v4633_v23 }
 0x34b   : > { %v4581_v40 = vpop.f32.mrf.mxu1  ;;  %v8216_v41 = vpop.f32.mrf.mxu0 }
 0x34c   : > { %v4634_v50 = vadd.f32 %v4581_v40, %v11352_v35  ;;  %v11475_v38 = vadd.f32 %v8212_v60, %v4636_v56 }
 0x34d   : > { %v8167_v18 = vpop.f32.mrf.mxu1  ;;  %8454 = vmatmul.mubr.bf16.gmra.mxu1 %v5970_v21  ;;  %v4856_v46 = vpop.f32.mrf.mxu0 }
 0x34e   : > { %v4639_v43 = vadd.f32 %v8167_v18, %v11354_v8  ;;  %v11478_v59 = vadd.f32 %v4840_v44, %v4634_v50 }
 0x34f   : > { %v4594_v15 = vpop.f32.mrf.mxu1  ;;  %v8283_v51 = vpop.f32.mrf.mxu0 }
 0x350   : > { %v4637_v37 = vadd.f32 %v4594_v15, %v11358_v57  ;;  %v11481_v34 = vadd.f32 %v8215_v48, %v4639_v43 }
 0x351   : > { %v8168_v11 = vpop.f32.mrf.mxu1  ;;  %v5276_v6 = vpop.f32.mrf.mxu0 }
 0x352   : > { %v4640_v63 = vadd.f32 %v8168_v11, %v11361_v14  ;;  %v11484_v35 = vadd.f32 %v4853_v9, %v4637_v37 }
 0x353   : > { %v4597_v7 = vpop.f32.mrf.mxu1  ;;  %v8284_v31 = vpop.f32.mrf.mxu0 }
 0x354   : > { %v4638_v42 = vadd.f32 %v4597_v7, %v12277_v24  ;;  %v11487_v13 = vadd.f32 %v8216_v41, %v4640_v63 }
 0x355   : > { %v8235_v8 = vpop.f32.mrf.mxu1  ;;  %v5279_v60 = vpop.f32.mrf.mxu0 }
 0x356   : > { %v5139_v3 = vadd.f32 %v8235_v8, %v11371_v54  ;;  %v11490_v61 = vadd.f32 %v4856_v46, %v4638_v42 }
 0x357   : > { %v5010_v57 = vpop.f32.mrf.mxu1  ;;  %v8287_v44 = vpop.f32.mrf.mxu0 }
 0x358   : > { %v5137_v49 = vadd.f32 %v5010_v57, %v11374_v62  ;;  %v11493_v25 = vadd.f32 %v8283_v51, %v5139_v3 }
 0x359   : > { %v8236_v14 = vpop.f32.mrf.mxu1  ;;  %v5292_v32 = vpop.f32.mrf.mxu0 }
 0x35a   : > { %v5140_v48 = vadd.f32 %v8236_v14, %v11377_v33  ;;  %v11496_v19 = vadd.f32 %v5276_v6, %v5137_v49 }
 0x35b   : > { %v5013_v23 = vpop.f32.mrf.mxu1  ;;  %v8288_v1 = vpop.f32.mrf.mxu0 }
 0x35c   : > { %v5138_v9 = vadd.f32 %v5013_v23, %v11382_v28  ;;  %v11499_v21 = vadd.f32 %v8284_v31, %v5140_v48 }
 0x35d   : > { %v8239_v54 = vpop.f32.mrf.mxu1  ;;  %v5295_v56 = vpop.f32.mrf.mxu0 }
 0x35e   : > { %v5143_v40 = vadd.f32 %v8239_v54, %v11387_v45  ;;  %v11502_v41 = vadd.f32 %v5279_v60, %v5138_v9 }
 0x35f   : > { %v5026_v62 = vpop.f32.mrf.mxu1  ;;  %v8291_v50 = vpop.f32.mrf.mxu0 }
 0x360   : > { %v5141_v18 = vadd.f32 %v5026_v62, %v11390_v2  ;;  %v11505_v46 = vadd.f32 %v8287_v44, %v5143_v40 }
 0x361   : > { %v8240_v33 = vpop.f32.mrf.mxu1  ;;  %v5308_v43 = vpop.f32.mrf.mxu0 }
 0x362   : > { %v5144_v15 = vadd.f32 %v8240_v33, %v11393_v30  ;;  %v11508_v51 = vadd.f32 %v5292_v32, %v5141_v18 }
 0x363   : > { %v5029_v28 = vpop.f32.mrf.mxu1  ;;  %v8292_v37 = vpop.f32.mrf.mxu0 }
 0x364   : > { %v5142_v11 = vadd.f32 %v5029_v28, %v11398_v20  ;;  %v11511_v6 = vadd.f32 %v8288_v1, %v5144_v15 }
 0x365   : > { %v8243_v45 = vpop.f32.mrf.mxu1  ;;  %v5311_v63 = vpop.f32.mrf.mxu0 }
 0x366   : > { %v5147_v7 = vadd.f32 %v8243_v45, %v11403_v27  ;;  %v11514_v31 = vadd.f32 %v5295_v56, %v5142_v11 }
 0x367   : > { %v5042_v2 = vpop.f32.mrf.mxu1  ;;  %v8295_v24 = vpop.f32.mrf.mxu0 }
 0x368   : > { %v5145_v42 = vadd.f32 %v5042_v2, %v11406_v36  ;;  %v11517_v8 = vadd.f32 %v8291_v50, %v5147_v7 }
 0x369   : > { %v8244_v30 = vpop.f32.mrf.mxu1  ;;  %v5324_v60 = vpop.f32.mrf.mxu0 }
 0x36a   : > { %v5148_v3 = vadd.f32 %v8244_v30, %v11409_v12  ;;  %v11520_v57 = vadd.f32 %v5308_v43, %v5145_v42 }
 0x36b   : > { %v5045_v20 = vpop.f32.mrf.mxu1  ;;  %v8296_v44 = vpop.f32.mrf.mxu0 }
 0x36c   : > { %v5146_v49 = vadd.f32 %v5045_v20, %v11414_v39  ;;  %v11523_v14 = vadd.f32 %v8292_v37, %v5148_v3 }
 0x36d   : > { %v8247_v27 = vpop.f32.mrf.mxu1  ;;  %v5327_v32 = vpop.f32.mrf.mxu0 }
 0x36e   : > { %v5151_v48 = vadd.f32 %v8247_v27, %v11419_v55  ;;  %v11526_v23 = vadd.f32 %v5311_v63, %v5146_v49 }
 0x36f   : > { %v5058_v36 = vpop.f32.mrf.mxu1  ;;  %v8299_v1 = vpop.f32.mrf.mxu0 }
 0x370   : > { %v5149_v9 = vadd.f32 %v5058_v36, %v11422_v29  ;;  %v11529_v54 = vadd.f32 %v8295_v24, %v5151_v48 }
 0x371   : > { %v8248_v12 = vpop.f32.mrf.mxu1  ;;  %v5340_v56 = vpop.f32.mrf.mxu0 }
 0x372   : > { %v5152_v40 = vadd.f32 %v8248_v12, %v11425_v53  ;;  %v11532_v62 = vadd.f32 %v5324_v60, %v5149_v9 }
 0x373   : > { %v5061_v39 = vpop.f32.mrf.mxu1  ;;  %v8300_v50 = vpop.f32.mrf.mxu0 }
 0x374   : > { %v5150_v18 = vadd.f32 %v5061_v39, %v11430_v47  ;;  %v11535_v33 = vadd.f32 %v8296_v44, %v5152_v40 }
 0x375   : > { %v8251_v55 = vpop.f32.mrf.mxu1  ;;  %v5343_v43 = vpop.f32.mrf.mxu0 }
 0x376   : > { %v5155_v15 = vadd.f32 %v8251_v55, %v11435_v10  ;;  %v11538_v28 = vadd.f32 %v5327_v32, %v5150_v18 }
 0x377   : > { %v5074_v29 = vpop.f32.mrf.mxu1  ;;  %v8303_v37 = vpop.f32.mrf.mxu0 }
 0x378   : > { %v5153_v11 = vadd.f32 %v5074_v29, %v11438_v26  ;;  %v11541_v45 = vadd.f32 %v8299_v1, %v5155_v15 }
 0x379   : > { %v8252_v53 = vpop.f32.mrf.mxu1  ;;  %v5356_v63 = vpop.f32.mrf.mxu0 }
 0x37a   : > { %v5156_v7 = vadd.f32 %v8252_v53, %v11441_v5  ;;  %v11544_v2 = vadd.f32 %v5340_v56, %v5153_v11 }
 0x37b   : > { %v5077_v47 = vpop.f32.mrf.mxu1  ;;  %v8304_v24 = vpop.f32.mrf.mxu0 }
 0x37c   : > { %v5154_v42 = vadd.f32 %v5077_v47, %v11446_v0  ;;  %v11547_v30 = vadd.f32 %v8300_v50, %v5156_v7 }
 0x37d   : > { %v8255_v10 = vpop.f32.mrf.mxu1  ;;  %v5359_v60 = vpop.f32.mrf.mxu0 }
 0x37e   : > { %12278 = vst [vmem:[#allocation62_spill] sm:$0xff] %v11547_v30  ;;  %v5159_v3 = vadd.f32 %v8255_v10, %v11451_v17  ;;  %v11550_v20 = vadd.f32 %v5343_v43, %v5154_v42 }
 0x37f   : > { %v5090_v26 = vpop.f32.mrf.mxu1  ;;  %v8307_v44 = vpop.f32.mrf.mxu0 }
 0x380   : > { %12279 = vst [vmem:[#allocation27_spill] sm:$0xff] %v11550_v20  ;;  %v5157_v49 = vadd.f32 %v5090_v26, %v11456_v4  ;;  %v11553_v27 = vadd.f32 %v8303_v37, %v5159_v3 }
 0x381   : > { %v8256_v5 = vpop.f32.mrf.mxu1  ;;  %v5372_v32 = vpop.f32.mrf.mxu0 }
 0x382   : > { %12280 = vst [vmem:[#allocation64_spill] sm:$0xff] %v11553_v27  ;;  %v5160_v48 = vadd.f32 %v8256_v5, %v11459_v22  ;;  %v11556_v36 = vadd.f32 %v5356_v63, %v5157_v49 }
 0x383   : > { %v5093_v0 = vpop.f32.mrf.mxu1  ;;  %v8308_v1 = vpop.f32.mrf.mxu0 }
 0x384   : > { %12281 = vst [vmem:[#allocation30_spill] sm:$0xff] %v11556_v36  ;;  %v5158_v9 = vadd.f32 %v5093_v0, %v11465_v16  ;;  %v11559_v12 = vadd.f32 %v8304_v24, %v5160_v48 }
 0x385   : > { %v8259_v17 = vpop.f32.mrf.mxu1  ;;  %v5375_v56 = vpop.f32.mrf.mxu0 }
 0x386   : > { %12282 = vst [vmem:[#allocation66_spill] sm:$0xff] %v11559_v12  ;;  %v5163_v40 = vadd.f32 %v8259_v17, %v11469_v52  ;;  %v11562_v39 = vadd.f32 %v5359_v60, %v5158_v9 }
 0x387   : > { %v5106_v4 = vpop.f32.mrf.mxu1  ;;  %v8311_v50 = vpop.f32.mrf.mxu0 }
 0x388   : > { %12283 = vst [vmem:[#allocation57_spill] sm:$0xff] %v11562_v39  ;;  %v5161_v18 = vadd.f32 %v5106_v4, %v11472_v58  ;;  %v11565_v55 = vadd.f32 %v8307_v44, %v5163_v40 }
 0x389   : > { %v8260_v22 = vpop.f32.mrf.mxu1  ;;  %v5388_v43 = vpop.f32.mrf.mxu0 }
 0x38a   : > { %12284 = vst [vmem:[#allocation68_spill] sm:$0xff] %v11565_v55  ;;  %v5164_v15 = vadd.f32 %v8260_v22, %v11475_v38  ;;  %v11568_v29 = vadd.f32 %v5372_v32, %v5161_v18 }
 0x38b   : > { %v5109_v16 = vpop.f32.mrf.mxu1  ;;  %v8312_v37 = vpop.f32.mrf.mxu0 }
 0x38c   : > { %12285 = vst [vmem:[#allocation32_spill] sm:$0xff] %v11568_v29  ;;  %v5162_v11 = vadd.f32 %v5109_v16, %v11478_v59  ;;  %v11571_v53 = vadd.f32 %v8308_v1, %v5164_v15 }
 0x38d   : > { %v8263_v52 = vpop.f32.mrf.mxu1  ;;  %v5391_v63 = vpop.f32.mrf.mxu0 }
 0x38e   : > { %12286 = vst [vmem:[#allocation70_spill] sm:$0xff] %v11571_v53  ;;  %v5167_v7 = vadd.f32 %v8263_v52, %v11481_v34  ;;  %v11574_v47 = vadd.f32 %v5375_v56, %v5162_v11 }
 0x38f   : > { %v5122_v58 = vpop.f32.mrf.mxu1  ;;  %v11576_v24 = vpop.f32.mrf.mxu0 }
 0x390   : > { %12287 = vst [vmem:[#allocation33_spill] sm:$0xff] %v11574_v47  ;;  %v5165_v42 = vadd.f32 %v5122_v58, %v11484_v35  ;;  %v11579_v38 = vadd.f32 %v8311_v50, %v5167_v7 }
 0x391   : > { %v8264_v10 = vpop.f32.mrf.mxu1  ;;  %v11581_v60 = vpop.f32.mrf.mxu0 }
 0x392   : > { %12288 = vst [vmem:[#allocation72_spill] sm:$0xff] %v11579_v38  ;;  %v5168_v59 = vadd.f32 %v8264_v10, %v11487_v13  ;;  %v11584_v3 = vadd.f32 %v5388_v43, %v5165_v42 }
 0x393   : > { %v5125_v26 = vpop.f32.mrf.mxu1  ;;  %v11586_v44 = vpop.f32.mrf.mxu0 }
 0x394   : > { %12289 = vst [vmem:[#allocation34_spill] sm:$0xff] %v11584_v3  ;;  %v5166_v34 = vadd.f32 %v5125_v26, %v11490_v61  ;;  %v11589_v49 = vadd.f32 %v8312_v37, %v5168_v59 }
 0x395   : > { %v8331_v5 = vpop.f32.mrf.mxu1  ;;  %v11591_v32 = vpop.f32.mrf.mxu0 }
 0x396   : > { %12290 = vst [vmem:[#allocation74_spill] sm:$0xff] %v11589_v49  ;;  %v11593_v35 = vadd.f32 %v5391_v63, %v5166_v34 }
 0x397   : > { %v5535_v48 = vpop.f32.mrf.mxu1  ;;  %v11595_v0 = vpop.f32.mrf.mxu0 }
 0x398   : > { %12291 = vst [vmem:[#allocation59_spill] sm:$0xff] %v11593_v35 }
 0x399   : > { %v8332_v1 = vpop.f32.mrf.mxu1  ;;  %v11597_v9 = vpop.f32.mrf.mxu0 }
 0x39b   : > { %v11599_v13 = vpop.f32.mrf.mxu1  ;;  %v11601_v17 = vpop.f32.mrf.mxu0 }
 0x39d   : > { %v11603_v56 = vpop.f32.mrf.mxu1  ;;  %v11605_v61 = vpop.f32.mrf.mxu0 }
 0x39f   : > { %v11607_v40 = vpop.f32.mrf.mxu1  ;;  %v11609_v4 = vpop.f32.mrf.mxu0 }
 0x3a1   : > { %v11611_v50 = vpop.f32.mrf.mxu1  ;;  %v11613_v18 = vpop.f32.mrf.mxu0 }
 0x3a3   : > { %v11615_v22 = vpop.f32.mrf.mxu1  ;;  %v11617_v43 = vpop.f32.mrf.mxu0 }
 0x3a5   : > { %v11619_v15 = vpop.f32.mrf.mxu1  ;;  %v11621_v16 = vpop.f32.mrf.mxu0 }
 0x3a7   : > { %v11623_v37 = vpop.f32.mrf.mxu1  ;;  %v11625_v11 = vpop.f32.mrf.mxu0 }
 0x3a9   : > { %v11627_v52 = vpop.f32.mrf.mxu1  ;;  %v11629_v63 = vpop.f32.mrf.mxu0 }
 0x3ab   : > { %v11631_v7 = vpop.f32.mrf.mxu1  ;;  %v11633_v58 = vpop.f32.mrf.mxu0 }
 0x3ad   : > { %v11635_v42 = vpop.f32.mrf.mxu1  ;;  %v11637_v10 = vpop.f32.mrf.mxu0 }
 0x3ae   : > { %12292 = vst [vmem:[#allocation61_spill] sm:$0xff] %v11637_v10 }
 0x3af   : > { %v11639_v59 = vpop.f32.mrf.mxu1  ;;  %v11641_v26 = vpop.f32.mrf.mxu0 }
 0x3b0   : > { %12293 = vst [vmem:[#allocation63_spill] sm:$0xff] %v11641_v26 }
 0x3b1   : > { %v11643_v34 = vpop.f32.mrf.mxu1  ;;  %v11645_v35 = vpop.f32.mrf.mxu0 }
 0x3b2   : > { %12294 = vst [vmem:[#allocation76_spill] sm:$0xff] %v11645_v35 }
 0x3b3   : > { %v11647_v49 = vpop.f32.mrf.mxu1  ;;  %v11649_v3 = vpop.f32.mrf.mxu0 }
 0x3b4   : > { %12295 = vst [vmem:[#allocation65_spill] sm:$0xff] %v11649_v3 }
 0x3b5   : > { %v11651_v38 = vpop.f32.mrf.mxu1  ;;  %v11653_v47 = vpop.f32.mrf.mxu0 }
 0x3b6   : > { %12296 = vst [vmem:[#allocation67_spill] sm:$0xff] %v11653_v47 }
 0x3b7   : > { %v11655_v53 = vpop.f32.mrf.mxu1  ;;  %v11657_v29 = vpop.f32.mrf.mxu0 }
 0x3b8   : > { %12297 = vst [vmem:[#allocation69_spill] sm:$0xff] %v11657_v29 }
 0x3b9   : > { %v11659_v55 = vpop.f32.mrf.mxu1  ;;  %v11661_v39 = vpop.f32.mrf.mxu0 }
 0x3ba   : > { %12298 = vst [vmem:[#allocation71_spill] sm:$0xff] %v11659_v55  ;;  %12299 = vst [vmem:[#allocation73_spill] sm:$0xff] %v11661_v39 }
 0x3bb   : > { %v11663_v12 = vpop.f32.mrf.mxu1  ;;  %v11665_v36 = vpop.f32.mrf.mxu0 }
 0x3bc   : > { %12300 = vst [vmem:[#allocation35_spill] sm:$0xff] %v11663_v12  ;;  %12301 = vst [vmem:[#allocation36_spill] sm:$0xff] %v11665_v36 }
 0x3bd   : > { %v11667_v27 = vpop.f32.mrf.mxu1  ;;  %v11669_v35 = vpop.f32.mrf.mxu0 }
 0x3be   : > { %12302 = vst [vmem:[#allocation37_spill] sm:$0xff] %v11667_v27  ;;  %12303 = vst [vmem:[#allocation38_spill] sm:$0xff] %v11669_v35 }
 0x3bf   : > { %v11671_v3 = vpop.f32.mrf.mxu1  ;;  %v11673_v20 = vpop.f32.mrf.mxu0 }
 0x3c0   : > { %12304 = vst [vmem:[#allocation39_spill] sm:$0xff] %v11671_v3  ;;  %12305 = vst [vmem:[#allocation40_spill] sm:$0xff] %v11673_v20 }
 0x3c1   : > { %v11675_v47 = vpop.f32.mrf.mxu1  ;;  %v11677_v26 = vpop.f32.mrf.mxu0 }
 0x3c2   : > { %12306 = vst [vmem:[#allocation75_spill] sm:$0xff] %v11675_v47  ;;  %12307 = vst [vmem:[#allocation77_spill] sm:$0xff] %v11677_v26 }
 0x3c3   : > { %v11679_v29 = vpop.f32.mrf.mxu1  ;;  %v11681_v55 = vpop.f32.mrf.mxu0 }
 0x3c4   : > { %12308 = vst [vmem:[#allocation31_spill] sm:$0xff] %v11679_v29  ;;  %12309 = vst [vmem:[#allocation29_spill] sm:$0xff] %v11681_v55 }
 0x3c5   : > { %v11683_v39 = vpop.f32.mrf.mxu1  ;;  %v11685_v12 = vpop.f32.mrf.mxu0 }
 0x3c6   : > { %12310 = vst [vmem:[#allocation12_spill] sm:$0xff] %v11683_v39  ;;  %12311 = vst [vmem:[#allocation20_spill] sm:$0xff] %v11685_v12  ;;  %v5664_v12 = vadd.f32 %v8331_v5, %v11493_v25  ;;  %v5668_v5 = vadd.f32 %v11603_v56, %v11505_v46 }
 0x3c7   : > { %v11687_v36 = vpop.f32.mrf.mxu1  ;;  %v11689_v27 = vpop.f32.mrf.mxu0 }
 0x3c8   : > { %12312 = vst [vmem:[#allocation58_spill] sm:$0xff] %v11687_v36  ;;  %12313 = vst [vmem:[#allocation28_spill] sm:$0xff] %v11689_v27 }
 0x3c9   : > { %v11691_v35 = vpop.f32.mrf.mxu1  ;;  %v11693_v3 = vpop.f32.mrf.mxu0 }
 0x3ca   : > { %12314 = vst [vmem:[#allocation54_spill] sm:$0xff] %v11691_v35  ;;  %12315 = vst [vmem:[#allocation18_spill] sm:$0xff] %v11693_v3  ;;  %v5662_v35 = vadd.f32 %v5535_v48, %v11496_v19  ;;  %v11721_v19 = vld [vmem:[%s11885_s5] ss:$0 sm:$0xff] }
 0x3cb   : > { %v11695_v20 = vpop.f32.mrf.mxu1  ;;  %v11697_v47 = vpop.f32.mrf.mxu0 }
 0x3cc   : > { %12316 = vst [vmem:[#allocation43_spill] sm:$0xff] %v11695_v20  ;;  %12317 = vst [vmem:[#allocation23_spill] sm:$0xff] %v11697_v47  ;;  %v5665_v47 = vadd.f32 %v8332_v1, %v11499_v21  ;;  %v5931_v25 = vadd.f32 %v11581_v60, %v5662_v35 }
 0x3cd   : > { %v11699_v26 = vpop.f32.mrf.mxu1  ;;  %v11701_v29 = vpop.f32.mrf.mxu0 }
 0x3ce   : > { %12318 = vst [vmem:[#allocation25_spill] sm:$0xff] %v11699_v26  ;;  %12319 = vst [vmem:[#allocation45_spill] sm:$0xff] %v11701_v29  ;;  %v5933_v26 = vadd.f32 %v11576_v24, %v5664_v12  ;;  %v5934_v1 = vadd.f32 %v11586_v44, %v5665_v47 }
 0x3cf   : > { %v11703_v55 = vpop.f32.mrf.mxu1  ;;  %v8475_v39 = vpop.f32.mrf.mxu0 }
 0x3d0   : > { %12320 = vst [vmem:[#allocation60_spill] sm:$0xff] %v11703_v55  ;;  %v5663_v55 = vadd.f32 %v11599_v13, %v11502_v41  ;;  %v5666_v41 = vadd.f32 %v11607_v40, %v11508_v51  ;;  %v5937_v51 = vadd.f32 %v11595_v0, %v5668_v5 }
 0x3d1   : > { %v11706_v36 = vpop.f32.mrf.mxu1  ;;  %v6327_v27 = vpop.f32.mrf.mxu0 }
 0x3d2   : > { %v5932_v56 = vadd.f32 %v11591_v32, %v5663_v55  ;;  %v5667_v55 = vadd.f32 %v11615_v22, %v11514_v31  ;;  %v5935_v32 = vadd.f32 %v11597_v9, %v5666_v41 }
 0x3d3   : > { %v11709_v3 = vpop.f32.mrf.mxu1  ;;  %v8476_v20 = vpop.f32.mrf.mxu0 }
 0x3d5   : > { %v8427_v30 = vpop.f32.mrf.mxu1  ;;  %v6330_v29 = vpop.f32.mrf.mxu0 }
 0x3d6   : > { %v6199_v10 = vadd.f32 %v8427_v30, %v5933_v26  ;;  %v5669_v26 = vadd.f32 %v11611_v50, %v11511_v6 }
 0x3d7   : > { %v6070_v48 = vpop.f32.mrf.mxu1  ;;  %v8479_v21 = vpop.f32.mrf.mxu0 }
 0x3d8   : > { %v6456_v12 = vadd.f32 %v8475_v39, %v6199_v10  ;;  %v6197_v24 = vadd.f32 %v6070_v48, %v5931_v25 }
 0x3d9   : > { %v8428_v30 = vpop.f32.mrf.mxu1  ;;  %v6343_v60 = vpop.f32.mrf.mxu0 }
 0x3da   : > { %v6495_v35 = vadd.f32 %v11721_v19, %v6456_v12  ;;  %v6454_v46 = vadd.f32 %v6327_v27, %v6197_v24  ;;  %v6200_v13 = vadd.f32 %v8428_v30, %v5934_v1  ;;  %v5672_v12 = vadd.f32 %v11619_v15, %v11517_v8 }
 0x3db   : > { %v6073_v39 = vpop.f32.mrf.mxu1  ;;  %v8480_v47 = vpop.f32.mrf.mxu0  ;;  %v5670_v30 = vadd.f32 %v11623_v37, %v11520_v57 }
 0x3dc   : > { %v6527_v44 = vmax.f32 %v6495_v35, 0.0  ;;  %v6493_v40 = vadd.f32 %v11721_v19, %v6454_v46  ;;  %v6457_v27 = vadd.f32 %v8476_v20, %v6200_v13  ;;  %v6198_v10 = vadd.f32 %v6073_v39, %v5932_v56 }
 0x3dd   : > { %v8431_v6 = vpop.f32.mrf.mxu1  ;;  %v6346_v50 = vpop.f32.mrf.mxu0  ;;  %v5938_v20 = vadd.f32 %v11601_v17, %v5669_v26  ;;  %v5673_v56 = vadd.f32 %v11627_v52, %v11523_v14 }
 0x3de   : > { %6559 = vst [vmem:[%s11734_s11 + $0x10] sm:$0xff] %v6527_v44  ;;  %v6525_v25 = vmax.f32 %v6493_v40, 0.0  ;;  %v6496_v48 = vadd.f32 %v11721_v19, %v6457_v27  ;;  %v6455_v0 = vadd.f32 %v6330_v29, %v6198_v10  ;;  %v6203_v5 = vadd.f32 %v8431_v6, %v5937_v51 }
 0x3df   : > { %v6086_v24 = vpop.f32.mrf.mxu1  ;;  %v8483_v1 = vpop.f32.mrf.mxu0  ;;  %v5936_v29 = vadd.f32 %v11605_v61, %v5667_v55  ;;  %v5671_v44 = vadd.f32 %v11631_v7, %v11526_v23  ;;  %v5676_v55 = vadd.f32 %v11635_v42, %v11529_v54 }
 0x3e0   : > { %6557 = vst [vmem:[%s11734_s11] sm:$0xff] %v6525_v25  ;;  %v6528_v31 = vmax.f32 %v6496_v48, 0.0  ;;  %v6494_v22 = vadd.f32 %v11721_v19, %v6455_v0  ;;  %v6460_v9 = vadd.f32 %v8479_v21, %v6203_v5  ;;  %v6201_v41 = vadd.f32 %v6086_v24, %v5935_v32 }
 0x3e1   : > { %v8432_v35 = vpop.f32.mrf.mxu1  ;;  %v6359_v46 = vpop.f32.mrf.mxu0  ;;  %v5941_v21 = vadd.f32 %v11609_v4, %v5672_v12  ;;  %v5674_v48 = vadd.f32 %v11639_v59, %v11532_v62  ;;  %v5677_v24 = vadd.f32 %v11643_v34, %v11535_v33 }
 0x3e2   : > { %6560 = vst [vmem:[%s11734_s11 + $0x18] sm:$0xff] %v6528_v31  ;;  %v6526_v8 = vmax.f32 %v6494_v22, 0.0  ;;  %v6499_v15 = vadd.f32 %v11721_v19, %v6460_v9  ;;  %v6458_v17 = vadd.f32 %v6343_v60, %v6201_v41  ;;  %v6204_v13 = vadd.f32 %v8432_v35, %v5938_v20 }
 0x3e3   : > { %v6089_v26 = vpop.f32.mrf.mxu1  ;;  %v8484_v39 = vpop.f32.mrf.mxu0  ;;  %v5939_v60 = vadd.f32 %v11613_v18, %v5670_v30  ;;  %v5675_v9 = vadd.f32 %v11647_v49, %v11538_v28  ;;  %v5943_v30 = vadd.f32 %v11629_v63, %v5674_v48 }
 0x3e4   : > { %6558 = vst [vmem:[%s11734_s11 + $0x8] sm:$0xff] %v6526_v8  ;;  %v6531_v57 = vmax.f32 %v6499_v15, 0.0  ;;  %v6497_v37 = vadd.f32 %v11721_v19, %v6458_v17  ;;  %v6461_v61 = vadd.f32 %v8480_v47, %v6204_v13  ;;  %v6202_v51 = vadd.f32 %v6089_v26, %v5936_v29 }
 0x3e5   : > { %v8435_v40 = vpop.f32.mrf.mxu1  ;;  %v6362_v27 = vpop.f32.mrf.mxu0  ;;  %v5942_v47 = vadd.f32 %v11617_v43, %v5673_v56  ;;  %v5946_v15 = vadd.f32 %v11633_v58, %v5677_v24  ;;  %v5678_v56 = vadd.f32 %v11655_v53, %v11544_v2 }
 0x3e6   : > { %6563 = vst [vmem:[%s11734_s11 + $0x30] sm:$0xff] %v6531_v57  ;;  %v6529_v14 = vmax.f32 %v6497_v37, 0.0  ;;  %v6500_v52 = vadd.f32 %v11721_v19, %v6461_v61  ;;  %v6459_v4 = vadd.f32 %v6346_v50, %v6202_v51  ;;  %v6207_v10 = vadd.f32 %v8435_v40, %v5941_v21  ;;  %v12321_v21 = vld [vmem:[#allocation61_spill] sm:$0xff]  ;;  %v12322_v61 = vld [vmem:[#allocation62_spill] sm:$0xff]  ;;  %v12323_v51 = vld [vmem:[#allocation71_spill] sm:$0xff] }
 0x3e7   : > { %v6102_v6 = vpop.f32.mrf.mxu1  ;;  %v8487_v32 = vpop.f32.mrf.mxu0  ;;  %v5940_v50 = vadd.f32 %v11621_v16, %v5671_v44  ;;  %v5681_v44 = vadd.f32 %v12323_v51, %v12322_v61 }
 0x3e8   : > { %6561 = vst [vmem:[%s11734_s11 + $0x20] sm:$0xff] %v6529_v14  ;;  %v6532_v23 = vmax.f32 %v6500_v52, 0.0  ;;  %v6498_v7 = vadd.f32 %v11721_v19, %v6459_v4  ;;  %v6464_v18 = vadd.f32 %v8483_v1, %v6207_v10  ;;  %v6205_v25 = vadd.f32 %v6102_v6, %v5939_v60  ;;  %v12324_v60 = vld [vmem:[#allocation63_spill] sm:$0xff] }
 0x3e9   : > { %v8436_v0 = vpop.f32.mrf.mxu1  ;;  %v6375_v5 = vpop.f32.mrf.mxu0  ;;  %v5945_v1 = vadd.f32 %v11625_v11, %v5676_v55  ;;  %v12325_v10 = vld [vmem:[#allocation27_spill] sm:$0xff] }
 0x3ea   : > { %6564 = vst [vmem:[%s11734_s11 + $0x38] sm:$0xff] %v6532_v23  ;;  %v6530_v54 = vmax.f32 %v6498_v7, 0.0  ;;  %v6503_v42 = vadd.f32 %v11721_v19, %v6464_v18  ;;  %v6462_v43 = vadd.f32 %v6359_v46, %v6205_v25  ;;  %v6208_v12 = vadd.f32 %v8436_v0, %v5942_v47  ;;  %v12326_v55 = vld [vmem:[#allocation35_spill] sm:$0xff] }
 0x3eb   : > { %v6105_v20 = vpop.f32.mrf.mxu1  ;;  %v8488_v31 = vpop.f32.mrf.mxu0  ;;  %v5680_v46 = vadd.f32 %v11651_v38, %v11541_v45  ;;  %v5679_v6 = vadd.f32 %v12326_v55, %v12325_v10 }
 0x3ec   : > { %6562 = vst [vmem:[%s11734_s11 + $0x28] sm:$0xff] %v6530_v54  ;;  %v6535_v62 = vmax.f32 %v6503_v42, 0.0  ;;  %v6501_v59 = vadd.f32 %v11721_v19, %v6462_v43  ;;  %v6465_v16 = vadd.f32 %v8484_v39, %v6208_v12  ;;  %v6206_v22 = vadd.f32 %v6105_v20, %v5940_v50  ;;  %v12328_v50 = vld [vmem:[#allocation64_spill] sm:$0xff]  ;;  %v12330_v43 = vld [vmem:[#allocation65_spill] sm:$0xff] }
 0x3ed   : > { %v8439_v41 = vpop.f32.mrf.mxu1  ;;  %v6378_v35 = vpop.f32.mrf.mxu0  ;;  %v5944_v39 = vadd.f32 %v12321_v21, %v5675_v9  ;;  %v5950_v12 = vadd.f32 %v12330_v43, %v5681_v44 }
 0x3ee   : > { %6567 = vst [vmem:[%s11734_s11 + $0x50] sm:$0xff] %v6535_v62  ;;  %v6533_v33 = vmax.f32 %v6501_v59, 0.0  ;;  %v6504_v34 = vadd.f32 %v11721_v19, %v6465_v16  ;;  %v6463_v11 = vadd.f32 %v6362_v27, %v6206_v22  ;;  %v6211_v29 = vadd.f32 %v8439_v41, %v5945_v1  ;;  %v12331_v59 = vld [vmem:[#allocation30_spill] sm:$0xff]  ;;  %v12332_v16 = vld [vmem:[#allocation39_spill] sm:$0xff] }
 0x3ef   : > { %v6118_v8 = vpop.f32.mrf.mxu1  ;;  %v8491_v17 = vpop.f32.mrf.mxu0  ;;  %v5949_v27 = vadd.f32 %v12324_v60, %v5680_v46  ;;  %v5682_v22 = vadd.f32 %v12332_v16, %v12331_v59  ;;  %v12333_v41 = vld [vmem:[#allocation67_spill] sm:$0xff]  ;;  %v12334_v46 = vld [vmem:[#allocation66_spill] sm:$0xff] }
 0x3f0   : > { %6565 = vst [vmem:[%s11734_s11 + $0x40] sm:$0xff] %v6533_v33  ;;  %v6536_v28 = vmax.f32 %v6504_v34, 0.0  ;;  %v6502_v49 = vadd.f32 %v11721_v19, %v6463_v11  ;;  %v6468_v63 = vadd.f32 %v8487_v32, %v6211_v29  ;;  %v6209_v13 = vadd.f32 %v6118_v8, %v5943_v30  ;;  %v12327_v32 = vld [vmem:[#allocation76_spill] sm:$0xff]  ;;  %v12335_v8 = vld [vmem:[#allocation75_spill] sm:$0xff] }
 0x3f1   : > { %v8440_v26 = vpop.f32.mrf.mxu1  ;;  %v6391_v57 = vpop.f32.mrf.mxu0  ;;  %v5947_v23 = vadd.f32 %v12327_v32, %v5678_v56  ;;  %v5948_v30 = vadd.f32 %v12333_v41, %v5679_v6 }
 0x3f2   : > { %6568 = vst [vmem:[%s11734_s11 + $0x58] sm:$0xff] %v6536_v28  ;;  %v6534_v45 = vmax.f32 %v6502_v49, 0.0  ;;  %v6507_v38 = vadd.f32 %v11721_v19, %v6468_v63  ;;  %v6466_v58 = vadd.f32 %v6375_v5, %v6209_v13  ;;  %v6212_v37 = vadd.f32 %v8440_v26, %v5946_v15  ;;  %v12329_v5 = vld [vmem:[#allocation37_spill] sm:$0xff] }
 0x3f3   : > { %v6121_v40 = vpop.f32.mrf.mxu1  ;;  %v8492_v14 = vpop.f32.mrf.mxu0  ;;  %v5684_v54 = vadd.f32 %v12329_v5, %v12328_v50  ;;  %v5685_v15 = vadd.f32 %v12335_v8, %v12334_v46 }
 0x3f4   : > { %6566 = vst [vmem:[%s11734_s11 + $0x48] sm:$0xff] %v6534_v45  ;;  %v6539_v2 = vmax.f32 %v6507_v38, 0.0  ;;  %v6505_v53 = vadd.f32 %v11721_v19, %v6466_v58  ;;  %v6469_v52 = vadd.f32 %v8488_v31, %v6212_v37  ;;  %v6210_v4 = vadd.f32 %v6121_v40, %v5944_v39  ;;  %v12337_v39 = vld [vmem:[#allocation57_spill] sm:$0xff]  ;;  %v12338_v45 = vld [vmem:[#allocation31_spill] sm:$0xff] }
 0x3f5   : > { %v8443_v47 = vpop.f32.mrf.mxu1  ;;  %v6394_v7 = vpop.f32.mrf.mxu0  ;;  %v5683_v38 = vadd.f32 %v12338_v45, %v12337_v39 }
 0x3f6   : > { %6571 = vst [vmem:[%s11734_s11 + $0x70] sm:$0xff] %v6539_v2  ;;  %v6537_v18 = vmax.f32 %v6505_v53, 0.0  ;;  %v6508_v25 = vadd.f32 %v11721_v19, %v6469_v52  ;;  %v6467_v48 = vadd.f32 %v6378_v35, %v6210_v4  ;;  %v6215_v0 = vadd.f32 %v8443_v47, %v5949_v27  ;;  %v12340_v27 = vld [vmem:[#allocation68_spill] sm:$0xff] }
 0x3f7   : > { %v6134_v42 = vpop.f32.mrf.mxu1  ;;  %v8495_v24 = vpop.f32.mrf.mxu0  ;;  %v12341_v2 = vld [vmem:[#allocation12_spill] sm:$0xff] }
 0x3f8   : > { %6569 = vst [vmem:[%s11734_s11 + $0x60] sm:$0xff] %v6537_v18  ;;  %v6540_v20 = vmax.f32 %v6508_v25, 0.0  ;;  %v6506_v1 = vadd.f32 %v11721_v19, %v6467_v48  ;;  %v6472_v31 = vadd.f32 %v8491_v17, %v6215_v0  ;;  %v6213_v62 = vadd.f32 %v6134_v42, %v5947_v23  ;;  %v12336_v17 = vld [vmem:[#allocation69_spill] sm:$0xff]  ;;  %v12343_v23 = vld [vmem:[#allocation32_spill] sm:$0xff]  ;;  %v12344_v18 = vld [vmem:[#allocation58_spill] sm:$0xff] }
 0x3f9   : > { %v8444_v9 = vpop.f32.mrf.mxu1  ;;  %v6407_v35 = vpop.f32.mrf.mxu0  ;;  %v5953_v49 = vadd.f32 %v12336_v17, %v5684_v54  ;;  %v5688_v53 = vadd.f32 %v12341_v2, %v12340_v27  ;;  %v5686_v25 = vadd.f32 %v12344_v18, %v12343_v23 }
 0x3fa   : > { %6572 = vst [vmem:[%s11734_s11 + $0x78] sm:$0xff] %v6540_v20  ;;  %v6538_v33 = vmax.f32 %v6506_v1, 0.0  ;;  %v6511_v34 = vadd.f32 %v11721_v19, %v6472_v31  ;;  %v6470_v11 = vadd.f32 %v6391_v57, %v6213_v62  ;;  %v6216_v29 = vadd.f32 %v8444_v9, %v5950_v12  ;;  %v12339_v57 = vld [vmem:[#allocation73_spill] sm:$0xff]  ;;  %v12346_v12 = vld [vmem:[#allocation70_spill] sm:$0xff] }
 0x3fb   : > { %v6137_v28 = vpop.f32.mrf.mxu1  ;;  %v8496_v63 = vpop.f32.mrf.mxu0  ;;  %v5951_v37 = vadd.f32 %v12339_v57, %v5682_v22  ;;  %v12347_v20 = vld [vmem:[#allocation54_spill] sm:$0xff] }
 0x3fc   : > { %6570 = vst [vmem:[%s11734_s11 + $0x68] sm:$0xff] %v6538_v33  ;;  %v6543_v13 = vmax.f32 %v6511_v34, 0.0  ;;  %v6509_v56 = vadd.f32 %v11721_v19, %v6470_v11  ;;  %v6473_v26 = vadd.f32 %v8492_v14, %v6216_v29  ;;  %v6214_v21 = vadd.f32 %v6137_v28, %v5948_v30  ;;  %v12342_v14 = vld [vmem:[#allocation36_spill] sm:$0xff]  ;;  %v12349_v30 = vld [vmem:[#allocation33_spill] sm:$0xff]  ;;  %v12350_v33 = vld [vmem:[#allocation43_spill] sm:$0xff] }
 0x3fd   : > { %v8447_v58 = vpop.f32.mrf.mxu1  ;;  %v6410_v61 = vpop.f32.mrf.mxu0  ;;  %v5954_v4 = vadd.f32 %v12342_v14, %v5685_v15  ;;  %v5689_v1 = vadd.f32 %v12347_v20, %v12346_v12  ;;  %v5687_v34 = vadd.f32 %v12350_v33, %v12349_v30  ;;  %v12355_v57 = vld [vmem:[#allocation34_spill] sm:$0xff]  ;;  %v12362_v20 = vld [vmem:[#allocation23_spill] sm:$0xff] }
 0x3fe   : > { %6575 = vst [vmem:[%s11734_s11 + $0x90] sm:$0xff] %v6543_v13  ;;  %v6541_v51 = vmax.f32 %v6509_v56, 0.0  ;;  %v6512_v44 = vadd.f32 %v11721_v19, %v6473_v26  ;;  %v6471_v40 = vadd.f32 %v6394_v7, %v6214_v21  ;;  %v6219_v60 = vadd.f32 %v8447_v58, %v5953_v49  ;;  %v12345_v7 = vld [vmem:[#allocation38_spill] sm:$0xff]  ;;  %v12352_v49 = vld [vmem:[#allocation72_spill] sm:$0xff]  ;;  %v12353_v13 = vld [vmem:[#allocation25_spill] sm:$0xff] }
 0x3ff   : > { %v6150_v52 = vpop.f32.mrf.mxu1  ;;  %v8499_v10 = vpop.f32.mrf.mxu0  ;;  %v5952_v0 = vadd.f32 %v12345_v7, %v5683_v38  ;;  %v5692_v56 = vadd.f32 %v12353_v13, %v12352_v49  ;;  %v12358_v14 = vld [vmem:[#allocation74_spill] sm:$0xff] }
 0x400   : > { %6573 = vst [vmem:[%s11734_s11 + $0x80] sm:$0xff] %v6541_v51  ;;  %v6544_v55 = vmax.f32 %v6512_v44, 0.0  ;;  %v6510_v6 = vadd.f32 %v11721_v19, %v6471_v40  ;;  %v6476_v47 = vadd.f32 %v8495_v24, %v6219_v60  ;;  %v6217_v32 = vadd.f32 %v6150_v52, %v5951_v37  ;;  %v12348_v24 = vld [vmem:[#allocation40_spill] sm:$0xff] }
 0x401   : > { %v8448_v48 = vpop.f32.mrf.mxu1  ;;  %v6423_v50 = vpop.f32.mrf.mxu0  ;;  %v5957_v62 = vadd.f32 %v12348_v24, %v5688_v53  ;;  %v12356_v37 = vld [vmem:[#allocation60_spill] sm:$0xff] }
 0x402   : > { %6576 = vst [vmem:[%s11734_s11 + $0x98] sm:$0xff] %v6544_v55  ;;  %v6542_v5 = vmax.f32 %v6510_v6, 0.0  ;;  %v6515_v54 = vadd.f32 %v11721_v19, %v6476_v47  ;;  %v6474_v42 = vadd.f32 %v6407_v35, %v6217_v32  ;;  %v6220_v43 = vadd.f32 %v8448_v48, %v5954_v4  ;;  %v12351_v35 = vld [vmem:[#allocation77_spill] sm:$0xff] }
 0x403   : > { %v6153_v31 = vpop.f32.mrf.mxu1  ;;  %v8500_v59 = vpop.f32.mrf.mxu0  ;;  %v5955_v29 = vadd.f32 %v12351_v35, %v5686_v25  ;;  %v5690_v51 = vadd.f32 %v12356_v37, %v12355_v57  ;;  %v5693_v4 = vadd.f32 %v11706_v36, %v12358_v14  ;;  %v12360_v25 = vld [vmem:[#allocation59_spill] sm:$0xff] }
 0x404   : > { %6574 = vst [vmem:[%s11734_s11 + $0x88] sm:$0xff] %v6542_v5  ;;  %v6547_v16 = vmax.f32 %v6515_v54, 0.0  ;;  %v6513_v22 = vadd.f32 %v11721_v19, %v6474_v42  ;;  %v6477_v9 = vadd.f32 %v8496_v63, %v6220_v43  ;;  %v6218_v41 = vadd.f32 %v6153_v31, %v5952_v0  ;;  %v12354_v63 = vld [vmem:[#allocation29_spill] sm:$0xff] }
 0x405   : > { %v8451_v11 = vpop.f32.mrf.mxu1  ;;  %v6426_v46 = vpop.f32.mrf.mxu0  ;;  %v5958_v21 = vadd.f32 %v12354_v63, %v5689_v1  ;;  %v5691_v48 = vadd.f32 %v11709_v3, %v12360_v25  ;;  %v5962_v1 = vadd.f32 %v12362_v20, %v5693_v4 }
 0x406   : > { %6579 = vst [vmem:[%s11734_s11 + $0xb0] sm:$0xff] %v6547_v16  ;;  %v6545_v8 = vmax.f32 %v6513_v22, 0.0  ;;  %v6516_v15 = vadd.f32 %v11721_v19, %v6477_v9  ;;  %v6475_v28 = vadd.f32 %v6410_v61, %v6218_v41  ;;  %v6223_v17 = vadd.f32 %v8451_v11, %v5957_v62  ;;  %v12357_v61 = vld [vmem:[#allocation20_spill] sm:$0xff]  ;;  %v12363_v22 = vld [vmem:[#allocation45_spill] sm:$0xff] }
 0x407   : > { %v6166_v26 = vpop.f32.mrf.mxu1  ;;  %v8503_v40 = vpop.f32.mrf.mxu0  ;;  %v5956_v60 = vadd.f32 %v12357_v61, %v5687_v34  ;;  %v5960_v9 = vadd.f32 %v12363_v22, %v5691_v48 }
 0x408   : > { %6577 = vst [vmem:[%s11734_s11 + $0xa0] sm:$0xff] %v6545_v8  ;;  %v6548_v39 = vmax.f32 %v6516_v15, 0.0  ;;  %v6514_v45 = vadd.f32 %v11721_v19, %v6475_v28  ;;  %v6480_v38 = vadd.f32 %v8499_v10, %v6223_v17  ;;  %v6221_v58 = vadd.f32 %v6166_v26, %v5955_v29  ;;  %v12359_v10 = vld [vmem:[#allocation28_spill] sm:$0xff] }
 0x409   : > { %v8452_v44 = vpop.f32.mrf.mxu1  ;;  %v5961_v6 = vadd.f32 %v12359_v10, %v5692_v56  ;;  %v6439_v7 = vpop.f32.mrf.mxu0 }
 0x40a   : > { %6580 = vst [vmem:[%s11734_s11 + $0xb8] sm:$0xff] %v6548_v39  ;;  %v6546_v27 = vmax.f32 %v6514_v45, 0.0  ;;  %v6519_v2 = vadd.f32 %v11721_v19, %v6480_v38  ;;  %v6478_v53 = vadd.f32 %v6423_v50, %v6221_v58  ;;  %v6224_v52 = vadd.f32 %v8452_v44, %v5958_v21  ;;  %v12361_v50 = vld [vmem:[#allocation18_spill] sm:$0xff] }
 0x40b   : > { %v6169_v55 = vpop.f32.mrf.mxu1  ;;  %v5959_v5 = vadd.f32 %v12361_v50, %v5690_v51 }
 0x40c   : > { %6578 = vst [vmem:[%s11734_s11 + $0xa8] sm:$0xff] %v6546_v27  ;;  %v6551_v47 = vmax.f32 %v6519_v2, 0.0  ;;  %v6517_v32 = vadd.f32 %v11721_v19, %v6478_v53  ;;  %v6481_v23 = vadd.f32 %v8500_v59, %v6224_v52  ;;  %v6222_v18 = vadd.f32 %v6169_v55, %v5956_v60  ;;  %v8504_v59 = vpop.f32.mrf.mxu0 }
 0x40d   : > { %v8455_v0 = vpop.f32.mrf.mxu1 }
 0x40e   : > { %6583 = vst [vmem:[%s11734_s11 + $0xd0] sm:$0xff] %v6551_v47  ;;  %v6549_v36 = vmax.f32 %v6517_v32, 0.0  ;;  %v6520_v54 = vadd.f32 %v11721_v19, %v6481_v23  ;;  %v6479_v42 = vadd.f32 %v6426_v46, %v6222_v18  ;;  %v6227_v43 = vadd.f32 %v8455_v0, %v5961_v6  ;;  %v6442_v15 = vpop.f32.mrf.mxu0 }
 0x40f   : > { %v6182_v12 = vpop.f32.mrf.mxu1 }
 0x410   : > { %6581 = vst [vmem:[%s11734_s11 + $0xc0] sm:$0xff] %v6549_v36  ;;  %v6552_v31 = vmax.f32 %v6520_v54, 0.0  ;;  %v6518_v24 = vadd.f32 %v11721_v19, %v6479_v42  ;;  %v6484_v3 = vadd.f32 %v8503_v40, %v6227_v43  ;;  %v6225_v62 = vadd.f32 %v6182_v12, %v5959_v5 }
 0x411   : > { %v8456_v16 = vpop.f32.mrf.mxu1 }
 0x412   : > { %6584 = vst [vmem:[%s11734_s11 + $0xd8] sm:$0xff] %v6552_v31  ;;  %v6550_v41 = vmax.f32 %v6518_v24, 0.0  ;;  %v6523_v30 = vadd.f32 %v11721_v19, %v6484_v3  ;;  %v6482_v33 = vadd.f32 %v6439_v7, %v6225_v62  ;;  %v6228_v34 = vadd.f32 %v8456_v16, %v5962_v1 }
 0x413   : > { %v6185_v11 = vpop.f32.mrf.mxu1 }
 0x414   : > { %6582 = vst [vmem:[%s11734_s11 + $0xc8] sm:$0xff] %v6550_v41  ;;  %v6555_v35 = vmax.f32 %v6523_v30, 0.0  ;;  %v6521_v29 = vadd.f32 %v11721_v19, %v6482_v33  ;;  %v6485_v46 = vadd.f32 %v8504_v59, %v6228_v34  ;;  %v6226_v8 = vadd.f32 %v6185_v11, %v5960_v9 }
 0x416   : > { %6587 = vst [vmem:[%s11734_s11 + $0xf0] sm:$0xff] %v6555_v35  ;;  %v6553_v28 = vmax.f32 %v6521_v29, 0.0  ;;  %v6524_v17 = vadd.f32 %v11721_v19, %v6485_v46  ;;  %v6483_v49 = vadd.f32 %v6442_v15, %v6226_v8 }
 0x418   : > { %6585 = vst [vmem:[%s11734_s11 + $0xe0] sm:$0xff] %v6553_v28  ;;  %v6556_v13 = vmax.f32 %v6524_v17, 0.0  ;;  %v6522_v56 = vadd.f32 %v11721_v19, %v6483_v49 }
 0x41a   : > { %6588 = vst [vmem:[%s11734_s11 + $0xf8] sm:$0xff] %v6556_v13  ;;  %v6554_v26 = vmax.f32 %v6522_v56, 0.0 }
 0x41c   : > { %6586 = vst [vmem:[%s11734_s11 + $0xe8] sm:$0xff] %v6554_v26 }
 0x41d PF: > { %s16_s21 = sadd.s32 1, %s8717_s21  }
 0x41e   : > { %p13_p4 = scmp.ge.s32.totalorder %s16_s21, 4  }
 0x420   :  { %15 = sbr.rel (!%p13_p4) target bundleno = 1 (0x1), region = 91 }

</bundles_post_ra>
